<compile_context>
chip_gen: v7x
topology: tpu7x:2x2x1
jax: 0.10.0
libtpu: 0.0.40
codegen_flags: <defaults>
</compile_context>

<pallas_src>
import functools

import jax
import jax.numpy as jnp
import numpy as np
from jax.experimental import pallas as pl
from jax.experimental.pallas import tpu as pltpu


# ----------------------------------------------------------------------------
# Host-side weight lowering (runs once, outside the hot path)
# ----------------------------------------------------------------------------
def _lower_conv_weight_np(w_hwio, W, src_channels, kh_total=None):
    """Lower an HWIO conv weight to a (kh_total*W*Cin, W*Cout) row-matmul matrix.

    Activations are lane-packed as A[n, h, w*C + c]; a stride-1 'same' conv
    becomes, per output row (n, h):

        out_row = concat_kh( concat_src( in_row[n, h + kh - ph, :] ) ) @ L

    The KW taps and the zero padding along W are folded into L, so the kernel
    only does KH sublane shifts and one MXU contraction per conv.
    `src_channels` gives the channel widths of the concatenated input sources
    (torch.cat order).  If kh_total > KH the KH taps are centered inside the
    kh_total row space (zero rows elsewhere) so weights built for different KH
    can share a single patch / fused matmul.
    """
    w_np = np.asarray(w_hwio, dtype=np.float32)
    KH, KW, Cin, Cout = w_np.shape
    assert sum(src_channels) == Cin
    if kh_total is None:
        kh_total = KH
    kh_off = (kh_total - KH) // 2
    pw = KW // 2
    w_in = np.arange(W)[:, None]
    w_out = np.arange(W)[None, :]
    kw = w_in - w_out + pw                        # (W_in, W_out)
    valid = (kw >= 0) & (kw < KW)
    kw_c = np.clip(kw, 0, KW - 1)

    parts = []
    coff = 0
    for cs in src_channels:
        wc = w_np[:, :, coff:coff + cs, :]        # (KH, KW, cs, Cout)
        low = wc[:, kw_c, :, :]                   # (KH, W_in, W_out, cs, Cout)
        low = low * valid[None, :, :, None, None]
        low = np.transpose(low, (0, 1, 3, 2, 4))  # (KH, W_in, cs, W_out, Cout)
        parts.append(low.reshape(KH, W * cs, W * Cout))
        coff += cs
    per_kh = np.concatenate(parts, axis=1)        # (KH, W*Cin, W*Cout)
    full = np.zeros((kh_total, W * Cin, W * Cout), np.float32)
    full[kh_off:kh_off + KH] = per_kh
    return full.reshape(kh_total * W * Cin, W * Cout)


def _tile_bias(b, W):
    return np.tile(np.asarray(b, np.float32), W)


def _lower_fused_pair_np(w5, b5, w3, b3, W, src_channels):
    """Fuse a 5x5 / 3x3 branch pair into one matmul.

    The 3x3 lowered weight is zero-embedded into the KH=5 row space (rows
    kh in {1,2,3}) and concatenated along the output columns, so one
    (M, 5*W*Cin) x (5*W*Cin, W*(Cout5+Cout3)) matmul produces the lane-block
    concat [P | S] directly (matching torch.cat([P, S], 1) row order).
    """
    L5 = _lower_conv_weight_np(w5, W, src_channels, kh_total=5)
    L3 = _lower_conv_weight_np(w3, W, src_channels, kh_total=5)
    L = np.concatenate([L5, L3], axis=1)
    b = np.concatenate([_tile_bias(b5, W), _tile_bias(b3, W)])
    return L, b


def prepare_msrnet_inputs(params, *, H, W, C, num_blocks):
    """Lowered (bf16 weight, f32 bias-row) lists in kernel consumption order."""
    weights, biases = [], []

    def add(lw, b):
        weights.append(jnp.asarray(lw, jnp.bfloat16))
        biases.append(jnp.asarray(np.asarray(b, np.float32)[None, :]))

    add(_lower_conv_weight_np(params['conv1_w'], W, [1]),
        _tile_bias(params['conv1_b'], W))
    for bp in params['blocks']:
        lw, b = _lower_fused_pair_np(bp['w5_1'], bp['b5_1'],
                                     bp['w3_1'], bp['b3_1'], W, [C])
        add(lw, b)
        lw, b = _lower_fused_pair_np(bp['w5_2'], bp['b5_2'],
                                     bp['w3_2'], bp['b3_2'], W, [C, C])
        add(lw, b)
        add(_lower_conv_weight_np(bp['w_bn'], W, [2 * C, 2 * C]),
            _tile_bias(bp['b_bn'], W))
    add(_lower_conv_weight_np(params['ff_w'], W, [C] * (num_blocks + 1)),
        _tile_bias(params['ff_b'], W))
    add(_lower_conv_weight_np(params['conv2_w'], W, [C]),
        _tile_bias(params['conv2_b'], W))

    # AdaptiveAvgPool2d(1) + flatten + Linear folded into one lane-packed
    # matmul: FC_low[w*C + c, k] = fc_w[c, k] / (H*W).  Output columns are
    # zero-padded to 128 so the final store is lane-dense.
    fc_w = np.asarray(params['fc_w'], np.float32)               # (C, 10)
    n_cls = fc_w.shape[1]
    fc_low = np.zeros((W * C, 128), np.float32)
    fc_low[:, :n_cls] = np.tile(fc_w, (W, 1)) / float(H * W)
    fc_b = np.zeros((128,), np.float32)
    fc_b[:n_cls] = np.asarray(params['fc_b'], np.float32)
    add(fc_low, fc_b)
    return weights, biases


# ----------------------------------------------------------------------------
# The fused kernel: whole MSRNet_2D forward in one pallas_call
# ----------------------------------------------------------------------------
def _msrnet_kernel(*refs, num_blocks, n_weights):
    nw = n_weights
    x_ref, a_ref = refs[0], refs[1]
    b_refs = refs[2:2 + nw]                     # bias rows (VMEM, f32)
    whbm_refs = refs[2 + nw:2 + 2 * nw]         # lowered weights (HBM, bf16)
    out_ref = refs[2 + 2 * nw]
    wvmem_refs = refs[3 + 2 * nw:3 + 3 * nw]    # VMEM weight scratch (bf16)
    dma_sem = refs[3 + 3 * nw]

    # Fire every weight HBM->VMEM DMA immediately (consumption order) so
    # late-stage weight loads overlap with early-stage compute; each conv
    # only waits on its own weight right before the matmul.
    copies = [pltpu.make_async_copy(whbm_refs[i], wvmem_refs[i], dma_sem.at[i])
              for i in range(nw)]
    for cp in copies:
        cp.start()

    counter = iter(range(nw))

    def conv(srcs, KH, relu):
        """Stride-1 'same' conv as one MXU matmul on lane-packed rows.

        srcs: lane-packed (N, H, lanes) values whose lane-wise concat (per kh,
        source-minor) matches the lowered-weight row order.
        """
        i = next(counter)
        copies[i].wait()
        lw_ref, b_ref = wvmem_refs[i], b_refs[i]
        n, h = srcs[0].shape[0], srcs[0].shape[1]
        ph = KH // 2
        padded = []
        for s in srcs:
            if ph > 0:
                z = jnp.zeros((n, ph, s.shape[-1]), jnp.float32)
                padded.append(jnp.concatenate([z, s, z], axis=1))
            else:
                padded.append(s)
        pieces = []
        for kh in range(KH):                 # kh-major, source-minor order:
            for sp in padded:                # must match lowered-weight rows
                pieces.append(sp[:, kh:kh + h, :].reshape(n * h, sp.shape[-1]))
        patch = pieces[0] if len(pieces) == 1 else jnp.concatenate(pieces, axis=-1)
        out = jnp.dot(patch.astype(jnp.bfloat16), lw_ref[...],
                      preferred_element_type=jnp.float32)
        out = out + b_ref[...]
        if relu:
            out = jnp.maximum(out, 0.0)
        return out.reshape(n, h, b_ref.shape[-1])

    # conv1 + PReLU epilogue
    x = x_ref[...]
    out = conv([x], 3, relu=False)
    a = a_ref[0, 0]
    out = jnp.where(out >= 0.0, out, a * out)

    # Multi-scale residual blocks: each 5x5/3x3 branch pair is ONE fused
    # matmul whose [P|S] lane-block output is already the channel-concat the
    # next stage expects (torch.cat never materialized).
    block_outputs = [out]
    cur = out
    for _ in range(num_blocks):
        ps1 = conv([cur], 5, relu=True)       # fused [P1 | S1]  (N,H,2*W*C)
        ps2 = conv([ps1], 5, relu=True)       # fused [P2 | S2]  (N,H,4*W*C)
        s = conv([ps2], 1, relu=False)        # bottleneck       (N,H,W*C)
        cur = cur + s                         # residual add, in-register
        block_outputs.append(cur)

    # Feature fusion (1x1 over all block outputs) + conv2
    fused = conv(block_outputs, 1, relu=False)
    y = conv([fused], 3, relu=False)          # (N, H, W*C)

    # Global average pool + FC: sublane-sum over H, then one matmul whose
    # lowered weight carries the per-channel FC rows, 1/(H*W), and 128-lane
    # zero padding (lane-dense store).
    i = next(counter)
    copies[i].wait()
    pooled = jnp.sum(y, axis=1)               # (N, W*C)
    logits = jnp.dot(pooled.astype(jnp.bfloat16), wvmem_refs[i][...],
                     preferred_element_type=jnp.float32)
    out_ref[...] = logits + b_refs[i][...]


def build_msrnet_pallas(params, *, N, H, W, C, num_blocks):
    weights, biases = prepare_msrnet_inputs(params, H=H, W=W, C=C,
                                            num_blocks=num_blocks)
    nw = len(weights)
    prelu_a = jnp.reshape(jnp.asarray(params['prelu_a'], jnp.float32), (1, 1))

    kernel = functools.partial(_msrnet_kernel, num_blocks=num_blocks,
                               n_weights=nw)
    vmem = pltpu.MemorySpace.VMEM
    smem = pltpu.MemorySpace.SMEM
    in_specs = ([pl.BlockSpec(memory_space=vmem),        # lane-packed input
                 pl.BlockSpec(memory_space=smem)]         # PReLU slope
                + [pl.BlockSpec(memory_space=vmem)] * nw   # bias rows
                + [pl.BlockSpec(memory_space=pl.ANY)] * nw)  # weights stay in HBM
    scratch_shapes = ([pltpu.VMEM(w.shape, jnp.bfloat16) for w in weights]
                      + [pltpu.SemaphoreType.DMA((nw,))])

    fwd = pl.pallas_call(
        kernel,
        out_shape=jax.ShapeDtypeStruct((N, 128), jnp.float32),
        in_specs=in_specs,
        out_specs=pl.BlockSpec(memory_space=vmem),
        scratch_shapes=scratch_shapes,
        compiler_params=pltpu.CompilerParams(vmem_limit_bytes=32 * 1024 * 1024),
    )

    def run(x_packed):
        # x_packed: (N, H, W) == lane-packed (N, H, W*Cin) with Cin=1.
        out = fwd(x_packed, prelu_a, *biases, *weights)
        return out[:, :10]

    return run


# ----------------------------------------------------------------------------
# Pure-JAX reference (for correctness check only)
# ----------------------------------------------------------------------------
def _conv_ref(x, w, b, relu):
    out = jax.lax.conv_general_dilated(
        x, w, window_strides=(1, 1), padding='SAME',
        dimension_numbers=('NHWC', 'HWIO', 'NHWC'))
    out = out + b
    return jnp.maximum(out, 0.0) if relu else out


def msrnet_ref(x, params):
    a = params['prelu_a']
    out = _conv_ref(x, params['conv1_w'], params['conv1_b'], False)
    out = jnp.where(out >= 0.0, out, a * out)
    block_outputs = [out]
    for bp in params['blocks']:
        P1 = _conv_ref(out, bp['w5_1'], bp['b5_1'], True)
        S1 = _conv_ref(out, bp['w3_1'], bp['b3_1'], True)
        c1 = jnp.concatenate([P1, S1], -1)
        P2 = _conv_ref(c1, bp['w5_2'], bp['b5_2'], True)
        S2 = _conv_ref(c1, bp['w3_2'], bp['b3_2'], True)
        S = _conv_ref(jnp.concatenate([P2, S2], -1), bp['w_bn'], bp['b_bn'], False)
        out = out + S
        block_outputs.append(out)
    fused = _conv_ref(jnp.concatenate(block_outputs, -1),
                      params['ff_w'], params['ff_b'], False)
    out = _conv_ref(fused, params['conv2_w'], params['conv2_b'], False)
    pooled = jnp.mean(out, axis=(1, 2))
    return pooled @ params['fc_w'] + params['fc_b']


# ----------------------------------------------------------------------------
# Deterministic parameter init (shapes match MSRNet_2D.__init__, HWIO layout)
# ----------------------------------------------------------------------------
def init_params(key, num_blocks, C):
    std = 0.1
    keys = iter(jax.random.split(key, 128))

    def rnd(shape):
        return std * jax.random.normal(next(keys), shape, jnp.float32)

    params = {
        'conv1_w': rnd((3, 3, 1, C)), 'conv1_b': rnd((C,)),
        'prelu_a': jnp.array(0.25, jnp.float32),
        'blocks': [],
        'ff_w': rnd((1, 1, C * (num_blocks + 1), C)), 'ff_b': rnd((C,)),
        'conv2_w': rnd((3, 3, C, C)), 'conv2_b': rnd((C,)),
        'fc_w': rnd((C, 10)), 'fc_b': rnd((10,)),
    }
    for _ in range(num_blocks):
        params['blocks'].append({
            'w5_1': rnd((5, 5, C, C)), 'b5_1': rnd((C,)),
            'w3_1': rnd((3, 3, C, C)), 'b3_1': rnd((C,)),
            'w5_2': rnd((5, 5, 2 * C, 2 * C)), 'b5_2': rnd((2 * C,)),
            'w3_2': rnd((3, 3, 2 * C, 2 * C)), 'b3_2': rnd((2 * C,)),
            'w_bn': rnd((1, 1, 4 * C, C)), 'b_bn': rnd((C,)),
        })
    return params


if __name__ == "__main__":
    key = jax.random.PRNGKey(0)
    kx, kp = jax.random.split(key)

    N, H, W = 2, 16, 16          # input_size = 16
    C, num_blocks = 8, 2         # block_channels = 8, num_blocks = 2

    # PyTorch input is NCHW (N, 1, H, W).
    x_nchw = jax.random.normal(kx, (N, 1, H, W), jnp.float32)
    params = init_params(kp, num_blocks, C)

    run = build_msrnet_pallas(params, N=N, H=H, W=W, C=C, num_blocks=num_blocks)

    # Lane-packed kernel input (N, H, W*Cin) with Cin=1.
    x_packed = x_nchw[:, 0, :, :]
    out = jax.block_until_ready(run(x_packed))
    assert out.shape == (N, 10)

    # Reference uses standard NHWC conv on the same HWIO weights (f32); the
    # kernel uses bf16 MXU inputs, so the tolerance is loosened accordingly.
    x_nhwc = jnp.transpose(x_nchw, (0, 2, 3, 1))
    ref = msrnet_ref(x_nhwc, params)
    np.testing.assert_allclose(np.asarray(out), np.asarray(ref),
                               atol=5e-2, rtol=5e-2)
    print("KERNEL_OK")
</pallas_src>

<mosaic_0001>
module attributes {stable_mosaic.version = 11 : i64} {
  func.func @_msrnet_kernel(%arg0: memref<2x16x16xf32, #tpu.memory_space<vmem>>, %arg1: memref<1x1xf32, #tpu.memory_space<smem>>, %arg2: memref<1x128xf32, #tpu.memory_space<vmem>>, %arg3: memref<1x256xf32, #tpu.memory_space<vmem>>, %arg4: memref<1x512xf32, #tpu.memory_space<vmem>>, %arg5: memref<1x128xf32, #tpu.memory_space<vmem>>, %arg6: memref<1x256xf32, #tpu.memory_space<vmem>>, %arg7: memref<1x512xf32, #tpu.memory_space<vmem>>, %arg8: memref<1x128xf32, #tpu.memory_space<vmem>>, %arg9: memref<1x128xf32, #tpu.memory_space<vmem>>, %arg10: memref<1x128xf32, #tpu.memory_space<vmem>>, %arg11: memref<1x128xf32, #tpu.memory_space<vmem>>, %arg12: memref<48x128xbf16, #tpu.memory_space<any>>, %arg13: memref<640x256xbf16, #tpu.memory_space<any>>, %arg14: memref<1280x512xbf16, #tpu.memory_space<any>>, %arg15: memref<512x128xbf16, #tpu.memory_space<any>>, %arg16: memref<640x256xbf16, #tpu.memory_space<any>>, %arg17: memref<1280x512xbf16, #tpu.memory_space<any>>, %arg18: memref<512x128xbf16, #tpu.memory_space<any>>, %arg19: memref<384x128xbf16, #tpu.memory_space<any>>, %arg20: memref<384x128xbf16, #tpu.memory_space<any>>, %arg21: memref<128x128xbf16, #tpu.memory_space<any>>, %arg22: memref<2x128xf32, #tpu.memory_space<vmem>>, %arg23: memref<48x128xbf16, #tpu.memory_space<vmem>>, %arg24: memref<640x256xbf16, #tpu.memory_space<vmem>>, %arg25: memref<1280x512xbf16, #tpu.memory_space<vmem>>, %arg26: memref<512x128xbf16, #tpu.memory_space<vmem>>, %arg27: memref<640x256xbf16, #tpu.memory_space<vmem>>, %arg28: memref<1280x512xbf16, #tpu.memory_space<vmem>>, %arg29: memref<512x128xbf16, #tpu.memory_space<vmem>>, %arg30: memref<384x128xbf16, #tpu.memory_space<vmem>>, %arg31: memref<384x128xbf16, #tpu.memory_space<vmem>>, %arg32: memref<128x128xbf16, #tpu.memory_space<vmem>>, %arg33: memref<10x!tpu.dma_semaphore, #tpu.memory_space<semaphore_mem>>) attributes {dimension_semantics = [], scalar_prefetch = 0 : i64, scratch_operands = 11 : i64, tpu.core_type = #tpu.core_type<tc>} {
    %c0_i32 = arith.constant 0 : i32
    %0 = tpu.memref_slice %arg33[%c0_i32] : memref<10x!tpu.dma_semaphore, #tpu.memory_space<semaphore_mem>> -> memref<1x!tpu.dma_semaphore, #tpu.memory_space<semaphore_mem>>
    %1 = tpu.memref_squeeze %0 : memref<1x!tpu.dma_semaphore, #tpu.memory_space<semaphore_mem>> -> memref<!tpu.dma_semaphore, #tpu.memory_space<semaphore_mem>>
    tpu.enqueue_dma source(%arg12 : memref<48x128xbf16, #tpu.memory_space<any>>) target(%arg23 : memref<48x128xbf16, #tpu.memory_space<vmem>>) target_semaphore(%1 : memref<!tpu.dma_semaphore, #tpu.memory_space<semaphore_mem>>)
    %c1_i32 = arith.constant 1 : i32
    %2 = tpu.memref_slice %arg33[%c1_i32] : memref<10x!tpu.dma_semaphore, #tpu.memory_space<semaphore_mem>> -> memref<1x!tpu.dma_semaphore, #tpu.memory_space<semaphore_mem>>
    %3 = tpu.memref_squeeze %2 : memref<1x!tpu.dma_semaphore, #tpu.memory_space<semaphore_mem>> -> memref<!tpu.dma_semaphore, #tpu.memory_space<semaphore_mem>>
    tpu.enqueue_dma source(%arg13 : memref<640x256xbf16, #tpu.memory_space<any>>) target(%arg24 : memref<640x256xbf16, #tpu.memory_space<vmem>>) target_semaphore(%3 : memref<!tpu.dma_semaphore, #tpu.memory_space<semaphore_mem>>)
    %c2_i32 = arith.constant 2 : i32
    %4 = tpu.memref_slice %arg33[%c2_i32] : memref<10x!tpu.dma_semaphore, #tpu.memory_space<semaphore_mem>> -> memref<1x!tpu.dma_semaphore, #tpu.memory_space<semaphore_mem>>
    %5 = tpu.memref_squeeze %4 : memref<1x!tpu.dma_semaphore, #tpu.memory_space<semaphore_mem>> -> memref<!tpu.dma_semaphore, #tpu.memory_space<semaphore_mem>>
    tpu.enqueue_dma source(%arg14 : memref<1280x512xbf16, #tpu.memory_space<any>>) target(%arg25 : memref<1280x512xbf16, #tpu.memory_space<vmem>>) target_semaphore(%5 : memref<!tpu.dma_semaphore, #tpu.memory_space<semaphore_mem>>)
    %c3_i32 = arith.constant 3 : i32
    %6 = tpu.memref_slice %arg33[%c3_i32] : memref<10x!tpu.dma_semaphore, #tpu.memory_space<semaphore_mem>> -> memref<1x!tpu.dma_semaphore, #tpu.memory_space<semaphore_mem>>
    %7 = tpu.memref_squeeze %6 : memref<1x!tpu.dma_semaphore, #tpu.memory_space<semaphore_mem>> -> memref<!tpu.dma_semaphore, #tpu.memory_space<semaphore_mem>>
    tpu.enqueue_dma source(%arg15 : memref<512x128xbf16, #tpu.memory_space<any>>) target(%arg26 : memref<512x128xbf16, #tpu.memory_space<vmem>>) target_semaphore(%7 : memref<!tpu.dma_semaphore, #tpu.memory_space<semaphore_mem>>)
    %c4_i32 = arith.constant 4 : i32
    %8 = tpu.memref_slice %arg33[%c4_i32] : memref<10x!tpu.dma_semaphore, #tpu.memory_space<semaphore_mem>> -> memref<1x!tpu.dma_semaphore, #tpu.memory_space<semaphore_mem>>
    %9 = tpu.memref_squeeze %8 : memref<1x!tpu.dma_semaphore, #tpu.memory_space<semaphore_mem>> -> memref<!tpu.dma_semaphore, #tpu.memory_space<semaphore_mem>>
    tpu.enqueue_dma source(%arg16 : memref<640x256xbf16, #tpu.memory_space<any>>) target(%arg27 : memref<640x256xbf16, #tpu.memory_space<vmem>>) target_semaphore(%9 : memref<!tpu.dma_semaphore, #tpu.memory_space<semaphore_mem>>)
    %c5_i32 = arith.constant 5 : i32
    %10 = tpu.memref_slice %arg33[%c5_i32] : memref<10x!tpu.dma_semaphore, #tpu.memory_space<semaphore_mem>> -> memref<1x!tpu.dma_semaphore, #tpu.memory_space<semaphore_mem>>
    %11 = tpu.memref_squeeze %10 : memref<1x!tpu.dma_semaphore, #tpu.memory_space<semaphore_mem>> -> memref<!tpu.dma_semaphore, #tpu.memory_space<semaphore_mem>>
    tpu.enqueue_dma source(%arg17 : memref<1280x512xbf16, #tpu.memory_space<any>>) target(%arg28 : memref<1280x512xbf16, #tpu.memory_space<vmem>>) target_semaphore(%11 : memref<!tpu.dma_semaphore, #tpu.memory_space<semaphore_mem>>)
    %c6_i32 = arith.constant 6 : i32
    %12 = tpu.memref_slice %arg33[%c6_i32] : memref<10x!tpu.dma_semaphore, #tpu.memory_space<semaphore_mem>> -> memref<1x!tpu.dma_semaphore, #tpu.memory_space<semaphore_mem>>
    %13 = tpu.memref_squeeze %12 : memref<1x!tpu.dma_semaphore, #tpu.memory_space<semaphore_mem>> -> memref<!tpu.dma_semaphore, #tpu.memory_space<semaphore_mem>>
    tpu.enqueue_dma source(%arg18 : memref<512x128xbf16, #tpu.memory_space<any>>) target(%arg29 : memref<512x128xbf16, #tpu.memory_space<vmem>>) target_semaphore(%13 : memref<!tpu.dma_semaphore, #tpu.memory_space<semaphore_mem>>)
    %c7_i32 = arith.constant 7 : i32
    %14 = tpu.memref_slice %arg33[%c7_i32] : memref<10x!tpu.dma_semaphore, #tpu.memory_space<semaphore_mem>> -> memref<1x!tpu.dma_semaphore, #tpu.memory_space<semaphore_mem>>
    %15 = tpu.memref_squeeze %14 : memref<1x!tpu.dma_semaphore, #tpu.memory_space<semaphore_mem>> -> memref<!tpu.dma_semaphore, #tpu.memory_space<semaphore_mem>>
    tpu.enqueue_dma source(%arg19 : memref<384x128xbf16, #tpu.memory_space<any>>) target(%arg30 : memref<384x128xbf16, #tpu.memory_space<vmem>>) target_semaphore(%15 : memref<!tpu.dma_semaphore, #tpu.memory_space<semaphore_mem>>)
    %c8_i32 = arith.constant 8 : i32
    %16 = tpu.memref_slice %arg33[%c8_i32] : memref<10x!tpu.dma_semaphore, #tpu.memory_space<semaphore_mem>> -> memref<1x!tpu.dma_semaphore, #tpu.memory_space<semaphore_mem>>
    %17 = tpu.memref_squeeze %16 : memref<1x!tpu.dma_semaphore, #tpu.memory_space<semaphore_mem>> -> memref<!tpu.dma_semaphore, #tpu.memory_space<semaphore_mem>>
    tpu.enqueue_dma source(%arg20 : memref<384x128xbf16, #tpu.memory_space<any>>) target(%arg31 : memref<384x128xbf16, #tpu.memory_space<vmem>>) target_semaphore(%17 : memref<!tpu.dma_semaphore, #tpu.memory_space<semaphore_mem>>)
    %c9_i32 = arith.constant 9 : i32
    %18 = tpu.memref_slice %arg33[%c9_i32] : memref<10x!tpu.dma_semaphore, #tpu.memory_space<semaphore_mem>> -> memref<1x!tpu.dma_semaphore, #tpu.memory_space<semaphore_mem>>
    %19 = tpu.memref_squeeze %18 : memref<1x!tpu.dma_semaphore, #tpu.memory_space<semaphore_mem>> -> memref<!tpu.dma_semaphore, #tpu.memory_space<semaphore_mem>>
    tpu.enqueue_dma source(%arg21 : memref<128x128xbf16, #tpu.memory_space<any>>) target(%arg32 : memref<128x128xbf16, #tpu.memory_space<vmem>>) target_semaphore(%19 : memref<!tpu.dma_semaphore, #tpu.memory_space<semaphore_mem>>)
    %c0 = arith.constant 0 : index
    %c0_0 = arith.constant 0 : index
    %c0_1 = arith.constant 0 : index
    %20 = vector.load %arg0[%c0, %c0_0, %c0_1] : memref<2x16x16xf32, #tpu.memory_space<vmem>>, vector<2x16x16xf32>
    %c0_i32_2 = arith.constant 0 : i32
    %21 = tpu.memref_slice %arg33[%c0_i32_2] : memref<10x!tpu.dma_semaphore, #tpu.memory_space<semaphore_mem>> -> memref<1x!tpu.dma_semaphore, #tpu.memory_space<semaphore_mem>>
    %22 = tpu.memref_squeeze %21 : memref<1x!tpu.dma_semaphore, #tpu.memory_space<semaphore_mem>> -> memref<!tpu.dma_semaphore, #tpu.memory_space<semaphore_mem>>
    tpu.wait_dma2 semaphore(%22 : memref<!tpu.dma_semaphore, #tpu.memory_space<semaphore_mem>>) src(%arg12 : memref<48x128xbf16, #tpu.memory_space<any>>) dst(%arg23 : memref<48x128xbf16, #tpu.memory_space<vmem>>)
    %cst = arith.constant 0.000000e+00 : f32
    %23 = vector.broadcast %cst : f32 to vector<2x1x16xf32>
    %24 = tpu.concatenate %23, %20, %23 in 1 : vector<2x1x16xf32>, vector<2x16x16xf32>, vector<2x1x16xf32> -> vector<2x18x16xf32>
    %25 = vector.extract_strided_slice %24 {offsets = [0, 0, 0], sizes = [2, 16, 16], strides = [1, 1, 1]} : vector<2x18x16xf32> to vector<2x16x16xf32>
    %26 = vector.shape_cast %25 : vector<2x16x16xf32> to vector<32x16xf32>
    %27 = vector.extract_strided_slice %24 {offsets = [0, 1, 0], sizes = [2, 16, 16], strides = [1, 1, 1]} : vector<2x18x16xf32> to vector<2x16x16xf32>
    %28 = vector.shape_cast %27 : vector<2x16x16xf32> to vector<32x16xf32>
    %29 = vector.extract_strided_slice %24 {offsets = [0, 2, 0], sizes = [2, 16, 16], strides = [1, 1, 1]} : vector<2x18x16xf32> to vector<2x16x16xf32>
    %30 = vector.shape_cast %29 : vector<2x16x16xf32> to vector<32x16xf32>
    %31 = tpu.concatenate %26, %28, %30 in 1 : vector<32x16xf32>, vector<32x16xf32>, vector<32x16xf32> -> vector<32x48xf32>
    %32 = arith.truncf %31 : vector<32x48xf32> to vector<32x48xbf16>
    %c0_3 = arith.constant 0 : index
    %c0_4 = arith.constant 0 : index
    %33 = vector.load %arg23[%c0_3, %c0_4] : memref<48x128xbf16, #tpu.memory_space<vmem>>, vector<48x128xbf16>
    %cst_5 = arith.constant dense<0.000000e+00> : vector<32x128xf32>
    %34 = tpu.matmul %32, %33, %cst_5 {dimension_numbers = #tpu.dot_dimension_numbers<[1], [0], [0], [1], [0, 0, 1, 1], [], []>} : vector<32x48xbf16>, vector<48x128xbf16>, vector<32x128xf32> -> vector<32x128xf32>
    %c0_6 = arith.constant 0 : index
    %c0_7 = arith.constant 0 : index
    %35 = vector.load %arg2[%c0_6, %c0_7] : memref<1x128xf32, #tpu.memory_space<vmem>>, vector<1x128xf32>
    %36 = vector.broadcast %35 : vector<1x128xf32> to vector<32x128xf32>
    %37 = arith.addf %34, %36 : vector<32x128xf32>
    %38 = vector.shape_cast %37 : vector<32x128xf32> to vector<2x16x128xf32>
    %c0_8 = arith.constant 0 : index
    %c0_9 = arith.constant 0 : index
    %39 = memref.load %arg1[%c0_8, %c0_9] : memref<1x1xf32, #tpu.memory_space<smem>>
    %cst_10 = arith.constant 0.000000e+00 : f32
    %40 = vector.broadcast %cst_10 : f32 to vector<2x16x128xf32>
    %41 = arith.cmpf oge, %38, %40 : vector<2x16x128xf32>
    %42 = vector.broadcast %39 : f32 to vector<2x16x128xf32>
    %43 = arith.mulf %42, %38 : vector<2x16x128xf32>
    %44 = arith.select %41, %38, %43 : vector<2x16x128xi1>, vector<2x16x128xf32>
    %c1_i32_11 = arith.constant 1 : i32
    %45 = tpu.memref_slice %arg33[%c1_i32_11] : memref<10x!tpu.dma_semaphore, #tpu.memory_space<semaphore_mem>> -> memref<1x!tpu.dma_semaphore, #tpu.memory_space<semaphore_mem>>
    %46 = tpu.memref_squeeze %45 : memref<1x!tpu.dma_semaphore, #tpu.memory_space<semaphore_mem>> -> memref<!tpu.dma_semaphore, #tpu.memory_space<semaphore_mem>>
    tpu.wait_dma2 semaphore(%46 : memref<!tpu.dma_semaphore, #tpu.memory_space<semaphore_mem>>) src(%arg13 : memref<640x256xbf16, #tpu.memory_space<any>>) dst(%arg24 : memref<640x256xbf16, #tpu.memory_space<vmem>>)
    %cst_12 = arith.constant 0.000000e+00 : f32
    %47 = vector.broadcast %cst_12 : f32 to vector<2x2x128xf32>
    %48 = tpu.concatenate %47, %44, %47 in 1 : vector<2x2x128xf32>, vector<2x16x128xf32>, vector<2x2x128xf32> -> vector<2x20x128xf32>
    %49 = vector.extract_strided_slice %48 {offsets = [0, 0, 0], sizes = [2, 16, 128], strides = [1, 1, 1]} : vector<2x20x128xf32> to vector<2x16x128xf32>
    %50 = vector.shape_cast %49 : vector<2x16x128xf32> to vector<32x128xf32>
    %51 = vector.extract_strided_slice %48 {offsets = [0, 1, 0], sizes = [2, 16, 128], strides = [1, 1, 1]} : vector<2x20x128xf32> to vector<2x16x128xf32>
    %52 = vector.shape_cast %51 : vector<2x16x128xf32> to vector<32x128xf32>
    %53 = vector.extract_strided_slice %48 {offsets = [0, 2, 0], sizes = [2, 16, 128], strides = [1, 1, 1]} : vector<2x20x128xf32> to vector<2x16x128xf32>
    %54 = vector.shape_cast %53 : vector<2x16x128xf32> to vector<32x128xf32>
    %55 = vector.extract_strided_slice %48 {offsets = [0, 3, 0], sizes = [2, 16, 128], strides = [1, 1, 1]} : vector<2x20x128xf32> to vector<2x16x128xf32>
    %56 = vector.shape_cast %55 : vector<2x16x128xf32> to vector<32x128xf32>
    %57 = vector.extract_strided_slice %48 {offsets = [0, 4, 0], sizes = [2, 16, 128], strides = [1, 1, 1]} : vector<2x20x128xf32> to vector<2x16x128xf32>
    %58 = vector.shape_cast %57 : vector<2x16x128xf32> to vector<32x128xf32>
    %59 = tpu.concatenate %50, %52, %54, %56, %58 in 1 : vector<32x128xf32>, vector<32x128xf32>, vector<32x128xf32>, vector<32x128xf32>, vector<32x128xf32> -> vector<32x640xf32>
    %60 = arith.truncf %59 : vector<32x640xf32> to vector<32x640xbf16>
    %c0_13 = arith.constant 0 : index
    %c0_14 = arith.constant 0 : index
    %61 = vector.load %arg24[%c0_13, %c0_14] : memref<640x256xbf16, #tpu.memory_space<vmem>>, vector<640x256xbf16>
    %cst_15 = arith.constant dense<0.000000e+00> : vector<32x256xf32>
    %62 = tpu.matmul %60, %61, %cst_15 {dimension_numbers = #tpu.dot_dimension_numbers<[1], [0], [0], [1], [0, 0, 1, 1], [], []>} : vector<32x640xbf16>, vector<640x256xbf16>, vector<32x256xf32> -> vector<32x256xf32>
    %c0_16 = arith.constant 0 : index
    %c0_17 = arith.constant 0 : index
    %63 = vector.load %arg3[%c0_16, %c0_17] : memref<1x256xf32, #tpu.memory_space<vmem>>, vector<1x256xf32>
    %64 = vector.broadcast %63 : vector<1x256xf32> to vector<32x256xf32>
    %65 = arith.addf %62, %64 : vector<32x256xf32>
    %cst_18 = arith.constant 0.000000e+00 : f32
    %66 = vector.broadcast %cst_18 : f32 to vector<32x256xf32>
    %67 = arith.maximumf %65, %66 : vector<32x256xf32>
    %68 = vector.shape_cast %67 : vector<32x256xf32> to vector<2x16x256xf32>
    %c2_i32_19 = arith.constant 2 : i32
    %69 = tpu.memref_slice %arg33[%c2_i32_19] : memref<10x!tpu.dma_semaphore, #tpu.memory_space<semaphore_mem>> -> memref<1x!tpu.dma_semaphore, #tpu.memory_space<semaphore_mem>>
    %70 = tpu.memref_squeeze %69 : memref<1x!tpu.dma_semaphore, #tpu.memory_space<semaphore_mem>> -> memref<!tpu.dma_semaphore, #tpu.memory_space<semaphore_mem>>
    tpu.wait_dma2 semaphore(%70 : memref<!tpu.dma_semaphore, #tpu.memory_space<semaphore_mem>>) src(%arg14 : memref<1280x512xbf16, #tpu.memory_space<any>>) dst(%arg25 : memref<1280x512xbf16, #tpu.memory_space<vmem>>)
    %cst_20 = arith.constant 0.000000e+00 : f32
    %71 = vector.broadcast %cst_20 : f32 to vector<2x2x256xf32>
    %72 = tpu.concatenate %71, %68, %71 in 1 : vector<2x2x256xf32>, vector<2x16x256xf32>, vector<2x2x256xf32> -> vector<2x20x256xf32>
    %73 = vector.extract_strided_slice %72 {offsets = [0, 0, 0], sizes = [2, 16, 256], strides = [1, 1, 1]} : vector<2x20x256xf32> to vector<2x16x256xf32>
    %74 = vector.shape_cast %73 : vector<2x16x256xf32> to vector<32x256xf32>
    %75 = vector.extract_strided_slice %72 {offsets = [0, 1, 0], sizes = [2, 16, 256], strides = [1, 1, 1]} : vector<2x20x256xf32> to vector<2x16x256xf32>
    %76 = vector.shape_cast %75 : vector<2x16x256xf32> to vector<32x256xf32>
    %77 = vector.extract_strided_slice %72 {offsets = [0, 2, 0], sizes = [2, 16, 256], strides = [1, 1, 1]} : vector<2x20x256xf32> to vector<2x16x256xf32>
    %78 = vector.shape_cast %77 : vector<2x16x256xf32> to vector<32x256xf32>
    %79 = vector.extract_strided_slice %72 {offsets = [0, 3, 0], sizes = [2, 16, 256], strides = [1, 1, 1]} : vector<2x20x256xf32> to vector<2x16x256xf32>
    %80 = vector.shape_cast %79 : vector<2x16x256xf32> to vector<32x256xf32>
    %81 = vector.extract_strided_slice %72 {offsets = [0, 4, 0], sizes = [2, 16, 256], strides = [1, 1, 1]} : vector<2x20x256xf32> to vector<2x16x256xf32>
    %82 = vector.shape_cast %81 : vector<2x16x256xf32> to vector<32x256xf32>
    %83 = tpu.concatenate %74, %76, %78, %80, %82 in 1 : vector<32x256xf32>, vector<32x256xf32>, vector<32x256xf32>, vector<32x256xf32>, vector<32x256xf32> -> vector<32x1280xf32>
    %84 = arith.truncf %83 : vector<32x1280xf32> to vector<32x1280xbf16>
    %c0_21 = arith.constant 0 : index
    %c0_22 = arith.constant 0 : index
    %85 = vector.load %arg25[%c0_21, %c0_22] : memref<1280x512xbf16, #tpu.memory_space<vmem>>, vector<1280x512xbf16>
    %cst_23 = arith.constant dense<0.000000e+00> : vector<32x512xf32>
    %86 = tpu.matmul %84, %85, %cst_23 {dimension_numbers = #tpu.dot_dimension_numbers<[1], [0], [0], [1], [0, 0, 1, 1], [], []>} : vector<32x1280xbf16>, vector<1280x512xbf16>, vector<32x512xf32> -> vector<32x512xf32>
    %c0_24 = arith.constant 0 : index
    %c0_25 = arith.constant 0 : index
    %87 = vector.load %arg4[%c0_24, %c0_25] : memref<1x512xf32, #tpu.memory_space<vmem>>, vector<1x512xf32>
    %88 = vector.broadcast %87 : vector<1x512xf32> to vector<32x512xf32>
    %89 = arith.addf %86, %88 : vector<32x512xf32>
    %cst_26 = arith.constant 0.000000e+00 : f32
    %90 = vector.broadcast %cst_26 : f32 to vector<32x512xf32>
    %91 = arith.maximumf %89, %90 : vector<32x512xf32>
    %92 = vector.shape_cast %91 : vector<32x512xf32> to vector<2x16x512xf32>
    %c3_i32_27 = arith.constant 3 : i32
    %93 = tpu.memref_slice %arg33[%c3_i32_27] : memref<10x!tpu.dma_semaphore, #tpu.memory_space<semaphore_mem>> -> memref<1x!tpu.dma_semaphore, #tpu.memory_space<semaphore_mem>>
    %94 = tpu.memref_squeeze %93 : memref<1x!tpu.dma_semaphore, #tpu.memory_space<semaphore_mem>> -> memref<!tpu.dma_semaphore, #tpu.memory_space<semaphore_mem>>
    tpu.wait_dma2 semaphore(%94 : memref<!tpu.dma_semaphore, #tpu.memory_space<semaphore_mem>>) src(%arg15 : memref<512x128xbf16, #tpu.memory_space<any>>) dst(%arg26 : memref<512x128xbf16, #tpu.memory_space<vmem>>)
    %95 = vector.shape_cast %92 : vector<2x16x512xf32> to vector<32x512xf32>
    %96 = arith.truncf %95 : vector<32x512xf32> to vector<32x512xbf16>
    %c0_28 = arith.constant 0 : index
    %c0_29 = arith.constant 0 : index
    %97 = vector.load %arg26[%c0_28, %c0_29] : memref<512x128xbf16, #tpu.memory_space<vmem>>, vector<512x128xbf16>
    %cst_30 = arith.constant dense<0.000000e+00> : vector<32x128xf32>
    %98 = tpu.matmul %96, %97, %cst_30 {dimension_numbers = #tpu.dot_dimension_numbers<[1], [0], [0], [1], [0, 0, 1, 1], [], []>} : vector<32x512xbf16>, vector<512x128xbf16>, vector<32x128xf32> -> vector<32x128xf32>
    %c0_31 = arith.constant 0 : index
    %c0_32 = arith.constant 0 : index
    %99 = vector.load %arg5[%c0_31, %c0_32] : memref<1x128xf32, #tpu.memory_space<vmem>>, vector<1x128xf32>
    %100 = vector.broadcast %99 : vector<1x128xf32> to vector<32x128xf32>
    %101 = arith.addf %98, %100 : vector<32x128xf32>
    %102 = vector.shape_cast %101 : vector<32x128xf32> to vector<2x16x128xf32>
    %103 = arith.addf %44, %102 : vector<2x16x128xf32>
    %c4_i32_33 = arith.constant 4 : i32
    %104 = tpu.memref_slice %arg33[%c4_i32_33] : memref<10x!tpu.dma_semaphore, #tpu.memory_space<semaphore_mem>> -> memref<1x!tpu.dma_semaphore, #tpu.memory_space<semaphore_mem>>
    %105 = tpu.memref_squeeze %104 : memref<1x!tpu.dma_semaphore, #tpu.memory_space<semaphore_mem>> -> memref<!tpu.dma_semaphore, #tpu.memory_space<semaphore_mem>>
    tpu.wait_dma2 semaphore(%105 : memref<!tpu.dma_semaphore, #tpu.memory_space<semaphore_mem>>) src(%arg16 : memref<640x256xbf16, #tpu.memory_space<any>>) dst(%arg27 : memref<640x256xbf16, #tpu.memory_space<vmem>>)
    %cst_34 = arith.constant 0.000000e+00 : f32
    %106 = vector.broadcast %cst_34 : f32 to vector<2x2x128xf32>
    %107 = tpu.concatenate %106, %103, %106 in 1 : vector<2x2x128xf32>, vector<2x16x128xf32>, vector<2x2x128xf32> -> vector<2x20x128xf32>
    %108 = vector.extract_strided_slice %107 {offsets = [0, 0, 0], sizes = [2, 16, 128], strides = [1, 1, 1]} : vector<2x20x128xf32> to vector<2x16x128xf32>
    %109 = vector.shape_cast %108 : vector<2x16x128xf32> to vector<32x128xf32>
    %110 = vector.extract_strided_slice %107 {offsets = [0, 1, 0], sizes = [2, 16, 128], strides = [1, 1, 1]} : vector<2x20x128xf32> to vector<2x16x128xf32>
    %111 = vector.shape_cast %110 : vector<2x16x128xf32> to vector<32x128xf32>
    %112 = vector.extract_strided_slice %107 {offsets = [0, 2, 0], sizes = [2, 16, 128], strides = [1, 1, 1]} : vector<2x20x128xf32> to vector<2x16x128xf32>
    %113 = vector.shape_cast %112 : vector<2x16x128xf32> to vector<32x128xf32>
    %114 = vector.extract_strided_slice %107 {offsets = [0, 3, 0], sizes = [2, 16, 128], strides = [1, 1, 1]} : vector<2x20x128xf32> to vector<2x16x128xf32>
    %115 = vector.shape_cast %114 : vector<2x16x128xf32> to vector<32x128xf32>
    %116 = vector.extract_strided_slice %107 {offsets = [0, 4, 0], sizes = [2, 16, 128], strides = [1, 1, 1]} : vector<2x20x128xf32> to vector<2x16x128xf32>
    %117 = vector.shape_cast %116 : vector<2x16x128xf32> to vector<32x128xf32>
    %118 = tpu.concatenate %109, %111, %113, %115, %117 in 1 : vector<32x128xf32>, vector<32x128xf32>, vector<32x128xf32>, vector<32x128xf32>, vector<32x128xf32> -> vector<32x640xf32>
    %119 = arith.truncf %118 : vector<32x640xf32> to vector<32x640xbf16>
    %c0_35 = arith.constant 0 : index
    %c0_36 = arith.constant 0 : index
    %120 = vector.load %arg27[%c0_35, %c0_36] : memref<640x256xbf16, #tpu.memory_space<vmem>>, vector<640x256xbf16>
    %cst_37 = arith.constant dense<0.000000e+00> : vector<32x256xf32>
    %121 = tpu.matmul %119, %120, %cst_37 {dimension_numbers = #tpu.dot_dimension_numbers<[1], [0], [0], [1], [0, 0, 1, 1], [], []>} : vector<32x640xbf16>, vector<640x256xbf16>, vector<32x256xf32> -> vector<32x256xf32>
    %c0_38 = arith.constant 0 : index
    %c0_39 = arith.constant 0 : index
    %122 = vector.load %arg6[%c0_38, %c0_39] : memref<1x256xf32, #tpu.memory_space<vmem>>, vector<1x256xf32>
    %123 = vector.broadcast %122 : vector<1x256xf32> to vector<32x256xf32>
    %124 = arith.addf %121, %123 : vector<32x256xf32>
    %cst_40 = arith.constant 0.000000e+00 : f32
    %125 = vector.broadcast %cst_40 : f32 to vector<32x256xf32>
    %126 = arith.maximumf %124, %125 : vector<32x256xf32>
    %127 = vector.shape_cast %126 : vector<32x256xf32> to vector<2x16x256xf32>
    %c5_i32_41 = arith.constant 5 : i32
    %128 = tpu.memref_slice %arg33[%c5_i32_41] : memref<10x!tpu.dma_semaphore, #tpu.memory_space<semaphore_mem>> -> memref<1x!tpu.dma_semaphore, #tpu.memory_space<semaphore_mem>>
    %129 = tpu.memref_squeeze %128 : memref<1x!tpu.dma_semaphore, #tpu.memory_space<semaphore_mem>> -> memref<!tpu.dma_semaphore, #tpu.memory_space<semaphore_mem>>
    tpu.wait_dma2 semaphore(%129 : memref<!tpu.dma_semaphore, #tpu.memory_space<semaphore_mem>>) src(%arg17 : memref<1280x512xbf16, #tpu.memory_space<any>>) dst(%arg28 : memref<1280x512xbf16, #tpu.memory_space<vmem>>)
    %cst_42 = arith.constant 0.000000e+00 : f32
    %130 = vector.broadcast %cst_42 : f32 to vector<2x2x256xf32>
    %131 = tpu.concatenate %130, %127, %130 in 1 : vector<2x2x256xf32>, vector<2x16x256xf32>, vector<2x2x256xf32> -> vector<2x20x256xf32>
    %132 = vector.extract_strided_slice %131 {offsets = [0, 0, 0], sizes = [2, 16, 256], strides = [1, 1, 1]} : vector<2x20x256xf32> to vector<2x16x256xf32>
    %133 = vector.shape_cast %132 : vector<2x16x256xf32> to vector<32x256xf32>
    %134 = vector.extract_strided_slice %131 {offsets = [0, 1, 0], sizes = [2, 16, 256], strides = [1, 1, 1]} : vector<2x20x256xf32> to vector<2x16x256xf32>
    %135 = vector.shape_cast %134 : vector<2x16x256xf32> to vector<32x256xf32>
    %136 = vector.extract_strided_slice %131 {offsets = [0, 2, 0], sizes = [2, 16, 256], strides = [1, 1, 1]} : vector<2x20x256xf32> to vector<2x16x256xf32>
    %137 = vector.shape_cast %136 : vector<2x16x256xf32> to vector<32x256xf32>
    %138 = vector.extract_strided_slice %131 {offsets = [0, 3, 0], sizes = [2, 16, 256], strides = [1, 1, 1]} : vector<2x20x256xf32> to vector<2x16x256xf32>
    %139 = vector.shape_cast %138 : vector<2x16x256xf32> to vector<32x256xf32>
    %140 = vector.extract_strided_slice %131 {offsets = [0, 4, 0], sizes = [2, 16, 256], strides = [1, 1, 1]} : vector<2x20x256xf32> to vector<2x16x256xf32>
    %141 = vector.shape_cast %140 : vector<2x16x256xf32> to vector<32x256xf32>
    %142 = tpu.concatenate %133, %135, %137, %139, %141 in 1 : vector<32x256xf32>, vector<32x256xf32>, vector<32x256xf32>, vector<32x256xf32>, vector<32x256xf32> -> vector<32x1280xf32>
    %143 = arith.truncf %142 : vector<32x1280xf32> to vector<32x1280xbf16>
    %c0_43 = arith.constant 0 : index
    %c0_44 = arith.constant 0 : index
    %144 = vector.load %arg28[%c0_43, %c0_44] : memref<1280x512xbf16, #tpu.memory_space<vmem>>, vector<1280x512xbf16>
    %cst_45 = arith.constant dense<0.000000e+00> : vector<32x512xf32>
    %145 = tpu.matmul %143, %144, %cst_45 {dimension_numbers = #tpu.dot_dimension_numbers<[1], [0], [0], [1], [0, 0, 1, 1], [], []>} : vector<32x1280xbf16>, vector<1280x512xbf16>, vector<32x512xf32> -> vector<32x512xf32>
    %c0_46 = arith.constant 0 : index
    %c0_47 = arith.constant 0 : index
    %146 = vector.load %arg7[%c0_46, %c0_47] : memref<1x512xf32, #tpu.memory_space<vmem>>, vector<1x512xf32>
    %147 = vector.broadcast %146 : vector<1x512xf32> to vector<32x512xf32>
    %148 = arith.addf %145, %147 : vector<32x512xf32>
    %cst_48 = arith.constant 0.000000e+00 : f32
    %149 = vector.broadcast %cst_48 : f32 to vector<32x512xf32>
    %150 = arith.maximumf %148, %149 : vector<32x512xf32>
    %151 = vector.shape_cast %150 : vector<32x512xf32> to vector<2x16x512xf32>
    %c6_i32_49 = arith.constant 6 : i32
    %152 = tpu.memref_slice %arg33[%c6_i32_49] : memref<10x!tpu.dma_semaphore, #tpu.memory_space<semaphore_mem>> -> memref<1x!tpu.dma_semaphore, #tpu.memory_space<semaphore_mem>>
    %153 = tpu.memref_squeeze %152 : memref<1x!tpu.dma_semaphore, #tpu.memory_space<semaphore_mem>> -> memref<!tpu.dma_semaphore, #tpu.memory_space<semaphore_mem>>
    tpu.wait_dma2 semaphore(%153 : memref<!tpu.dma_semaphore, #tpu.memory_space<semaphore_mem>>) src(%arg18 : memref<512x128xbf16, #tpu.memory_space<any>>) dst(%arg29 : memref<512x128xbf16, #tpu.memory_space<vmem>>)
    %154 = vector.shape_cast %151 : vector<2x16x512xf32> to vector<32x512xf32>
    %155 = arith.truncf %154 : vector<32x512xf32> to vector<32x512xbf16>
    %c0_50 = arith.constant 0 : index
    %c0_51 = arith.constant 0 : index
    %156 = vector.load %arg29[%c0_50, %c0_51] : memref<512x128xbf16, #tpu.memory_space<vmem>>, vector<512x128xbf16>
    %cst_52 = arith.constant dense<0.000000e+00> : vector<32x128xf32>
    %157 = tpu.matmul %155, %156, %cst_52 {dimension_numbers = #tpu.dot_dimension_numbers<[1], [0], [0], [1], [0, 0, 1, 1], [], []>} : vector<32x512xbf16>, vector<512x128xbf16>, vector<32x128xf32> -> vector<32x128xf32>
    %c0_53 = arith.constant 0 : index
    %c0_54 = arith.constant 0 : index
    %158 = vector.load %arg8[%c0_53, %c0_54] : memref<1x128xf32, #tpu.memory_space<vmem>>, vector<1x128xf32>
    %159 = vector.broadcast %158 : vector<1x128xf32> to vector<32x128xf32>
    %160 = arith.addf %157, %159 : vector<32x128xf32>
    %161 = vector.shape_cast %160 : vector<32x128xf32> to vector<2x16x128xf32>
    %162 = arith.addf %103, %161 : vector<2x16x128xf32>
    %c7_i32_55 = arith.constant 7 : i32
    %163 = tpu.memref_slice %arg33[%c7_i32_55] : memref<10x!tpu.dma_semaphore, #tpu.memory_space<semaphore_mem>> -> memref<1x!tpu.dma_semaphore, #tpu.memory_space<semaphore_mem>>
    %164 = tpu.memref_squeeze %163 : memref<1x!tpu.dma_semaphore, #tpu.memory_space<semaphore_mem>> -> memref<!tpu.dma_semaphore, #tpu.memory_space<semaphore_mem>>
    tpu.wait_dma2 semaphore(%164 : memref<!tpu.dma_semaphore, #tpu.memory_space<semaphore_mem>>) src(%arg19 : memref<384x128xbf16, #tpu.memory_space<any>>) dst(%arg30 : memref<384x128xbf16, #tpu.memory_space<vmem>>)
    %165 = vector.shape_cast %44 : vector<2x16x128xf32> to vector<32x128xf32>
    %166 = vector.shape_cast %103 : vector<2x16x128xf32> to vector<32x128xf32>
    %167 = vector.shape_cast %162 : vector<2x16x128xf32> to vector<32x128xf32>
    %168 = tpu.concatenate %165, %166, %167 in 1 : vector<32x128xf32>, vector<32x128xf32>, vector<32x128xf32> -> vector<32x384xf32>
    %169 = arith.truncf %168 : vector<32x384xf32> to vector<32x384xbf16>
    %c0_56 = arith.constant 0 : index
    %c0_57 = arith.constant 0 : index
    %170 = vector.load %arg30[%c0_56, %c0_57] : memref<384x128xbf16, #tpu.memory_space<vmem>>, vector<384x128xbf16>
    %cst_58 = arith.constant dense<0.000000e+00> : vector<32x128xf32>
    %171 = tpu.matmul %169, %170, %cst_58 {dimension_numbers = #tpu.dot_dimension_numbers<[1], [0], [0], [1], [0, 0, 1, 1], [], []>} : vector<32x384xbf16>, vector<384x128xbf16>, vector<32x128xf32> -> vector<32x128xf32>
    %c0_59 = arith.constant 0 : index
    %c0_60 = arith.constant 0 : index
    %172 = vector.load %arg9[%c0_59, %c0_60] : memref<1x128xf32, #tpu.memory_space<vmem>>, vector<1x128xf32>
    %173 = vector.broadcast %172 : vector<1x128xf32> to vector<32x128xf32>
    %174 = arith.addf %171, %173 : vector<32x128xf32>
    %175 = vector.shape_cast %174 : vector<32x128xf32> to vector<2x16x128xf32>
    %c8_i32_61 = arith.constant 8 : i32
    %176 = tpu.memref_slice %arg33[%c8_i32_61] : memref<10x!tpu.dma_semaphore, #tpu.memory_space<semaphore_mem>> -> memref<1x!tpu.dma_semaphore, #tpu.memory_space<semaphore_mem>>
    %177 = tpu.memref_squeeze %176 : memref<1x!tpu.dma_semaphore, #tpu.memory_space<semaphore_mem>> -> memref<!tpu.dma_semaphore, #tpu.memory_space<semaphore_mem>>
    tpu.wait_dma2 semaphore(%177 : memref<!tpu.dma_semaphore, #tpu.memory_space<semaphore_mem>>) src(%arg20 : memref<384x128xbf16, #tpu.memory_space<any>>) dst(%arg31 : memref<384x128xbf16, #tpu.memory_space<vmem>>)
    %cst_62 = arith.constant 0.000000e+00 : f32
    %178 = vector.broadcast %cst_62 : f32 to vector<2x1x128xf32>
    %179 = tpu.concatenate %178, %175, %178 in 1 : vector<2x1x128xf32>, vector<2x16x128xf32>, vector<2x1x128xf32> -> vector<2x18x128xf32>
    %180 = vector.extract_strided_slice %179 {offsets = [0, 0, 0], sizes = [2, 16, 128], strides = [1, 1, 1]} : vector<2x18x128xf32> to vector<2x16x128xf32>
    %181 = vector.shape_cast %180 : vector<2x16x128xf32> to vector<32x128xf32>
    %182 = vector.extract_strided_slice %179 {offsets = [0, 1, 0], sizes = [2, 16, 128], strides = [1, 1, 1]} : vector<2x18x128xf32> to vector<2x16x128xf32>
    %183 = vector.shape_cast %182 : vector<2x16x128xf32> to vector<32x128xf32>
    %184 = vector.extract_strided_slice %179 {offsets = [0, 2, 0], sizes = [2, 16, 128], strides = [1, 1, 1]} : vector<2x18x128xf32> to vector<2x16x128xf32>
    %185 = vector.shape_cast %184 : vector<2x16x128xf32> to vector<32x128xf32>
    %186 = tpu.concatenate %181, %183, %185 in 1 : vector<32x128xf32>, vector<32x128xf32>, vector<32x128xf32> -> vector<32x384xf32>
    %187 = arith.truncf %186 : vector<32x384xf32> to vector<32x384xbf16>
    %c0_63 = arith.constant 0 : index
    %c0_64 = arith.constant 0 : index
    %188 = vector.load %arg31[%c0_63, %c0_64] : memref<384x128xbf16, #tpu.memory_space<vmem>>, vector<384x128xbf16>
    %cst_65 = arith.constant dense<0.000000e+00> : vector<32x128xf32>
    %189 = tpu.matmul %187, %188, %cst_65 {dimension_numbers = #tpu.dot_dimension_numbers<[1], [0], [0], [1], [0, 0, 1, 1], [], []>} : vector<32x384xbf16>, vector<384x128xbf16>, vector<32x128xf32> -> vector<32x128xf32>
    %c0_66 = arith.constant 0 : index
    %c0_67 = arith.constant 0 : index
    %190 = vector.load %arg10[%c0_66, %c0_67] : memref<1x128xf32, #tpu.memory_space<vmem>>, vector<1x128xf32>
    %191 = vector.broadcast %190 : vector<1x128xf32> to vector<32x128xf32>
    %192 = arith.addf %189, %191 : vector<32x128xf32>
    %193 = vector.shape_cast %192 : vector<32x128xf32> to vector<2x16x128xf32>
    %c9_i32_68 = arith.constant 9 : i32
    %194 = tpu.memref_slice %arg33[%c9_i32_68] : memref<10x!tpu.dma_semaphore, #tpu.memory_space<semaphore_mem>> -> memref<1x!tpu.dma_semaphore, #tpu.memory_space<semaphore_mem>>
    %195 = tpu.memref_squeeze %194 : memref<1x!tpu.dma_semaphore, #tpu.memory_space<semaphore_mem>> -> memref<!tpu.dma_semaphore, #tpu.memory_space<semaphore_mem>>
    tpu.wait_dma2 semaphore(%195 : memref<!tpu.dma_semaphore, #tpu.memory_space<semaphore_mem>>) src(%arg21 : memref<128x128xbf16, #tpu.memory_space<any>>) dst(%arg32 : memref<128x128xbf16, #tpu.memory_space<vmem>>)
    %cst_69 = arith.constant dense<0.000000e+00> : vector<2x128xf32>
    %196 = vector.multi_reduction <add>, %193, %cst_69 [1] : vector<2x16x128xf32> to vector<2x128xf32>
    %197 = arith.truncf %196 : vector<2x128xf32> to vector<2x128xbf16>
    %c0_70 = arith.constant 0 : index
    %c0_71 = arith.constant 0 : index
    %198 = vector.load %arg32[%c0_70, %c0_71] : memref<128x128xbf16, #tpu.memory_space<vmem>>, vector<128x128xbf16>
    %cst_72 = arith.constant dense<0.000000e+00> : vector<2x128xf32>
    %199 = tpu.matmul %197, %198, %cst_72 {dimension_numbers = #tpu.dot_dimension_numbers<[1], [0], [0], [1], [0, 0, 1, 1], [], []>} : vector<2x128xbf16>, vector<128x128xbf16>, vector<2x128xf32> -> vector<2x128xf32>
    %c0_73 = arith.constant 0 : index
    %c0_74 = arith.constant 0 : index
    %200 = vector.load %arg11[%c0_73, %c0_74] : memref<1x128xf32, #tpu.memory_space<vmem>>, vector<1x128xf32>
    %201 = vector.broadcast %200 : vector<1x128xf32> to vector<2x128xf32>
    %202 = arith.addf %199, %201 : vector<2x128xf32>
    %c0_75 = arith.constant 0 : index
    %c0_76 = arith.constant 0 : index
    %203 = vector.load %arg22[%c0_75, %c0_76] : memref<2x128xf32, #tpu.memory_space<vmem>>, vector<2x128xf32>
    tpu.vector_store %arg22[%c0_75, %c0_76], %202 {strides = array<i32>} : memref<2x128xf32, #tpu.memory_space<vmem>>, vector<2x128xf32>,
    return
  }
}

</mosaic_0001>

<bundles_post_ra>
// kernel: tpu_custom_call.1
= control target key start
LH: loop header
LB: loop body
LE: loop exit
PB: predicated region body
PF: predicated region fallthrough
CT: control target
= control target key end

     0   :  { %s6677_s0 = inlined_call_operand.hbm [shape: f32[2,16,16], index: 0, kind: input, shape index: {}]   ;;  %s6678_s1 = inlined_call_operand.<no memory space> [shape: f32[1,1], index: 1, kind: input, shape index: {}]   ;;  %s6679_s2 = inlined_call_operand.hbm [shape: f32[1,128], index: 2, kind: input, shape index: {}]   ;;  %s6680_s3 = inlined_call_operand.hbm [shape: f32[1,256], index: 3, kind: input, shape index: {}]   ;;  %s6681_s4 = inlined_call_operand.hbm [shape: f32[1,512], index: 4, kind: input, shape index: {}]   ;;  %s6682_s5 = inlined_call_operand.hbm [shape: f32[1,128], index: 5, kind: input, shape index: {}]   ;;  %s6683_s6 = inlined_call_operand.hbm [shape: f32[1,256], index: 6, kind: input, shape index: {}]   ;;  %s6684_s7 = inlined_call_operand.hbm [shape: f32[1,512], index: 7, kind: input, shape index: {}]   ;;  %s6685_s8 = inlined_call_operand.hbm [shape: f32[1,128], index: 8, kind: input, shape index: {}]   ;;  %s6686_s9 = inlined_call_operand.hbm [shape: f32[1,128], index: 9, kind: input, shape index: {}]   ;;  %s6687_s10 = inlined_call_operand.hbm [shape: f32[1,128], index: 10, kind: input, shape index: {}]   ;;  %s6688_s11 = inlined_call_operand.hbm [shape: f32[1,128], index: 11, kind: input, shape index: {}]   ;;  %s6689_s12 = inlined_call_operand.hbm [shape: bf16[48,128], index: 12, kind: input, shape index: {}]   ;;  %s6690_s13 = inlined_call_operand.hbm [shape: bf16[640,256], index: 13, kind: input, shape index: {}]   ;;  %s6691_s14 = inlined_call_operand.hbm [shape: bf16[1280,512], index: 14, kind: input, shape index: {}]   ;;  %s6692_s15 = inlined_call_operand.hbm [shape: bf16[512,128], index: 15, kind: input, shape index: {}]   ;;  %s6693_s16 = inlined_call_operand.hbm [shape: bf16[640,256], index: 16, kind: input, shape index: {}]   ;;  %s6694_s17 = inlined_call_operand.hbm [shape: bf16[1280,512], index: 17, kind: input, shape index: {}]   ;;  %s6695_s18 = inlined_call_operand.hbm [shape: bf16[512,128], index: 18, kind: input, shape index: {}]   ;;  %s6696_s19 = inlined_call_operand.hbm [shape: bf16[384,128], index: 19, kind: input, shape index: {}]   ;;  %s6697_s20 = inlined_call_operand.hbm [shape: bf16[384,128], index: 20, kind: input, shape index: {}]   ;;  %s6698_s21 = inlined_call_operand.hbm [shape: bf16[128,128], index: 21, kind: input, shape index: {}]   ;;  %s6699_s22 = inlined_call_operand.hbm [shape: f32[2,128], index: 22, kind: output, shape index: {}]  }
   0x1   :  { %6707 = sst [smem:[#allocation72_spill]] %s6677_s0 }
   0x2   :  { %6708 = sst [smem:[#allocation73_spill]] %s6678_s1 }
   0x3   :  { %6709 = sst [smem:[#allocation74_spill]] %s6679_s2 }
   0x4   :  { %6710 = sst [smem:[#allocation75_spill]] %s6680_s3 }
   0x5   :  { %6711 = sst [smem:[#allocation76_spill]] %s6681_s4 }
   0x6   :  { %6712 = sst [smem:[#allocation77_spill]] %s6682_s5 }
   0x7   :  { %6713 = sst [smem:[#allocation78_spill]] %s6683_s6 }
   0x8   :  { %6714 = sst [smem:[#allocation79_spill]] %s6699_s22 }
   0x9   :  { %28 = vsyncpa [#allocation15], 0 }
   0xa   :  { %29 = vsyncpa [#allocation18], 0 }
   0xb   :  { %30 = vsyncpa [#allocation21], 0 }
   0xc   :  { %31 = vsyncpa [#allocation24], 0 }
   0xd   :  { %32 = vsyncpa [#allocation27], 0 }
   0xe   :  { %33 = vsyncpa [#allocation30], 0 }
   0xf   :  { %34 = vsyncpa [#allocation16], 0  ;;  %s5307_s3 = smov [#allocation17]   ;;  %s5308_s29 = smov [#allocation20]  }
  0x10   :  { %s55_s28 = sshll.u32 %s5307_s3, 4  ;;  %s75_s30 = sshll.u32 %s5308_s29, 4  ;;  %s56_s28 = int_to_ptr.vmem [resolvable:$true] %s55_s28  ;;  %s76_s30 = int_to_ptr.vmem [resolvable:$true] %s75_s30 }
  0x11   :  { %s6715_s23 = sld [smem:[#allocation74_spill]] }
  0x17   :  { %s4877_s1 = scalar_lea.hbm %s6715_s23, 16 }
  0x18   :  { %p4878_p0 = scmp.ne.s32.totalorder %s6715_s23, %s4877_s1  ;;  %p4881_p1 = scmp.lt.u32.totalorder %s4877_s1, %s6715_s23 }
  0x1a   :  { %p4883_p2 = pnand %p4881_p1, %p4878_p0 }
  0x1c   :  { %4886 = shalt.err (!%p4883_p2)
}
  0x1d   :  { %s4887_s26 = scalar_lea.vmem %s56_s28, 16  ;;  %s4891_s2 = scalar_lea.vmem %s56_s28, 32 }
  0x1e   :  { %p4888_p3 = scmp.ne.s32.totalorder %s56_s28, %s4887_s26  ;;  %p4892_p4 = scmp.lt.s32.totalorder %s56_s28, %s56_s28 }
  0x1f   :  { %p4893_p5 = scmp.lt.s32.totalorder %s4891_s2, %s4887_s26 }
  0x21   :  { %p4894_p6 = por %p4893_p5, %p4892_p4 }
  0x23   :  { %p4895_p7 = pnand %p4894_p6, %p4888_p3 }
  0x25   :  { %4898 = shalt.err (!%p4895_p7)
}
  0x26   :  { %58 = dma.hbm_to_vmem [thread:$0]  %s6715_s23, 16, %s56_s28, [#allocation18]  }
  0x27   :  { %s6716_s0 = sld [smem:[#allocation76_spill]] }
  0x2d   :  { %s4899_s5 = scalar_lea.hbm %s6716_s0, 64 }
  0x2e   :  { %p4900_p8 = scmp.ne.s32.totalorder %s6716_s0, %s4899_s5  ;;  %p4903_p9 = scmp.lt.u32.totalorder %s4899_s5, %s6716_s0 }
  0x30   :  { %p4905_p10 = pnand %p4903_p9, %p4900_p8 }
  0x32   :  { %4908 = shalt.err (!%p4905_p10)
}
  0x33   :  { %s4909_s26 = scalar_lea.vmem %s76_s30, 64  ;;  %p4914_p12 = scmp.lt.s32.totalorder %s76_s30, %s76_s30 }
  0x34   :  { %p4910_p11 = scmp.ne.s32.totalorder %s76_s30, %s4909_s26  ;;  %p4915_p13 = scmp.lt.s32.totalorder %s4909_s26, %s4909_s26 }
  0x36   :  { %p4916_p0 = por %p4915_p13, %p4914_p12 }
  0x38   :  { %p4917_p1 = pnand %p4916_p0, %p4910_p11 }
  0x3a   :  { %4920 = shalt.err (!%p4917_p1)
}
  0x3b   :  { %78 = dma.hbm_to_vmem [thread:$0]  %s6716_s0, 64, %s76_s30, [#allocation21]  }
  0x3c   :  { %s5309_s2 = smov [#allocation23]   ;;  %s5310_s3 = smov [#allocation26]  }
  0x3d   :  { %s95_s27 = sshll.u32 %s5309_s2, 4  ;;  %s115_s29 = sshll.u32 %s5310_s3, 4  ;;  %s96_s27 = int_to_ptr.vmem [resolvable:$true] %s95_s27  ;;  %s116_s29 = int_to_ptr.vmem [resolvable:$true] %s115_s29 }
  0x3e   :  { %s6717_s24 = sld [smem:[#allocation78_spill]] }
  0x44   :  { %s4921_s1 = scalar_lea.hbm %s6717_s24, 32 }
  0x45   :  { %p4922_p2 = scmp.ne.s32.totalorder %s6717_s24, %s4921_s1  ;;  %p4925_p3 = scmp.lt.u32.totalorder %s4921_s1, %s6717_s24 }
  0x47   :  { %p4927_p4 = pnand %p4925_p3, %p4922_p2 }
  0x49   :  { %4930 = shalt.err (!%p4927_p4)
}
  0x4a   :  { %s4931_s30 = scalar_lea.vmem %s96_s27, 32  ;;  %p4936_p6 = scmp.lt.s32.totalorder %s96_s27, %s96_s27 }
  0x4b   :  { %p4932_p5 = scmp.ne.s32.totalorder %s96_s27, %s4931_s30  ;;  %p4937_p7 = scmp.lt.s32.totalorder %s4931_s30, %s4931_s30 }
  0x4d   :  { %p4938_p8 = por %p4937_p7, %p4936_p6 }
  0x4f   :  { %p4939_p9 = pnand %p4938_p8, %p4932_p5 }
  0x51   :  { %4942 = shalt.err (!%p4939_p9)
}
  0x52   :  { %98 = dma.hbm_to_vmem [thread:$0]  %s6717_s24, 32, %s96_s27, [#allocation24]  }
  0x53   :  { %s4943_s3 = scalar_lea.hbm %s6685_s8, 16 }
  0x54   :  { %p4944_p10 = scmp.ne.s32.totalorder %s6685_s8, %s4943_s3  ;;  %p4947_p11 = scmp.lt.u32.totalorder %s4943_s3, %s6685_s8 }
  0x56   :  { %p4949_p12 = pnand %p4947_p11, %p4944_p10 }
  0x58   :  { %4952 = shalt.err (!%p4949_p12)
}
  0x59   :  { %s4953_s6 = scalar_lea.vmem %s116_s29, 16  ;;  %s4957_s25 = scalar_lea.vmem %s116_s29, 32 }
  0x5a   :  { %p4954_p13 = scmp.ne.s32.totalorder %s116_s29, %s4953_s6  ;;  %p4958_p0 = scmp.lt.s32.totalorder %s116_s29, %s116_s29 }
  0x5b   :  { %p4959_p1 = scmp.lt.s32.totalorder %s4957_s25, %s4953_s6 }
  0x5d   :  { %p4960_p2 = por %p4959_p1, %p4958_p0 }
  0x5f   :  { %p4961_p3 = pnand %p4960_p2, %p4954_p13 }
  0x61   :  { %4964 = shalt.err (!%p4961_p3)
}
  0x62   :  { %118 = dma.hbm_to_vmem [thread:$0]  %s6685_s8, 16, %s116_s29, [#allocation27]  }
  0x63   :  { %s5311_s26 = smov [#allocation29]   ;;  %s5312_s0 = smov [#allocation14]  }
  0x64   :  { %s135_s30 = sshll.u32 %s5311_s26, 4  ;;  %s40_s28 = sshll.u32 %s5312_s0, 4  ;;  %s136_s30 = int_to_ptr.vmem [resolvable:$true] %s135_s30  ;;  %s5513_s28 = int_to_ptr.vmem [resolvable:$true] %s40_s28 }
  0x65   :  { %s4965_s3 = scalar_lea.hbm %s6687_s10, 16 }
  0x66   :  { %p4966_p4 = scmp.ne.s32.totalorder %s6687_s10, %s4965_s3  ;;  %p4969_p5 = scmp.lt.u32.totalorder %s4965_s3, %s6687_s10 }
  0x68   :  { %p4971_p6 = pnand %p4969_p5, %p4966_p4 }
  0x6a   :  { %4974 = shalt.err (!%p4971_p6)
}
  0x6b   :  { %s4975_s8 = scalar_lea.vmem %s136_s30, 16  ;;  %s4979_s29 = scalar_lea.vmem %s136_s30, 32 }
  0x6c   :  { %p4976_p7 = scmp.ne.s32.totalorder %s136_s30, %s4975_s8  ;;  %p4980_p8 = scmp.lt.s32.totalorder %s136_s30, %s136_s30 }
  0x6d   :  { %p4981_p9 = scmp.lt.s32.totalorder %s4979_s29, %s4975_s8 }
  0x6f   :  { %p4982_p10 = por %p4981_p9, %p4980_p8 }
  0x71   :  { %p4983_p11 = pnand %p4982_p10, %p4976_p7 }
  0x73   :  { %4986 = shalt.err (!%p4983_p11)
}
  0x74   :  { %138 = dma.hbm_to_vmem [thread:$0]  %s6687_s10, 16, %s136_s30, [#allocation30]  }
  0x75   :  { %s6718_s26 = sld [smem:[#allocation72_spill]] }
  0x7b   :  { %s4987_s0 = scalar_lea.hbm %s6718_s26, 512 }
  0x7c   :  { %p4988_p12 = scmp.ne.s32.totalorder %s6718_s26, %s4987_s0  ;;  %p4991_p13 = scmp.lt.u32.totalorder %s4987_s0, %s6718_s26 }
  0x7e   :  { %p4993_p0 = pnand %p4991_p13, %p4988_p12 }
  0x80   :  { %4996 = shalt.err (!%p4993_p0)
}
  0x81   :  { %s4997_s22 = scalar_lea.vmem %s5513_s28, 512  ;;  %p5002_p2 = scmp.lt.s32.totalorder %s5513_s28, %s5513_s28 }
  0x82   :  { %p4998_p1 = scmp.ne.s32.totalorder %s5513_s28, %s4997_s22  ;;  %p5003_p3 = scmp.lt.s32.totalorder %s4997_s22, %s4997_s22 }
  0x84   :  { %p5004_p4 = por %p5003_p3, %p5002_p2 }
  0x86   :  { %p5005_p5 = pnand %p5004_p4, %p4998_p1 }
  0x88   :  { %5008 = shalt.err (!%p5005_p5)
}
  0x89   :  { %s5313_s10 = smov 128   ;;  %s5314_s30 = smov 8  }
  0x8a   :  { %46 = dma.hbm_to_vmem [thread:$0]  %s6718_s26, 512, %s5513_s28, [#allocation15], %s5313_s10, %s5313_s10, %s5314_s30  }
  0x8b   :  { %s5315_s8 = smov [#allocation19]   ;;  %s5316_s6 = smov [#allocation22]  }
  0x8c   :  { %s65_s29 = sshll.u32 %s5315_s8, 4  ;;  %s85_s25 = sshll.u32 %s5316_s6, 4  ;;  %s66_s29 = int_to_ptr.vmem [resolvable:$true] %s65_s29  ;;  %s86_s25 = int_to_ptr.vmem [resolvable:$true] %s85_s25 }
  0x8d   :  { %s6719_s0 = sld [smem:[#allocation75_spill]] }
  0x93   :  { %s5009_s23 = scalar_lea.hbm %s6719_s0, 32 }
  0x94   :  { %p5010_p6 = scmp.ne.s32.totalorder %s6719_s0, %s5009_s23  ;;  %p5013_p7 = scmp.lt.u32.totalorder %s5009_s23, %s6719_s0 }
  0x96   :  { %p5015_p8 = pnand %p5013_p7, %p5010_p6 }
  0x98   :  { %5018 = shalt.err (!%p5015_p8)
}
  0x99   :  { %s5019_s28 = scalar_lea.vmem %s66_s29, 32  ;;  %p5024_p10 = scmp.lt.s32.totalorder %s66_s29, %s66_s29 }
  0x9a   :  { %p5020_p9 = scmp.ne.s32.totalorder %s66_s29, %s5019_s28  ;;  %p5025_p11 = scmp.lt.s32.totalorder %s5019_s28, %s5019_s28 }
  0x9c   :  { %p5026_p12 = por %p5025_p11, %p5024_p10 }
  0x9e   :  { %p5027_p13 = pnand %p5026_p12, %p5020_p9 }
  0xa0   :  { %5030 = shalt.err (!%p5027_p13)
}
  0xa1   :  { %68 = dma.hbm_to_vmem [thread:$0]  %s6719_s0, 32, %s66_s29, [#allocation18]  }
  0xa2   :  { %s6720_s8 = sld [smem:[#allocation77_spill]] }
  0xa8   :  { %s5031_s6 = scalar_lea.hbm %s6720_s8, 16 }
  0xa9   :  { %p5032_p0 = scmp.ne.s32.totalorder %s6720_s8, %s5031_s6  ;;  %p5035_p1 = scmp.lt.u32.totalorder %s5031_s6, %s6720_s8 }
  0xab   :  { %p5037_p2 = pnand %p5035_p1, %p5032_p0 }
  0xad   :  { %5040 = shalt.err (!%p5037_p2)
}
  0xae   :  { %s5041_s3 = scalar_lea.vmem %s86_s25, 16  ;;  %s5045_s4 = scalar_lea.vmem %s86_s25, 32 }
  0xaf   :  { %p5042_p3 = scmp.ne.s32.totalorder %s86_s25, %s5041_s3  ;;  %p5046_p4 = scmp.lt.s32.totalorder %s86_s25, %s86_s25 }
  0xb0   :  { %p5047_p5 = scmp.lt.s32.totalorder %s5045_s4, %s5041_s3 }
  0xb2   :  { %p5048_p6 = por %p5047_p5, %p5046_p4 }
  0xb4   :  { %p5049_p7 = pnand %p5048_p6, %p5042_p3 }
  0xb6   :  { %5052 = shalt.err (!%p5049_p7)
}
  0xb7   :  { %88 = dma.hbm_to_vmem [thread:$0]  %s6720_s8, 16, %s86_s25, [#allocation21]  }
  0xb8   :  { %s5317_s22 = smov [#allocation25]   ;;  %s5318_s26 = smov [#allocation28]  }
  0xb9   :  { %s105_s28 = sshll.u32 %s5317_s22, 4  ;;  %s125_s30 = sshll.u32 %s5318_s26, 4  ;;  %s106_s28 = int_to_ptr.vmem [resolvable:$true] %s105_s28  ;;  %s126_s30 = int_to_ptr.vmem [resolvable:$true] %s125_s30 }
  0xba   :  { %s5053_s6 = scalar_lea.hbm %s6684_s7, 64 }
  0xbb   :  { %p5054_p8 = scmp.ne.s32.totalorder %s6684_s7, %s5053_s6  ;;  %p5057_p9 = scmp.lt.u32.totalorder %s5053_s6, %s6684_s7 }
  0xbd   :  { %p5059_p10 = pnand %p5057_p9, %p5054_p8 }
  0xbf   :  { %5062 = shalt.err (!%p5059_p10)
}
  0xc0   :  { %s5063_s25 = scalar_lea.vmem %s106_s28, 64  ;;  %p5068_p12 = scmp.lt.s32.totalorder %s106_s28, %s106_s28 }
  0xc1   :  { %p5064_p11 = scmp.ne.s32.totalorder %s106_s28, %s5063_s25  ;;  %p5069_p13 = scmp.lt.s32.totalorder %s5063_s25, %s5063_s25 }
  0xc3   :  { %p5070_p0 = por %p5069_p13, %p5068_p12 }
  0xc5   :  { %p5071_p1 = pnand %p5070_p0, %p5064_p11 }
  0xc7   :  { %5074 = shalt.err (!%p5071_p1)
}
  0xc8   :  { %108 = dma.hbm_to_vmem [thread:$0]  %s6684_s7, 64, %s106_s28, [#allocation24]  }
  0xc9   :  { %s5075_s0 = scalar_lea.hbm %s6686_s9, 16 }
  0xca   :  { %p5076_p2 = scmp.ne.s32.totalorder %s6686_s9, %s5075_s0  ;;  %p5079_p3 = scmp.lt.u32.totalorder %s5075_s0, %s6686_s9 }
  0xcc   :  { %p5081_p4 = pnand %p5079_p3, %p5076_p2 }
  0xce   :  { %5084 = shalt.err (!%p5081_p4)
}
  0xcf   :  { %s5085_s6 = scalar_lea.vmem %s126_s30, 16  ;;  %s5089_s27 = scalar_lea.vmem %s126_s30, 32 }
  0xd0   :  { %p5086_p5 = scmp.ne.s32.totalorder %s126_s30, %s5085_s6  ;;  %p5090_p6 = scmp.lt.s32.totalorder %s126_s30, %s126_s30 }
  0xd1   :  { %p5091_p7 = scmp.lt.s32.totalorder %s5089_s27, %s5085_s6 }
  0xd3   :  { %p5092_p8 = por %p5091_p7, %p5090_p6 }
  0xd5   :  { %p5093_p9 = pnand %p5092_p8, %p5086_p5 }
  0xd7   :  { %5096 = shalt.err (!%p5093_p9)
}
  0xd8   :  { %128 = dma.hbm_to_vmem [thread:$0]  %s6686_s9, 16, %s126_s30, [#allocation27]  }
  0xd9   :  { %s5319_s24 = smov [#allocation31]   ;;  %s5097_s8 = scalar_lea.hbm %s6688_s11, 16 }
  0xda   :  { %s145_s23 = sshll.u32 %s5319_s24, 4  ;;  %p5098_p10 = scmp.ne.s32.totalorder %s6688_s11, %s5097_s8  ;;  %s146_s23 = int_to_ptr.vmem [resolvable:$true] %s145_s23 }
  0xdb   :  { %p5101_p11 = scmp.lt.u32.totalorder %s5097_s8, %s6688_s11 }
  0xdd   :  { %p5103_p12 = pnand %p5101_p11, %p5098_p10 }
  0xdf   :  { %5106 = shalt.err (!%p5103_p12)
}
  0xe0   :  { %s5107_s22 = scalar_lea.vmem %s146_s23, 16  ;;  %s5111_s9 = scalar_lea.vmem %s146_s23, 32 }
  0xe1   :  { %p5108_p13 = scmp.ne.s32.totalorder %s146_s23, %s5107_s22  ;;  %p5112_p0 = scmp.lt.s32.totalorder %s146_s23, %s146_s23 }
  0xe2   :  { %p5113_p1 = scmp.lt.s32.totalorder %s5111_s9, %s5107_s22 }
  0xe4   :  { %p5114_p2 = por %p5113_p1, %p5112_p0 }
  0xe6   :  { %p5115_p3 = pnand %p5114_p2, %p5108_p13 }
  0xe8   :  { %5118 = shalt.err (!%p5115_p3)
}
  0xe9   :  { %148 = dma.hbm_to_vmem [thread:$0]  %s6688_s11, 16, %s146_s23, [#allocation30]  }
  0xea   :  { %5273 = dma.done.wait [#allocation15], 512  }
  0xeb   :  { %5274 = vsyncadd [#allocation15], 4294966784 }
  0xec   :  { %5275 = dma.done.wait [#allocation18], 48  }
  0xed   :  { %5276 = vsyncadd [#allocation18], 4294967248 }
  0xee   :  { %5277 = dma.done.wait [#allocation21], 80  }
  0xef   :  { %5278 = vsyncadd [#allocation21], 4294967216 }
  0xf0   :  { %5279 = dma.done.wait [#allocation24], 96  }
  0xf1   :  { %5280 = vsyncadd [#allocation24], 4294967200 }
  0xf2   :  { %5281 = dma.done.wait [#allocation27], 32  }
  0xf3   :  { %5282 = vsyncadd [#allocation27], 4294967264 }
  0xf4   :  { %5283 = dma.done.wait [#allocation30], 32  }
  0xf5   :  { %5284 = vsyncadd [#allocation30], 4294967264  ;;  %s199_s5 = sld [smem:[#allocation0]]   ;;  %s5320_s1 = smov 64  }
  0xf6   :  { %217 = sst [smem:[#allocation38 + $0x3]] %s5320_s1  ;;  %s5321_s6 = smov [#allocation2]  }
  0xf7   :  { %219 = sst [smem:[#allocation38 + $0x4]] %s5313_s10  ;;  %s190_s11 = sshll.u32 %s5321_s6, 4  ;;  %s191_s11 = int_to_ptr.vmem [resolvable:$true] %s190_s11 }
  0xf8   :  { %223 = sst [smem:[#allocation38 + $0x6]] %s5313_s10  ;;  %s5119_s28 = scalar_lea.hbm %s6689_s12, 384 }
  0xf9   :  { %225 = sst [smem:[#allocation38 + $0x7]] %s5320_s1  ;;  %p5120_p4 = scmp.ne.s32.totalorder %s6689_s12, %s5119_s28 }
  0xfa   :  { %p5123_p5 = scmp.lt.u32.totalorder %s5119_s28, %s6689_s12 }
  0xfc   :  { %p5125_p6 = pnand %p5123_p5, %p5120_p4 }
  0xfe   :  { %5128 = shalt.err (!%p5125_p6)  }
  0xff   :  { %s5129_s8 = scalar_lea.vmem %s191_s11, 384  ;;  %p5134_p8 = scmp.lt.s32.totalorder %s191_s11, %s191_s11 }
 0x100   :  { %p5130_p7 = scmp.ne.s32.totalorder %s191_s11, %s5129_s8  ;;  %p5135_p9 = scmp.lt.s32.totalorder %s5129_s8, %s5129_s8 }
 0x102   :  { %p5136_p10 = por %p5135_p9, %p5134_p8 }
 0x104   :  { %p5137_p11 = pnand %p5136_p10, %p5130_p7 }
 0x106   :  { %5140 = shalt.err (!%p5137_p11)  }
 0x107   :  { %193 = dma.hbm_to_vmem [thread:$0]  %s6689_s12, 384, %s191_s11, [#allocation12] }
 0x108   :  { %s5322_s29 = smov [#allocation3]   ;;  %s4220_s22 = sshll.u32 %s199_s5, 26 }
 0x109   :  { %s207_s0 = sshll.u32 %s5322_s29, 4  ;;  %s5622_s9 = sadd.s32 134217728, %s4220_s22  ;;  %s208_s0 = int_to_ptr.vmem [resolvable:$true] %s207_s0 }
 0x10a   :  { %s5323_s30 = smov 256   ;;  %s5324_s26 = smov 2  }
 0x10b   :  { %211 = sst [smem:[#allocation38]] %s5323_s30  ;;  %s5325_s6 = smov 4  }
 0x10c   :  { %213 = sst [smem:[#allocation38 + $0x1]] %s5323_s30  ;;  %s5326_s12 = smov [#allocation12 + $0x1]  }
 0x10d   :  { %215 = sst [smem:[#allocation38 + $0x2]] %s5324_s26  ;;  %s5327_s11 = smov [#allocation37]  }
 0x10e   :  { %221 = sst [smem:[#allocation38 + $0x5]] %s5324_s26  ;;  %s5328_s7 = smov 512  }
 0x10f   :  { %227 = sst [smem:[#allocation38 + $0x8]] %s5325_s6  ;;  %s5329_s28 = smov [#allocation4]  }
 0x110   :  { %229 = dma.general %s6690_s13, 10240, %s208_s0, %s5326_s12, %s5327_s11, [#allocation38], %s5622_s9, 0  }
 0x111   :  { %250 = sst [smem:[#allocation40 + $0x2]] %s5325_s6  ;;  %s242_s24 = sshll.u32 %s5329_s28, 4  ;;  %s243_s24 = int_to_ptr.vmem [resolvable:$true] %s242_s24 }
 0x112   :  { %246 = sst [smem:[#allocation40]] %s5328_s7  ;;  %s5330_s13 = smov [#allocation5]  }
 0x113   :  { %248 = sst [smem:[#allocation40 + $0x1]] %s5328_s7  ;;  %s273_s23 = sshll.u32 %s5330_s13, 4  ;;  %s5642_s23 = int_to_ptr.vmem [resolvable:$true] %s273_s23 }
 0x114   :  { %252 = sst [smem:[#allocation40 + $0x3]] %s5320_s1  ;;  %s5331_s2 = smov [#allocation12 + $0x2]  }
 0x115   :  { %254 = sst [smem:[#allocation40 + $0x4]] %s5313_s10  ;;  %s5332_s25 = smov [#allocation39]  }
 0x116   :  { %256 = sst [smem:[#allocation40 + $0x5]] %s5324_s26  ;;  %s5333_s4 = smov [#allocation6]  }
 0x117   :  { %258 = sst [smem:[#allocation40 + $0x6]] %s5323_s30  ;;  %s5650_s29 = sshll.u32 %s5333_s4, 4  ;;  %s290_s29 = int_to_ptr.vmem [resolvable:$true] %s5650_s29 }
 0x118   :  { %260 = sst [smem:[#allocation40 + $0x7]] %s5320_s1  ;;  %s5141_s11 = scalar_lea.hbm %s6692_s15, 4096 }
 0x119   :  { %262 = sst [smem:[#allocation40 + $0x8]] %s5325_s6  ;;  %p5142_p12 = scmp.ne.s32.totalorder %s6692_s15, %s5141_s11 }
 0x11a   :  { %264 = dma.general %s6691_s14, 40960, %s243_s24, %s5331_s2, %s5332_s25, [#allocation40], %s5622_s9, 0  }
 0x11b   :  { %293 = sst [smem:[#allocation44]] %s5323_s30  ;;  %s5334_s14 = smov [#allocation7]  }
 0x11c   :  { %295 = sst [smem:[#allocation44 + $0x1]] %s5323_s30  ;;  %s5658_s0 = sshll.u32 %s5334_s14, 4  ;;  %s325_s0 = int_to_ptr.vmem [resolvable:$true] %s5658_s0 }
 0x11d   :  { %297 = sst [smem:[#allocation44 + $0x2]] %s5324_s26  ;;  %p5145_p13 = scmp.lt.u32.totalorder %s5141_s11, %s6692_s15 }
 0x11e   :  { %299 = sst [smem:[#allocation44 + $0x3]] %s5320_s1 }
 0x11f   :  { %301 = sst [smem:[#allocation44 + $0x4]] %s5313_s10  ;;  %p5147_p0 = pnand %p5145_p13, %p5142_p12 }
 0x120   :  { %303 = sst [smem:[#allocation44 + $0x5]] %s5324_s26 }
 0x121   :  { %305 = sst [smem:[#allocation44 + $0x6]] %s5313_s10 }
 0x122   :  { %307 = sst [smem:[#allocation44 + $0x7]] %s5320_s1 }
 0x123   :  { %309 = sst [smem:[#allocation44 + $0x8]] %s5325_s6 }
 0x124   :  { %5150 = shalt.err (!%p5147_p0)  }
 0x125   :  { %s5151_s13 = scalar_lea.vmem %s5642_s23, 4096  ;;  %p5156_p2 = scmp.lt.s32.totalorder %s5642_s23, %s5642_s23 }
 0x126   :  { %p5152_p1 = scmp.ne.s32.totalorder %s5642_s23, %s5151_s13  ;;  %p5157_p3 = scmp.lt.s32.totalorder %s5151_s13, %s5151_s13 }
 0x128   :  { %p5158_p4 = por %p5157_p3, %p5156_p2 }
 0x12a   :  { %p5159_p5 = pnand %p5158_p4, %p5152_p1 }
 0x12c   :  { %5162 = shalt.err (!%p5159_p5)  }
 0x12d   :  { %276 = dma.hbm_to_vmem [thread:$0]  %s6692_s15, 4096, %s5642_s23, [#allocation12 + $0x3] }
 0x12e   :  { %s5335_s8 = smov [#allocation12 + $0x4]   ;;  %s5336_s3 = smov [#allocation43]  }
 0x12f   :  { %311 = dma.general %s6693_s16, 10240, %s290_s29, %s5335_s8, %s5336_s3, [#allocation44], %s5622_s9, 0  }
 0x130   :  { %328 = sst [smem:[#allocation46]] %s5328_s7  ;;  %s5337_s22 = smov [#allocation8]  }
 0x131   :  { %330 = sst [smem:[#allocation46 + $0x1]] %s5328_s7  ;;  %s355_s12 = sshll.u32 %s5337_s22, 4  ;;  %s356_s12 = int_to_ptr.vmem [resolvable:$true] %s355_s12 }
 0x132   :  { %332 = sst [smem:[#allocation46 + $0x2]] %s5325_s6  ;;  %s5338_s15 = smov [#allocation9]  }
 0x133   :  { %334 = sst [smem:[#allocation46 + $0x3]] %s5320_s1  ;;  %s367_s23 = sshll.u32 %s5338_s15, 4  ;;  %s5691_s23 = int_to_ptr.vmem [resolvable:$true] %s367_s23 }
 0x134   :  { %336 = sst [smem:[#allocation46 + $0x4]] %s5313_s10  ;;  %s5339_s16 = smov [#allocation10]  }
 0x135   :  { %338 = sst [smem:[#allocation46 + $0x5]] %s5324_s26  ;;  %s5695_s7 = sshll.u32 %s5339_s16, 4  ;;  %s380_s7 = int_to_ptr.vmem [resolvable:$true] %s5695_s7 }
 0x136   :  { %340 = sst [smem:[#allocation46 + $0x6]] %s5323_s30  ;;  %s5340_s29 = smov [#allocation12 + $0x5]  }
 0x137   :  { %342 = sst [smem:[#allocation46 + $0x7]] %s5320_s1  ;;  %s5341_s11 = smov [#allocation45]  }
 0x138   :  { %344 = sst [smem:[#allocation46 + $0x8]] %s5325_s6  ;;  %s5163_s30 = scalar_lea.hbm %s6695_s18, 4096 }
 0x139   :  { %346 = dma.general %s6694_s17, 40960, %s325_s0, %s5340_s29, %s5341_s11, [#allocation46], %s5622_s9, 0  }
 0x13a   :  { %p5164_p6 = scmp.ne.s32.totalorder %s6695_s18, %s5163_s30  ;;  %p5167_p7 = scmp.lt.u32.totalorder %s5163_s30, %s6695_s18 }
 0x13c   :  { %p5169_p8 = pnand %p5167_p7, %p5164_p6 }
 0x13e   :  { %5172 = shalt.err (!%p5169_p8)  }
 0x13f   :  { %s5173_s13 = scalar_lea.vmem %s356_s12, 4096  ;;  %p5178_p10 = scmp.lt.s32.totalorder %s356_s12, %s356_s12 }
 0x140   :  { %p5174_p9 = scmp.ne.s32.totalorder %s356_s12, %s5173_s13  ;;  %p5179_p11 = scmp.lt.s32.totalorder %s5173_s13, %s5173_s13 }
 0x142   :  { %p5180_p12 = por %p5179_p11, %p5178_p10 }
 0x144   :  { %p5181_p13 = pnand %p5180_p12, %p5174_p9 }
 0x146   :  { %5184 = shalt.err (!%p5181_p13)  }
 0x147   :  { %358 = dma.hbm_to_vmem [thread:$0]  %s6695_s18, 4096, %s356_s12, [#allocation12 + $0x6] }
 0x148   :  { %s5185_s25 = scalar_lea.hbm %s6696_s19, 3072 }
 0x149   :  { %p5186_p0 = scmp.ne.s32.totalorder %s6696_s19, %s5185_s25  ;;  %p5189_p1 = scmp.lt.u32.totalorder %s5185_s25, %s6696_s19 }
 0x14b   :  { %p5191_p2 = pnand %p5189_p1, %p5186_p0 }
 0x14d   :  { %5194 = shalt.err (!%p5191_p2)  }
 0x14e   :  { %s5195_s22 = scalar_lea.vmem %s5691_s23, 3072  ;;  %p5200_p4 = scmp.lt.s32.totalorder %s5691_s23, %s5691_s23 }
 0x14f   :  { %p5196_p3 = scmp.ne.s32.totalorder %s5691_s23, %s5195_s22  ;;  %p5201_p5 = scmp.lt.s32.totalorder %s5195_s22, %s5195_s22 }
 0x151   :  { %p5202_p6 = por %p5201_p5, %p5200_p4 }
 0x153   :  { %p5203_p7 = pnand %p5202_p6, %p5196_p3 }
 0x155   :  { %5206 = shalt.err (!%p5203_p7)  }
 0x156   :  { %370 = dma.hbm_to_vmem [thread:$0]  %s6696_s19, 3072, %s5691_s23, [#allocation12 + $0x7] }
 0x157   :  { %s5207_s29 = scalar_lea.hbm %s6697_s20, 3072 }
 0x158   :  { %p5208_p8 = scmp.ne.s32.totalorder %s6697_s20, %s5207_s29  ;;  %p5211_p9 = scmp.lt.u32.totalorder %s5207_s29, %s6697_s20 }
 0x15a   :  { %p5213_p10 = pnand %p5211_p9, %p5208_p8 }
 0x15c   :  { %5216 = shalt.err (!%p5213_p10)  }
 0x15d   :  { %s5217_s27 = scalar_lea.vmem %s380_s7, 3072  ;;  %p5222_p12 = scmp.lt.s32.totalorder %s380_s7, %s380_s7 }
 0x15e   :  { %p5218_p11 = scmp.ne.s32.totalorder %s380_s7, %s5217_s27  ;;  %p5223_p13 = scmp.lt.s32.totalorder %s5217_s27, %s5217_s27 }
 0x160   :  { %p5224_p0 = por %p5223_p13, %p5222_p12 }
 0x162   :  { %p5225_p1 = pnand %p5224_p0, %p5218_p11 }
 0x164   :  { %5228 = shalt.err (!%p5225_p1)  }
 0x165   :  { %382 = dma.hbm_to_vmem [thread:$0]  %s6697_s20, 3072, %s380_s7, [#allocation12 + $0x8]  ;;  %v395_v0 = vld [vmem:[#allocation14] sm:$0xff]  ;;  %v396_v1 = vld [vmem:[#allocation14 + $0x8] sm:$0xff]  ;;  %v397_v2 = vld [vmem:[#allocation14 + $0x10] sm:$0xff] }
 0x166   :  { %s5342_s30 = smov [#allocation11]   ;;  %s5229_s6 = scalar_lea.hbm %s6698_s21, 1024 }
 0x167   :  { %s391_s28 = sshll.u32 %s5342_s30, 4  ;;  %p5230_p2 = scmp.ne.s32.totalorder %s6698_s21, %s5229_s6  ;;  %s392_s28 = int_to_ptr.vmem [resolvable:$true] %s391_s28 }
 0x168   :  { %p5233_p3 = scmp.lt.u32.totalorder %s5229_s6, %s6698_s21 }
 0x16a   :  { %p5235_p4 = pnand %p5233_p3, %p5230_p2 }
 0x16c   :  { %5238 = shalt.err (!%p5235_p4)  }
 0x16d   :  { %s5239_s20 = scalar_lea.vmem %s392_s28, 1024  ;;  %p5244_p6 = scmp.lt.s32.totalorder %s392_s28, %s392_s28 }
 0x16e   :  { %p5240_p5 = scmp.ne.s32.totalorder %s392_s28, %s5239_s20  ;;  %p5245_p7 = scmp.lt.s32.totalorder %s5239_s20, %s5239_s20 }
 0x170   :  { %p5246_p8 = por %p5245_p7, %p5244_p6 }
 0x172   :  { %p5247_p9 = pnand %p5246_p8, %p5240_p5 }
 0x174   :  { %5250 = shalt.err (!%p5247_p9)  }
 0x175   :  { %394 = dma.hbm_to_vmem [thread:$0]  %s6698_s21, 1024, %s392_s28, [#allocation12 + $0x9]  ;;  %v398_v3 = vld [vmem:[#allocation14 + $0x18] sm:$0xff]  ;;  %vm407_vm0 = vcmask 1040384   ;;  %v408_v4 = vrot.slane %v395_v0, 7  ;;  %v409_v5 = vrot.slane %v396_v1, 7 }
 0x176   :  { %vm428_vm1 = vcmask 1046528   ;;  %v411_v6 = vrot.slane %v397_v2, 7  ;;  %v412_v7 = vrot.slane %v398_v3, 7 }
 0x177   :  { %5285 = dma.done.wait [#allocation12], 384 }
 0x178   :  { %5286 = vsyncadd [#allocation12], 4294966912  ;;  %v410_v8 = vsel %vm407_vm0, %v408_v4, %v409_v5  ;;  %v420_v9 = vsel %vm407_vm0, 0.0, %v408_v4  ;;  %v422_v10 = vsel %vm407_vm0, %v409_v5, 0.0  ;;  %vm439_vm2 = vcmask 1045504   ;;  %s5343_s21 = smov 16  }
 0x179   :  { %v429_v11 = vrot.slane %v420_v9, 1  ;;  %v430_v12 = vrot.slane %v410_v8, 1  ;;  %v432_v13 = vrot.slane %v422_v10, 1  ;;  %v440_v14 = vrot.slane %v420_v9, 2  ;;  %v486_v33 = vld [vmem:[#allocation2] sm:$0xff]  ;;  %v487_v34 = vld [vmem:[#allocation2 + $0x8] sm:$0xff] }
 0x17a   :  { %v441_v15 = vrot.slane %v410_v8, 2  ;;  %v443_v16 = vrot.slane %v422_v10, 2  ;;  %v413_v17 = vsel %vm407_vm0, %v411_v6, %v412_v7  ;;  %v421_v18 = vsel %vm407_vm0, 0.0, %v411_v6  ;;  %s5344_s25 = smov 32   ;;  %4536 = vmatprep.subr.bf16.mxu0 %v486_v33  ;;  %v488_v40 = vld [vmem:[#allocation2 + $0x10] sm:$0xff]  ;;  %s6721_s4 = sld [smem:[#allocation73_spill]] }
 0x17b   :  { %v431_v19 = vsel %vm428_vm1, %v429_v11, %v430_v12  ;;  %v433_v20 = vsel %vm428_vm1, %v430_v12, %v432_v13  ;;  %v423_v21 = vsel %vm407_vm0, %v412_v7, 0.0  ;;  %v434_v22 = vrot.slane %v421_v18, 1  ;;  %4537 = vmatpush3.bf16.msra.mxu0 %v486_v33  ;;  %v4228_v63 = vld [vmem:[#allocation17] ss:$0 sm:$0xff] }
 0x17c   :  { %v4857_v23 = vpack.i.bf16 %v433_v20, %v431_v19  ;;  %v442_v24 = vsel %vm439_vm2, %v440_v14, %v441_v15  ;;  %v444_v25 = vsel %vm439_vm2, %v441_v15, %v443_v16  ;;  %v435_v26 = vrot.slane %v413_v17, 1  ;;  %4538 = vmatprep.subr.bf16.mxu0 %v487_v34 }
 0x17d   :  { %v4867_v27 = vpack.i.bf16 %v444_v25, %v442_v24  ;;  %v437_v28 = vrot.slane %v423_v21, 1  ;;  %v445_v29 = vrot.slane %v421_v18, 2  ;;  %v446_v30 = vrot.slane %v413_v17, 2 }
 0x17e   :  { %4858 = vrot.lane.b32.xlu0 %v4857_v23, %s5343_s21  ;;  %v436_v31 = vsel %vm428_vm1, %v434_v22, %v435_v26  ;;  %v448_v32 = vrot.slane %v423_v21, 2  ;;  %vm474_vm3 = vcmask 130048   ;;  %vm479_vm4 = vcmask 261120  }
 0x17f   :  { %4868 = vrot.lane.b32.xlu1 %v4867_v27, %s5344_s25  ;;  %v438_v35 = vsel %vm428_vm1, %v435_v26, %v437_v28  ;;  %v447_v36 = vsel %vm439_vm2, %v445_v29, %v446_v30  ;;  %4539 = vmatpush3.bf16.msra.mxu0 %v487_v34  ;;  %vm496_vm5 = vcmask 392192  }
 0x180   :  { %v4862_v37 = vpack.i.bf16 %v438_v35, %v436_v31  ;;  %v449_v38 = vsel %vm439_vm2, %v446_v30, %v448_v32  ;;  %4540 = vmatprep.subr.bf16.mxu0 %v488_v40  ;;  %v557_v1 = vstv %s6721_s4 }
 0x181   :  { %v4872_v39 = vpack.i.bf16 %v449_v38, %v447_v36 }
 0x182   :  { %4863 = vrot.lane.b32.xlu0 %v4862_v37, %s5343_s21 }
 0x183   :  { %4873 = vrot.lane.b32.xlu1 %v4872_v39, %s5344_s25  ;;  %4541 = vmatpush3.bf16.msra.mxu0 %v488_v40 }
 0x1f0   :  { %v4859_v41 = vpop.permute.xlu0 %4858 }
 0x1f1   :  { %v4861_v42 = vunpack.i.h.bf16 %v4859_v41  ;;  %v4860_v43 = vunpack.i.l.bf16 %v4859_v41  ;;  %v4869_v44 = vpop.permute.xlu1 %4868 }
 0x1f2   :  { %v4871_v45 = vunpack.i.h.bf16 %v4869_v44  ;;  %v4870_v46 = vunpack.i.l.bf16 %v4869_v44 }
 0x1f3   :  { %v475_v47 = vsel %vm474_vm3, %v420_v9, %v4860_v43  ;;  %v476_v48 = vsel %vm474_vm3, %v410_v8, %v4861_v42 }
 0x1f4   :  { %v4864_v49 = vpop.permute.xlu0 %4863  ;;  %v480_v50 = vsel %vm479_vm4, %v475_v47, %v4870_v46  ;;  %v481_v51 = vsel %vm479_vm4, %v476_v48, %v4871_v45 }
 0x1f5   :  { %v4866_v52 = vunpack.i.h.bf16 %v4864_v49  ;;  %v4865_v53 = vunpack.i.l.bf16 %v4864_v49  ;;  %v4874_v54 = vpop.permute.xlu1 %4873  ;;  %v484_v55 = vpack.c.bf16 %v481_v51, %v480_v50 }
 0x1f6   :  { %v4876_v56 = vunpack.i.h.bf16 %v4874_v54  ;;  %v4875_v57 = vunpack.i.l.bf16 %v4874_v54 }
 0x1f7   :  { %v478_v58 = vsel %vm474_vm3, %v413_v17, %v4866_v52  ;;  %v477_v59 = vsel %vm474_vm3, %v421_v18, %v4865_v53  ;;  %4542 = vmatprep.mubr.msk.bf16.mxu0 %vm496_vm5, %v484_v55 }
 0x1f8   :  { %v482_v60 = vsel %vm479_vm4, %v477_v59, %v4875_v57  ;;  %v483_v61 = vsel %vm479_vm4, %v478_v58, %v4876_v56 }
 0x1f9   :  { %v485_v62 = vpack.c.bf16 %v483_v61, %v482_v60 }
 0x1fb   :  { %4543 = vmatmul.mubr.msk.bf16.vlgmr.msra.gmra.mrb[0].mxu0 %vm496_vm5, %v485_v62 }
 0x2ce   :  { %v4544_v0 = vpop.f32.mrb[0].mxu0 }
 0x2cf   :  { %v546_v2 = vadd.f32 %v4544_v0, %v4228_v63  ;;  %v537_v3 = vpop.f32.mrb[1].mxu0 }
 0x2d0   :  { %v538_v4 = vadd.f32 %v4228_v63, %v537_v3  ;;  %v4545_v5 = vpop.f32.mrb[2].mxu0 }
 0x2d1   :  { %vm555_vm6 = vcmp.ge.f32.partialorder %v546_v2, 0.0  ;;  %v560_v6 = vmul.f32 %v557_v1, %v546_v2  ;;  %v549_v7 = vadd.f32 %v4545_v5, %v4228_v63  ;;  %v540_v8 = vpop.f32.mrb[3].mxu0 }
 0x2d2   :  { %vm553_vm7 = vcmp.ge.f32.partialorder %v538_v4, 0.0  ;;  %v558_v9 = vmul.f32 %v557_v1, %v538_v4  ;;  %v541_v10 = vadd.f32 %v4228_v63, %v540_v8 }
 0x2d3   :  { %v5782_v11 = vsel %vm555_vm6, %v546_v2, %v560_v6  ;;  %vm556_vm8 = vcmp.ge.f32.partialorder %v549_v7, 0.0  ;;  %v561_v12 = vmul.f32 %v557_v1, %v549_v7 }
 0x2d4   :  { %v5784_v13 = vsel %vm553_vm7, %v538_v4, %v558_v9  ;;  %vm554_vm9 = vcmp.ge.f32.partialorder %v541_v10, 0.0  ;;  %v559_v14 = vmul.f32 %v557_v1, %v541_v10 }
 0x2d5   :  { %v5786_v15 = vsel %vm556_vm8, %v549_v7, %v561_v12 }
 0x2d6   :  { %v5788_v16 = vsel %vm554_vm9, %v541_v10, %v559_v14 }
 0x2d7   :  { %5287 = dma.done.wait [#allocation12 + $0x1], 10240 }
 0x2d8   :  { %5288 = vsyncadd [#allocation12 + $0x1], 4294957056  ;;  %vm574_vm10 = vcmask 1041408   ;;  %v5791_v17 = vrot.slane %v5784_v13, 6  ;;  %v576_v18 = vrot.slane %v5788_v16, 6  ;;  %v664_v29 = vld [vmem:[#allocation3 + $0x8] sm:$0xff] }
 0x2d9   :  { %v663_v30 = vld [vmem:[#allocation3] sm:$0xff]  ;;  %v666_v31 = vld [vmem:[#allocation3 + $0x18] sm:$0xff]  ;;  %vm623_vm11 = vcmask 1044480   ;;  %755 = vmatprep.subr.bf16.mxu1 %v664_v29  ;;  %v665_v38 = vld [vmem:[#allocation3 + $0x10] sm:$0xff]  ;;  %v5835_v50 = vrot.slane %v5782_v11, 6  ;;  %v579_v51 = vrot.slane %v5786_v15, 6 }
 0x2da   :  { %v5796_v19 = vsel %vm574_vm10, %v5791_v17, %v576_v18  ;;  %v5800_v20 = vsel %vm574_vm10, 0.0, %v5791_v17  ;;  %v5803_v21 = vsel %vm574_vm10, %v576_v18, 0.0  ;;  %756 = vmatpush1.bf16.msra.mxu1 %v663_v30  ;;  %v668_v41 = vld [vmem:[#allocation3 + $0x28] sm:$0xff]  ;;  %v667_v46 = vld [vmem:[#allocation3 + $0x20] sm:$0xff]  ;;  %v670_v47 = vld [vmem:[#allocation3 + $0x38] sm:$0xff]  ;;  %vm638_vm12 = vcmask 1043456  }
 0x2db   :  { %v595_v22 = vrot.slane %v5800_v20, 1  ;;  %v596_v23 = vrot.slane %v5796_v19, 1  ;;  %v598_v24 = vrot.slane %v5803_v21, 1  ;;  %v4233_v27 = vpack.c.bf16 %v5796_v19, %v5791_v17  ;;  %757 = vmatprep.subr.bf16.mxu1 %v666_v31  ;;  %v669_v48 = vld [vmem:[#allocation3 + $0x30] sm:$0xff]  ;;  %v672_v49 = vld [vmem:[#allocation3 + $0x48] sm:$0xff]  ;;  %v671_v52 = vld [vmem:[#allocation3 + $0x40] sm:$0xff] }
 0x2dc   :  { %v609_v32 = vrot.slane %v5800_v20, 2  ;;  %v612_v33 = vrot.slane %v5803_v21, 2  ;;  %v624_v34 = vrot.slane %v5800_v20, 3  ;;  %v625_v35 = vrot.slane %v5796_v19, 3  ;;  %v674_v53 = vld [vmem:[#allocation3 + $0x58] sm:$0xff]  ;;  %v673_v57 = vld [vmem:[#allocation3 + $0x50] sm:$0xff]  ;;  %vm4231_vm13 = vmneg %vm574_vm10 }
 0x2dd   :  { %v597_v25 = vsel %vm428_vm1, %v595_v22, %v596_v23  ;;  %v599_v26 = vsel %vm428_vm1, %v596_v23, %v598_v24  ;;  %v627_v36 = vrot.slane %v5803_v21, 3  ;;  %v610_v37 = vrot.slane %v5796_v19, 2  ;;  %v676_v61 = vld [vmem:[#allocation3 + $0x68] sm:$0xff]  ;;  %v675_v6 = vld [vmem:[#allocation3 + $0x60] sm:$0xff]  ;;  %v678_v8 = vld [vmem:[#allocation3 + $0x78] sm:$0xff] }
 0x2de   :  { %v654_v28 = vpack.c.bf16 %v599_v26, %v597_v25  ;;  %v5819_v39 = vsel %vm623_vm11, %v624_v34, %v625_v35  ;;  %758 = vmatpush1.bf16.msra.mxu1 %v665_v38  ;;  %v5840_v54 = vsel %vm574_vm10, %v5835_v50, %v579_v51  ;;  %v5844_v55 = vsel %vm574_vm10, 0.0, %v5835_v50  ;;  %v677_v14 = vld [vmem:[#allocation3 + $0x70] sm:$0xff]  ;;  %v680_v18 = vld [vmem:[#allocation3 + $0x88] sm:$0xff]  ;;  %v679_v24 = vld [vmem:[#allocation3 + $0x80] sm:$0xff] }
 0x2df   :  { %v5822_v40 = vsel %vm623_vm11, %v625_v35, %v627_v36  ;;  %v5827_v43 = vsel %vm439_vm2, %v609_v32, %v610_v37  ;;  %v5830_v44 = vsel %vm439_vm2, %v610_v37, %v612_v33  ;;  %759 = vmatprep.subr.bf16.mxu1 %v668_v41  ;;  %v5847_v56 = vsel %vm574_vm10, %v579_v51, 0.0  ;;  %v682_v25 = vld [vmem:[#allocation3 + $0x98] sm:$0xff]  ;;  %v681_v29 = vld [vmem:[#allocation3 + $0x90] sm:$0xff]  ;;  %v684_v30 = vld [vmem:[#allocation3 + $0xa8] sm:$0xff] }
 0x2e0   :  { %787 = vmatprep.mubr.bf16.mxu1 %v654_v28  ;;  %v656_v42 = vpack.c.bf16 %v5822_v40, %v5819_v39  ;;  %v655_v45 = vpack.c.bf16 %v5830_v44, %v5827_v43  ;;  %v629_v58 = vrot.slane %v5844_v55, 3  ;;  %v630_v59 = vrot.slane %v5840_v54, 3  ;;  %v683_v34 = vld [vmem:[#allocation3 + $0xa0] sm:$0xff]  ;;  %v686_v35 = vld [vmem:[#allocation3 + $0xb8] sm:$0xff]  ;;  %v685_v36 = vld [vmem:[#allocation3 + $0xb0] sm:$0xff] }
 0x2e1   :  { %v632_v60 = vrot.slane %v5847_v56, 3  ;;  %v614_v62 = vrot.slane %v5844_v55, 2  ;;  %v615_v63 = vrot.slane %v5840_v54, 2  ;;  %v617_v0 = vrot.slane %v5847_v56, 2  ;;  %v688_v37 = vld [vmem:[#allocation3 + $0xc8] sm:$0xff]  ;;  %v687_v38 = vld [vmem:[#allocation3 + $0xc0] sm:$0xff] }
 0x2e2   :  { %760 = vmatpush1.bf16.msra.mxu1 %v667_v46  ;;  %v5856_v1 = vsel %vm623_vm11, %v629_v58, %v630_v59  ;;  %v639_v9 = vrot.slane %v5800_v20, 4  ;;  %v640_v10 = vrot.slane %v5796_v19, 4  ;;  %v642_v12 = vrot.slane %v5803_v21, 4  ;;  %v690_v41 = vld [vmem:[#allocation3 + $0xd8] sm:$0xff]  ;;  %v689_v46 = vld [vmem:[#allocation3 + $0xd0] sm:$0xff]  ;;  %v704_v19 = vld [vmem:[#allocation3 + $0x148] sm:$0xff] }
 0x2e3   :  { %761 = vmatprep.subr.bf16.mxu1 %v670_v47  ;;  %v5859_v2 = vsel %vm623_vm11, %v630_v59, %v632_v60  ;;  %v5864_v4 = vsel %vm439_vm2, %v614_v62, %v615_v63  ;;  %v5867_v5 = vsel %vm439_vm2, %v615_v63, %v617_v0  ;;  %v644_v21 = vrot.slane %v5844_v55, 4  ;;  %v692_v47 = vld [vmem:[#allocation3 + $0xe8] sm:$0xff]  ;;  %v698_v62 = vld [vmem:[#allocation3 + $0x118] sm:$0xff]  ;;  %v697_v63 = vld [vmem:[#allocation3 + $0x110] sm:$0xff] }
 0x2e4   :  { %v661_v3 = vpack.c.bf16 %v5859_v2, %v5856_v1  ;;  %v660_v7 = vpack.c.bf16 %v5867_v5, %v5864_v4  ;;  %v5875_v22 = vsel %vm638_vm12, %v639_v9, %v640_v10  ;;  %v5878_v23 = vsel %vm638_vm12, %v640_v10, %v642_v12  ;;  %v696_v60 = vld [vmem:[#allocation3 + $0x108] sm:$0xff]  ;;  %v702_v9 = vld [vmem:[#allocation3 + $0x138] sm:$0xff]  ;;  %v701_v17 = vld [vmem:[#allocation3 + $0x130] sm:$0xff] }
 0x2e5   :  { %v657_v20 = vpack.c.bf16 %v5878_v23, %v5875_v22  ;;  %v645_v26 = vrot.slane %v5840_v54, 4  ;;  %v647_v28 = vrot.slane %v5847_v56, 4  ;;  %v601_v51 = vrot.slane %v5840_v54, 1  ;;  %v700_v0 = vld [vmem:[#allocation3 + $0x128] sm:$0xff]  ;;  %v706_v10 = vld [vmem:[#allocation3 + $0x158] sm:$0xff]  ;;  %v707_v12 = vld [vmem:[#allocation3 + $0x160] sm:$0xff] }
 0x2e6   :  { %762 = vmatpush1.bf16.msra.mxu1 %v669_v48  ;;  %v691_v48 = vld [vmem:[#allocation3 + $0xe0] sm:$0xff]  ;;  %vm5345_vm14 = vmmov 1   ;;  %v712_v39 = vld [vmem:[#allocation3 + $0x188] sm:$0xff]  ;;  %v733_v43 = vld [vmem:[#allocation3 + $0x230] sm:$0xff] }
 0x2e7   :  { %763 = vmatprep.subr.bf16.mxu1 %v672_v49  ;;  %v5886_v31 = vsel %vm638_vm12, %v644_v21, %v645_v26  ;;  %v5889_v32 = vsel %vm638_vm12, %v645_v26, %v647_v28  ;;  %v600_v49 = vrot.slane %v5844_v55, 1  ;;  %vm5900_vm15 = vmpackc.low %vm5345_vm14, %vm4231_vm13  ;;  %v711_v40 = vld [vmem:[#allocation3 + $0x180] sm:$0xff]  ;;  %v718_v26 = vld [vmem:[#allocation3 + $0x1b8] sm:$0xff] }
 0x2e8   :  { %v662_v33 = vpack.c.bf16 %v5889_v32, %v5886_v31  ;;  %v715_v21 = vld [vmem:[#allocation3 + $0x1a0] sm:$0xff]  ;;  %v717_v28 = vld [vmem:[#allocation3 + $0x1b0] sm:$0xff]  ;;  %v736_v44 = vld [vmem:[#allocation3 + $0x248] sm:$0xff] }
 0x2e9   :  { %v602_v58 = vsel %vm428_vm1, %v600_v49, %v601_v51  ;;  %v729_v49 = vld [vmem:[#allocation3 + $0x210] sm:$0xff]  ;;  %v738_v1 = vld [vmem:[#allocation3 + $0x258] sm:$0xff] }
 0x2ea   :  { %764 = vmatpush1.bf16.msra.mxu1 %v671_v52  ;;  %v603_v52 = vrot.slane %v5847_v56, 1  ;;  %v695_v56 = vld [vmem:[#allocation3 + $0x100] sm:$0xff]  ;;  %v737_v2 = vld [vmem:[#allocation3 + $0x250] sm:$0xff]  ;;  %v742_v4 = vld [vmem:[#allocation3 + $0x278] sm:$0xff] }
 0x2eb   :  { %765 = vmatprep.subr.bf16.mxu1 %v674_v53  ;;  %v694_v53 = vld [vmem:[#allocation3 + $0xf8] sm:$0xff]  ;;  %v741_v5 = vld [vmem:[#allocation3 + $0x270] sm:$0xff] }
 0x2ec   :  { %v604_v59 = vsel %vm428_vm1, %v601_v51, %v603_v52  ;;  %v732_v51 = vld [vmem:[#allocation3 + $0x228] sm:$0xff]  ;;  %v731_v52 = vld [vmem:[#allocation3 + $0x220] sm:$0xff] }
 0x2ee   :  { %766 = vmatpush1.bf16.msra.mxu1 %v673_v57  ;;  %v693_v57 = vld [vmem:[#allocation3 + $0xf0] sm:$0xff] }
 0x2ef   :  { %767 = vmatprep.subr.bf16.mxu1 %v676_v61  ;;  %v659_v61 = vpack.c.bf16 %v604_v59, %v602_v58  ;;  %v739_v58 = vld [vmem:[#allocation3 + $0x260] sm:$0xff] }
 0x2f2   :  { %768 = vmatpush1.bf16.msra.mxu1 %v675_v6  ;;  %v4237_v6 = vpack.c.bf16 %v5840_v54, %v5835_v50  ;;  %v705_v50 = vld [vmem:[#allocation3 + $0x150] sm:$0xff]  ;;  %v708_v54 = vld [vmem:[#allocation3 + $0x168] sm:$0xff] }
 0x2f3   :  { %769 = vmatprep.subr.bf16.mxu1 %v678_v8  ;;  %v699_v8 = vld [vmem:[#allocation3 + $0x120] sm:$0xff] }
 0x2f6   :  { %770 = vmatpush1.bf16.msra.mxu1 %v677_v14  ;;  %v710_v14 = vld [vmem:[#allocation3 + $0x178] sm:$0xff] }
 0x2f7   :  { %771 = vmatprep.subr.bf16.mxu1 %v680_v18  ;;  %v709_v18 = vld [vmem:[#allocation3 + $0x170] sm:$0xff] }
 0x2fa   :  { %772 = vmatpush1.bf16.msra.mxu1 %v679_v24  ;;  %v713_v24 = vld [vmem:[#allocation3 + $0x190] sm:$0xff] }
 0x2fb   :  { %773 = vmatprep.subr.bf16.mxu1 %v682_v25  ;;  %v716_v25 = vld [vmem:[#allocation3 + $0x1a8] sm:$0xff] }
 0x2fe   :  { %774 = vmatpush1.bf16.msra.mxu1 %v681_v29  ;;  %v720_v29 = vld [vmem:[#allocation3 + $0x1c8] sm:$0xff] }
 0x2ff   :  { %775 = vmatprep.subr.bf16.mxu1 %v684_v30  ;;  %v719_v30 = vld [vmem:[#allocation3 + $0x1c0] sm:$0xff] }
 0x302   :  { %776 = vmatpush1.bf16.msra.mxu1 %v683_v34  ;;  %v722_v34 = vld [vmem:[#allocation3 + $0x1d8] sm:$0xff] }
 0x303   :  { %777 = vmatprep.subr.bf16.mxu1 %v686_v35  ;;  %v721_v35 = vld [vmem:[#allocation3 + $0x1d0] sm:$0xff] }
 0x306   :  { %778 = vmatpush1.bf16.msra.mxu1 %v685_v36  ;;  %v724_v36 = vld [vmem:[#allocation3 + $0x1e8] sm:$0xff] }
 0x307   :  { %779 = vmatprep.subr.bf16.mxu1 %v688_v37  ;;  %v723_v37 = vld [vmem:[#allocation3 + $0x1e0] sm:$0xff] }
 0x30a   :  { %780 = vmatpush1.bf16.msra.mxu1 %v687_v38  ;;  %v726_v38 = vld [vmem:[#allocation3 + $0x1f8] sm:$0xff] }
 0x30b   :  { %781 = vmatprep.subr.bf16.mxu1 %v690_v41  ;;  %v725_v41 = vld [vmem:[#allocation3 + $0x1f0] sm:$0xff] }
 0x30e   :  { %782 = vmatpush1.bf16.msra.mxu1 %v689_v46  ;;  %v728_v46 = vld [vmem:[#allocation3 + $0x208] sm:$0xff] }
 0x30f   :  { %783 = vmatprep.subr.bf16.mxu1 %v692_v47  ;;  %v727_v47 = vld [vmem:[#allocation3 + $0x200] sm:$0xff] }
 0x312   :  { %784 = vmatpush1.bf16.msra.mxu1 %v691_v48  ;;  %v730_v48 = vld [vmem:[#allocation3 + $0x218] sm:$0xff] }
 0x313   :  { %785 = vmatprep.subr.bf16.mxu1 %v694_v53  ;;  %v734_v53 = vld [vmem:[#allocation3 + $0x238] sm:$0xff] }
 0x316   :  { %786 = vmatpush1.bf16.msra.mxu1 %v693_v57  ;;  %v5346_v57 = vmov 0  }
 0x317   :  { %808 = vmatprep.subr.bf16.mxu1 %v696_v60 }
 0x319   :  { %4234 = vmatmul.mubr.msk.bf16.vlgmr.msra.gmra.mrb[0].mxu1 %vm5900_vm15, %v4233_v27  ;;  %v703_v27 = vld [vmem:[#allocation3 + $0x140] sm:$0xff] }
 0x31a   :  { %809 = vmatpush1.bf16.msra.mxu1 %v695_v56  ;;  %797 = vmatprep.mubr.bf16.mxu1 %v659_v61  ;;  %v743_v61 = vld [vmem:[#allocation19] sm:$0x3] }
 0x31b   :  { %810 = vmatprep.subr.bf16.mxu1 %v698_v62 }
 0x31e   :  { %811 = vmatpush1.bf16.msra.mxu1 %v697_v63 }
 0x31f   :  { %812 = vmatprep.subr.bf16.mxu1 %v700_v0 }
 0x321   :  { %4238 = vmatmul.mubr.msk.bf16.gmra.mrb[4].mxu1 %vm5900_vm15, %v4237_v6 }
 0x322   :  { %813 = vmatpush1.bf16.msra.mxu1 %v699_v8  ;;  %840 = vmatprep.mubr.bf16.mxu1 %v656_v42  ;;  %v714_v42 = vld [vmem:[#allocation3 + $0x198] sm:$0xff] }
 0x323   :  { %814 = vmatprep.subr.bf16.mxu1 %v702_v9 }
 0x326   :  { %815 = vmatpush1.bf16.msra.mxu1 %v701_v17 }
 0x327   :  { %816 = vmatprep.subr.bf16.mxu1 %v704_v19 }
 0x32a   :  { %817 = vmatpush1.bf16.msra.mxu1 %v703_v27 }
 0x32b   :  { %818 = vmatprep.subr.bf16.mxu1 %v706_v10 }
 0x32e   :  { %819 = vmatpush1.bf16.msra.mxu1 %v705_v50 }
 0x32f   :  { %820 = vmatprep.subr.bf16.mxu1 %v708_v54 }
 0x332   :  { %821 = vmatpush1.bf16.msra.mxu1 %v707_v12 }
 0x333   :  { %822 = vmatprep.subr.bf16.mxu1 %v710_v14 }
 0x336   :  { %823 = vmatpush1.bf16.msra.mxu1 %v709_v18 }
 0x337   :  { %824 = vmatprep.subr.bf16.mxu1 %v712_v39 }
 0x33a   :  { %825 = vmatpush1.bf16.msra.mxu1 %v711_v40 }
 0x33b   :  { %826 = vmatprep.subr.bf16.mxu1 %v714_v42 }
 0x33e   :  { %827 = vmatpush1.bf16.msra.mxu1 %v713_v24 }
 0x33f   :  { %828 = vmatprep.subr.bf16.mxu1 %v716_v25 }
 0x342   :  { %829 = vmatpush1.bf16.msra.mxu1 %v715_v21 }
 0x343   :  { %830 = vmatprep.subr.bf16.mxu1 %v718_v26 }
 0x346   :  { %831 = vmatpush1.bf16.msra.mxu1 %v717_v28 }
 0x347   :  { %832 = vmatprep.subr.bf16.mxu1 %v720_v29 }
 0x34a   :  { %833 = vmatpush1.bf16.msra.mxu1 %v719_v30 }
 0x34b   :  { %834 = vmatprep.subr.bf16.mxu1 %v722_v34 }
 0x34e   :  { %835 = vmatpush1.bf16.msra.mxu1 %v721_v35 }
 0x34f   :  { %836 = vmatprep.subr.bf16.mxu1 %v724_v36 }
 0x352   :  { %837 = vmatpush1.bf16.msra.mxu1 %v723_v37 }
 0x353   :  { %838 = vmatprep.subr.bf16.mxu1 %v726_v38 }
 0x356   :  { %839 = vmatpush1.bf16.msra.mxu1 %v725_v41 }
 0x357   :  { %861 = vmatprep.subr.bf16.mxu1 %v728_v46 }
 0x359   :  { %841 = vmatmul.mubr.bf16.vlgmr.msra.gmra.mrb[0].mxu1 %v655_v45  ;;  %v735_v45 = vld [vmem:[#allocation3 + $0x240] sm:$0xff] }
 0x35a   :  { %862 = vmatpush1.bf16.msra.mxu1 %v727_v47  ;;  %850 = vmatprep.mubr.bf16.mxu1 %v661_v3  ;;  %v740_v3 = vld [vmem:[#allocation3 + $0x268] sm:$0xff] }
 0x35b   :  { %863 = vmatprep.subr.bf16.mxu1 %v730_v48 }
 0x35e   :  { %864 = vmatpush1.bf16.msra.mxu1 %v729_v49 }
 0x35f   :  { %865 = vmatprep.subr.bf16.mxu1 %v732_v51 }
 0x361   :  { %851 = vmatmul.mubr.bf16.gmra.mrb[4].mxu1 %v660_v7  ;;  %v745_v7 = vlaneseq }
 0x362   :  { %866 = vmatpush1.bf16.msra.mxu1 %v731_v52  ;;  %893 = vmatprep.mubr.bf16.mxu1 %v5346_v57 }
 0x363   :  { %867 = vmatprep.subr.bf16.mxu1 %v734_v53  ;;  %v5933_v59 = vshrl.u32 %v745_v7, 7 }
 0x365   :  { %v5936_v60 = vsub.s32 0, %v5933_v59  ;;  %v5939_v56 = vsub.s32 1, %v5933_v59 }
 0x366   :  { %868 = vmatpush1.bf16.msra.mxu1 %v733_v43 }
 0x367   :  { %869 = vmatprep.subr.bf16.mxu1 %v736_v44  ;;  %v748_v62 = vrot.slane %v743_v61, %v5936_v60  ;;  %v752_v22 = vrot.slane %v743_v61, %v5939_v56 }
 0x36a   :  { %870 = vmatpush1.bf16.msra.mxu1 %v735_v45 }
 0x36b   :  { %871 = vmatprep.subr.bf16.mxu1 %v738_v1 }
 0x36e   :  { %872 = vmatpush1.bf16.msra.mxu1 %v737_v2 }
 0x36f   :  { %873 = vmatprep.subr.bf16.mxu1 %v740_v3 }
 0x372   :  { %874 = vmatpush1.bf16.msra.mxu1 %v739_v58 }
 0x373   :  { %875 = vmatprep.subr.bf16.mxu1 %v742_v4 }
 0x376   :  { %876 = vmatpush1.bf16.msra.mxu1 %v741_v5 }
 0x379   :  { %894 = vmatmul.mubr.bf16.vlgmr.msra.gmra.mrb[0].mxu1 %v657_v20 }
 0x37a   :  { %903 = vmatprep.mubr.bf16.mxu1 %v5346_v57 }
 0x381   :  { %904 = vmatmul.mubr.bf16.gmra.mrb[4].mxu1 %v662_v33 }
 0x44c   :  { %v895_v23 = vpop.f32.mrb[0].mxu1 }
 0x44d   :  { %v5943_v20 = vadd.f32 %v895_v23, %v748_v62  ;;  %v897_v63 = vpop.f32.mrb[1].mxu1 }
 0x44e   :  { %v4607_v31 = vadd.f32 %v897_v63, %v752_v22  ;;  %v899_v32 = vpop.f32.mrb[2].mxu1 }
 0x44f   :  { %v914_v33 = vmax.f32 %v5943_v20, 0.0  ;;  %v5946_v0 = vadd.f32 %v899_v32, %v748_v62  ;;  %v901_v6 = vpop.f32.mrb[3].mxu1 }
 0x450   :  { %v915_v8 = vmax.f32 %v4607_v31, 0.0  ;;  %v4609_v9 = vadd.f32 %v901_v6, %v752_v22 }
 0x451   :  { %v916_v17 = vmax.f32 %v5946_v0, 0.0 }
 0x452   :  { %v917_v19 = vmax.f32 %v4609_v9, 0.0 }
 0x454   :  { %v905_v27 = vpop.f32.mrb[4].mxu1 }
 0x455   :  { %v5949_v10 = vadd.f32 %v905_v27, %v748_v62  ;;  %v907_v50 = vpop.f32.mrb[5].mxu1 }
 0x456   :  { %v5951_v54 = vadd.f32 %v907_v50, %v752_v22  ;;  %v909_v12 = vpop.f32.mrb[6].mxu1 }
 0x457   :  { %v918_v14 = vmax.f32 %v5949_v10, 0.0  ;;  %v5954_v18 = vadd.f32 %v909_v12, %v748_v62  ;;  %v911_v39 = vpop.f32.mrb[7].mxu1 }
 0x458   :  { %v919_v40 = vmax.f32 %v5951_v54, 0.0  ;;  %v5957_v42 = vadd.f32 %v911_v39, %v752_v22 }
 0x459   :  { %v920_v24 = vmax.f32 %v5954_v18, 0.0 }
 0x45a   :  { %v921_v25 = vmax.f32 %v5957_v42, 0.0 }
 0x45b   :  { %5289 = dma.done.wait [#allocation12 + $0x2], 40960 }
 0x45c   :  { %5290 = vsyncadd [#allocation12 + $0x2], 4294926336  ;;  %v5961_v21 = vrot.slane %v915_v8, 6  ;;  %v5963_v26 = vrot.slane %v917_v19, 6  ;;  %v1107_v30 = vld [vmem:[#allocation4 + $0x8] sm:$0xff]  ;;  %v1109_v34 = vld [vmem:[#allocation4 + $0x18] sm:$0xff] }
 0x45d   :  { %v1106_v35 = vld [vmem:[#allocation4] sm:$0xff]  ;;  %1448 = vmatprep.subr.bf16.mxu0 %v1107_v30  ;;  %1713 = vmatprep.subr.bf16.mxu1 %v1109_v34  ;;  %v1108_v36 = vld [vmem:[#allocation4 + $0x10] sm:$0xff]  ;;  %v1111_v37 = vld [vmem:[#allocation4 + $0x28] sm:$0xff] }
 0x45e   :  { %v5968_v28 = vsel %vm574_vm10, %v5961_v21, %v5963_v26  ;;  %v1113_v38 = vld [vmem:[#allocation4 + $0x38] sm:$0xff]  ;;  %1449 = vmatpush1.bf16.msra.mxu0 %v1106_v35  ;;  %1714 = vmatpush1.bf16.msra.mxu1 %v1108_v36  ;;  %v1110_v41 = vld [vmem:[#allocation4 + $0x20] sm:$0xff]  ;;  %v1112_v46 = vld [vmem:[#allocation4 + $0x30] sm:$0xff]  ;;  %v6006_v42 = vsel %vm574_vm10, 0.0, %v5961_v21 }
 0x45f   :  { %v4241_v29 = vpack.c.bf16 %v5968_v28, %v5961_v21  ;;  %1450 = vmatprep.subr.bf16.mxu0 %v1111_v37  ;;  %1715 = vmatprep.subr.bf16.mxu1 %v1113_v38  ;;  %v1115_v47 = vld [vmem:[#allocation4 + $0x48] sm:$0xff]  ;;  %v1117_v48 = vld [vmem:[#allocation4 + $0x58] sm:$0xff]  ;;  %v1114_v49 = vld [vmem:[#allocation4 + $0x40] sm:$0xff]  ;;  %v977_v10 = vrot.slane %v6006_v42, 1 }
 0x460   :  { %v1116_v51 = vld [vmem:[#allocation4 + $0x50] sm:$0xff]  ;;  %v1119_v52 = vld [vmem:[#allocation4 + $0x68] sm:$0xff]  ;;  %v1121_v53 = vld [vmem:[#allocation4 + $0x78] sm:$0xff] }
 0x461   :  { %4242 = vmatprep.mubr.msk.bf16.mxu0 %vm5900_vm15, %v4241_v29  ;;  %4258 = vmatprep.mubr.msk.bf16.mxu1 %vm5900_vm15, %v4241_v29  ;;  %v1118_v43 = vld [vmem:[#allocation4 + $0x60] sm:$0xff]  ;;  %v1120_v44 = vld [vmem:[#allocation4 + $0x70] sm:$0xff]  ;;  %v1123_v45 = vld [vmem:[#allocation4 + $0x88] sm:$0xff] }
 0x462   :  { %1451 = vmatpush1.bf16.msra.mxu0 %v1110_v41  ;;  %1716 = vmatpush1.bf16.msra.mxu1 %v1112_v46  ;;  %v1125_v1 = vld [vmem:[#allocation4 + $0x98] sm:$0xff]  ;;  %v1122_v2 = vld [vmem:[#allocation4 + $0x80] sm:$0xff]  ;;  %v1124_v3 = vld [vmem:[#allocation4 + $0x90] sm:$0xff] }
 0x463   :  { %1452 = vmatprep.subr.bf16.mxu0 %v1115_v47  ;;  %1717 = vmatprep.subr.bf16.mxu1 %v1117_v48  ;;  %v1127_v58 = vld [vmem:[#allocation4 + $0xa8] sm:$0xff]  ;;  %v1129_v4 = vld [vmem:[#allocation4 + $0xb8] sm:$0xff]  ;;  %v1126_v5 = vld [vmem:[#allocation4 + $0xa0] sm:$0xff] }
 0x464   :  { %v1128_v7 = vld [vmem:[#allocation4 + $0xb0] sm:$0xff]  ;;  %v1131_v61 = vld [vmem:[#allocation4 + $0xc8] sm:$0xff]  ;;  %v1133_v62 = vld [vmem:[#allocation4 + $0xd8] sm:$0xff] }
 0x465   :  { %v1130_v22 = vld [vmem:[#allocation4 + $0xc0] sm:$0xff]  ;;  %v1132_v23 = vld [vmem:[#allocation4 + $0xd0] sm:$0xff]  ;;  %v1135_v63 = vld [vmem:[#allocation4 + $0xe8] sm:$0xff] }
 0x466   :  { %1453 = vmatpush1.bf16.msra.mxu0 %v1114_v49  ;;  %1718 = vmatpush1.bf16.msra.mxu1 %v1116_v51  ;;  %v1137_v31 = vld [vmem:[#allocation4 + $0xf8] sm:$0xff]  ;;  %v1134_v32 = vld [vmem:[#allocation4 + $0xe0] sm:$0xff]  ;;  %v1136_v6 = vld [vmem:[#allocation4 + $0xf0] sm:$0xff] }
 0x467   :  { %1454 = vmatprep.subr.bf16.mxu0 %v1119_v52  ;;  %1719 = vmatprep.subr.bf16.mxu1 %v1121_v53  ;;  %v1139_v8 = vld [vmem:[#allocation4 + $0x108] sm:$0xff]  ;;  %v1141_v9 = vld [vmem:[#allocation4 + $0x118] sm:$0xff]  ;;  %v1138_v19 = vld [vmem:[#allocation4 + $0x100] sm:$0xff] }
 0x468   :  { %v1140_v27 = vld [vmem:[#allocation4 + $0x110] sm:$0xff]  ;;  %v1143_v50 = vld [vmem:[#allocation4 + $0x128] sm:$0xff]  ;;  %v1145_v12 = vld [vmem:[#allocation4 + $0x138] sm:$0xff] }
 0x469   :  { %v1142_v39 = vld [vmem:[#allocation4 + $0x120] sm:$0xff]  ;;  %v1144_v29 = vld [vmem:[#allocation4 + $0x130] sm:$0xff]  ;;  %v1147_v30 = vld [vmem:[#allocation4 + $0x148] sm:$0xff] }
 0x46a   :  { %1455 = vmatpush1.bf16.msra.mxu0 %v1118_v43  ;;  %1720 = vmatpush1.bf16.msra.mxu1 %v1120_v44  ;;  %v1149_v34 = vld [vmem:[#allocation4 + $0x158] sm:$0xff]  ;;  %v1146_v35 = vld [vmem:[#allocation4 + $0x140] sm:$0xff]  ;;  %v1148_v36 = vld [vmem:[#allocation4 + $0x150] sm:$0xff] }
 0x46b   :  { %1456 = vmatprep.subr.bf16.mxu0 %v1123_v45  ;;  %1721 = vmatprep.subr.bf16.mxu1 %v1125_v1  ;;  %v1151_v37 = vld [vmem:[#allocation4 + $0x168] sm:$0xff]  ;;  %v1153_v38 = vld [vmem:[#allocation4 + $0x178] sm:$0xff]  ;;  %v1150_v41 = vld [vmem:[#allocation4 + $0x160] sm:$0xff] }
 0x46c   :  { %v1152_v46 = vld [vmem:[#allocation4 + $0x170] sm:$0xff]  ;;  %v1155_v47 = vld [vmem:[#allocation4 + $0x188] sm:$0xff]  ;;  %v1157_v48 = vld [vmem:[#allocation4 + $0x198] sm:$0xff] }
 0x46d   :  { %v1154_v49 = vld [vmem:[#allocation4 + $0x180] sm:$0xff]  ;;  %v1156_v51 = vld [vmem:[#allocation4 + $0x190] sm:$0xff]  ;;  %v1159_v52 = vld [vmem:[#allocation4 + $0x1a8] sm:$0xff] }
 0x46e   :  { %1457 = vmatpush1.bf16.msra.mxu0 %v1122_v2  ;;  %1722 = vmatpush1.bf16.msra.mxu1 %v1124_v3  ;;  %v1161_v53 = vld [vmem:[#allocation4 + $0x1b8] sm:$0xff]  ;;  %v1158_v43 = vld [vmem:[#allocation4 + $0x1a0] sm:$0xff]  ;;  %v1160_v44 = vld [vmem:[#allocation4 + $0x1b0] sm:$0xff]  ;;  %v5978_v2 = vrot.slane %v914_v33, 6  ;;  %v5982_v3 = vrot.slane %v916_v17, 6 }
 0x46f   :  { %1458 = vmatprep.subr.bf16.mxu0 %v1127_v58  ;;  %1723 = vmatprep.subr.bf16.mxu1 %v1129_v4  ;;  %v1163_v45 = vld [vmem:[#allocation4 + $0x1c8] sm:$0xff]  ;;  %v1165_v1 = vld [vmem:[#allocation4 + $0x1d8] sm:$0xff]  ;;  %v1162_v58 = vld [vmem:[#allocation4 + $0x1c0] sm:$0xff] }
 0x470   :  { %v1164_v4 = vld [vmem:[#allocation4 + $0x1d0] sm:$0xff]  ;;  %v5995_v20 = vsel %vm574_vm10, %v5978_v2, %v5982_v3  ;;  %v1166_v33 = vld [vmem:[#allocation4 + $0x1e0] sm:$0xff]  ;;  %v1171_v17 = vld [vmem:[#allocation4 + $0x208] sm:$0xff] }
 0x471   :  { %v1168_v0 = vld [vmem:[#allocation4 + $0x1f0] sm:$0xff]  ;;  %v4245_v54 = vpack.c.bf16 %v5995_v20, %v5978_v2 }
 0x472   :  { %1459 = vmatpush1.bf16.msra.mxu0 %v1126_v5  ;;  %1724 = vmatpush1.bf16.msra.mxu1 %v1128_v7  ;;  %v1167_v5 = vld [vmem:[#allocation4 + $0x1e8] sm:$0xff]  ;;  %v1169_v7 = vld [vmem:[#allocation4 + $0x1f8] sm:$0xff] }
 0x473   :  { %1460 = vmatprep.subr.bf16.mxu0 %v1131_v61  ;;  %1725 = vmatprep.subr.bf16.mxu1 %v1133_v62  ;;  %v5986_v61 = vrot.slane %v919_v40, 6  ;;  %v5990_v62 = vrot.slane %v921_v25, 6  ;;  %v6010_v25 = vrot.slane %v918_v14, 6  ;;  %v978_v14 = vrot.slane %v5968_v28, 1 }
 0x475   :  { %v6002_v40 = vsel %vm574_vm10, %v5986_v61, %v5990_v62 }
 0x476   :  { %1461 = vmatpush1.bf16.msra.mxu0 %v1130_v22  ;;  %1726 = vmatpush1.bf16.msra.mxu1 %v1132_v23  ;;  %v1173_v22 = vld [vmem:[#allocation4 + $0x218] sm:$0xff]  ;;  %v6014_v23 = vrot.slane %v920_v24, 6  ;;  %v4249_v21 = vpack.c.bf16 %v6002_v40, %v5986_v61 }
 0x477   :  { %1462 = vmatprep.subr.bf16.mxu0 %v1135_v63  ;;  %1727 = vmatprep.subr.bf16.mxu1 %v1137_v31  ;;  %v6018_v63 = vsel %vm574_vm10, %v5963_v26, 0.0  ;;  %v1170_v31 = vld [vmem:[#allocation4 + $0x200] sm:$0xff] }
 0x478   :  { %v982_v18 = vrot.slane %v6018_v63, 1  ;;  %v6032_v24 = vsel %vm574_vm10, %v6010_v25, %v6014_v23  ;;  %v1174_v26 = vld [vmem:[#allocation4 + $0x220] sm:$0xff] }
 0x47a   :  { %1463 = vmatpush1.bf16.msra.mxu0 %v1134_v32  ;;  %1728 = vmatpush1.bf16.msra.mxu1 %v1136_v6  ;;  %v1172_v32 = vld [vmem:[#allocation4 + $0x210] sm:$0xff]  ;;  %v1175_v6 = vld [vmem:[#allocation4 + $0x228] sm:$0xff] }
 0x47b   :  { %1464 = vmatprep.subr.bf16.mxu0 %v1139_v8  ;;  %1729 = vmatprep.subr.bf16.mxu1 %v1141_v9  ;;  %v1177_v8 = vld [vmem:[#allocation4 + $0x238] sm:$0xff]  ;;  %v1176_v9 = vld [vmem:[#allocation4 + $0x230] sm:$0xff] }
 0x47e   :  { %1465 = vmatpush1.bf16.msra.mxu0 %v1138_v19  ;;  %1730 = vmatpush1.bf16.msra.mxu1 %v1140_v27  ;;  %v1179_v19 = vld [vmem:[#allocation4 + $0x248] sm:$0xff]  ;;  %v1181_v27 = vld [vmem:[#allocation4 + $0x258] sm:$0xff] }
 0x47f   :  { %1466 = vmatprep.subr.bf16.mxu0 %v1143_v50  ;;  %1731 = vmatprep.subr.bf16.mxu1 %v1145_v12  ;;  %v4253_v50 = vpack.c.bf16 %v6032_v24, %v6010_v25  ;;  %v979_v12 = vsel %vm428_vm1, %v977_v10, %v978_v14  ;;  %v1210_v10 = vld [vmem:[#allocation4 + $0x340] sm:$0xff] }
 0x482   :  { %1467 = vmatpush1.bf16.msra.mxu0 %v1142_v39  ;;  %1732 = vmatpush1.bf16.msra.mxu1 %v1144_v29  ;;  %v983_v39 = vsel %vm428_vm1, %v978_v14, %v982_v18  ;;  %v1178_v29 = vld [vmem:[#allocation4 + $0x240] sm:$0xff]  ;;  %v1212_v14 = vld [vmem:[#allocation4 + $0x350] sm:$0xff]  ;;  %v1215_v18 = vld [vmem:[#allocation4 + $0x368] sm:$0xff] }
 0x483   :  { %1468 = vmatprep.subr.bf16.mxu0 %v1147_v30  ;;  %1733 = vmatprep.subr.bf16.mxu1 %v1149_v34  ;;  %v1180_v30 = vld [vmem:[#allocation4 + $0x250] sm:$0xff]  ;;  %v1183_v34 = vld [vmem:[#allocation4 + $0x268] sm:$0xff] }
 0x486   :  { %1469 = vmatpush1.bf16.msra.mxu0 %v1146_v35  ;;  %1734 = vmatpush1.bf16.msra.mxu1 %v1148_v36  ;;  %v1185_v35 = vld [vmem:[#allocation4 + $0x278] sm:$0xff]  ;;  %v1089_v36 = vpack.c.bf16 %v983_v39, %v979_v12  ;;  %v1218_v12 = vld [vmem:[#allocation4 + $0x380] sm:$0xff]  ;;  %v1220_v39 = vld [vmem:[#allocation4 + $0x390] sm:$0xff] }
 0x487   :  { %1470 = vmatprep.subr.bf16.mxu0 %v1151_v37  ;;  %1735 = vmatprep.subr.bf16.mxu1 %v1153_v38  ;;  %v1182_v37 = vld [vmem:[#allocation4 + $0x260] sm:$0xff]  ;;  %v1184_v38 = vld [vmem:[#allocation4 + $0x270] sm:$0xff] }
 0x48a   :  { %1471 = vmatpush1.bf16.msra.mxu0 %v1150_v41  ;;  %1736 = vmatpush1.bf16.msra.mxu1 %v1152_v46  ;;  %v1187_v41 = vld [vmem:[#allocation4 + $0x288] sm:$0xff]  ;;  %v1189_v46 = vld [vmem:[#allocation4 + $0x298] sm:$0xff] }
 0x48b   :  { %1472 = vmatprep.subr.bf16.mxu0 %v1155_v47  ;;  %1737 = vmatprep.subr.bf16.mxu1 %v1157_v48  ;;  %v1186_v47 = vld [vmem:[#allocation4 + $0x280] sm:$0xff]  ;;  %v1188_v48 = vld [vmem:[#allocation4 + $0x290] sm:$0xff] }
 0x48e   :  { %1473 = vmatpush1.bf16.msra.mxu0 %v1154_v49  ;;  %1738 = vmatpush1.bf16.msra.mxu1 %v1156_v51  ;;  %v1191_v49 = vld [vmem:[#allocation4 + $0x2a8] sm:$0xff]  ;;  %v1193_v51 = vld [vmem:[#allocation4 + $0x2b8] sm:$0xff] }
 0x48f   :  { %1474 = vmatprep.subr.bf16.mxu0 %v1159_v52  ;;  %1739 = vmatprep.subr.bf16.mxu1 %v1161_v53  ;;  %v1190_v52 = vld [vmem:[#allocation4 + $0x2a0] sm:$0xff]  ;;  %v1192_v53 = vld [vmem:[#allocation4 + $0x2b0] sm:$0xff] }
 0x492   :  { %1475 = vmatpush1.bf16.msra.mxu0 %v1158_v43  ;;  %1740 = vmatpush1.bf16.msra.mxu1 %v1160_v44  ;;  %v1195_v43 = vld [vmem:[#allocation4 + $0x2c8] sm:$0xff]  ;;  %v1197_v44 = vld [vmem:[#allocation4 + $0x2d8] sm:$0xff] }
 0x493   :  { %1476 = vmatprep.subr.bf16.mxu0 %v1163_v45  ;;  %1741 = vmatprep.subr.bf16.mxu1 %v1165_v1  ;;  %v1194_v45 = vld [vmem:[#allocation4 + $0x2c0] sm:$0xff]  ;;  %v1196_v1 = vld [vmem:[#allocation4 + $0x2d0] sm:$0xff] }
 0x496   :  { %1477 = vmatpush1.bf16.msra.mxu0 %v1162_v58  ;;  %1742 = vmatpush1.bf16.msra.mxu1 %v1164_v4  ;;  %v1199_v58 = vld [vmem:[#allocation4 + $0x2e8] sm:$0xff]  ;;  %v1201_v4 = vld [vmem:[#allocation4 + $0x2f8] sm:$0xff] }
 0x497   :  { %1478 = vmatprep.subr.bf16.mxu0 %v1167_v5  ;;  %1743 = vmatprep.subr.bf16.mxu1 %v1169_v7  ;;  %v1198_v5 = vld [vmem:[#allocation4 + $0x2e0] sm:$0xff]  ;;  %v1200_v7 = vld [vmem:[#allocation4 + $0x2f0] sm:$0xff] }
 0x49a   :  { %1479 = vmatpush1.bf16.msra.mxu0 %v1166_v33  ;;  %1744 = vmatpush1.bf16.msra.mxu1 %v1168_v0  ;;  %v1203_v33 = vld [vmem:[#allocation4 + $0x308] sm:$0xff]  ;;  %v1205_v0 = vld [vmem:[#allocation4 + $0x318] sm:$0xff] }
 0x49b   :  { %1501 = vmatprep.subr.bf16.mxu0 %v1171_v17  ;;  %1766 = vmatprep.subr.bf16.mxu1 %v1173_v22  ;;  %v1202_v17 = vld [vmem:[#allocation4 + $0x300] sm:$0xff]  ;;  %v1204_v22 = vld [vmem:[#allocation4 + $0x310] sm:$0xff] }
 0x49d   :  { %4246 = vmatmul.mubr.msk.bf16.vlgmr.msra.gmra.mrb[4].mxu0 %vm5900_vm15, %v4245_v54  ;;  %4262 = vmatmul.mubr.msk.bf16.vlgmr.msra.gmra.mrb[8].mxu1 %vm5900_vm15, %v4245_v54  ;;  %v1207_v54 = vld [vmem:[#allocation4 + $0x328] sm:$0xff] }
 0x49e   :  { %1502 = vmatpush1.bf16.msra.mxu0 %v1170_v31  ;;  %1767 = vmatpush1.bf16.msra.mxu1 %v1172_v32  ;;  %v1209_v31 = vld [vmem:[#allocation4 + $0x338] sm:$0xff]  ;;  %v1206_v32 = vld [vmem:[#allocation4 + $0x320] sm:$0xff] }
 0x49f   :  { %1503 = vmatprep.subr.bf16.mxu0 %v1175_v6  ;;  %1768 = vmatprep.subr.bf16.mxu1 %v1177_v8  ;;  %v1208_v6 = vld [vmem:[#allocation4 + $0x330] sm:$0xff]  ;;  %v1211_v8 = vld [vmem:[#allocation4 + $0x348] sm:$0xff] }
 0x4a0   :  { %4250 = vmatprep.mubr.msk.bf16.mxu0 %vm5900_vm15, %v4249_v21  ;;  %4266 = vmatprep.mubr.msk.bf16.mxu1 %vm5900_vm15, %v4249_v21  ;;  %v1213_v21 = vld [vmem:[#allocation4 + $0x358] sm:$0xff] }
 0x4a2   :  { %1504 = vmatpush1.bf16.msra.mxu0 %v1174_v26  ;;  %1769 = vmatpush1.bf16.msra.mxu1 %v1176_v9  ;;  %v1217_v26 = vld [vmem:[#allocation4 + $0x378] sm:$0xff]  ;;  %v1214_v9 = vld [vmem:[#allocation4 + $0x360] sm:$0xff] }
 0x4a3   :  { %1505 = vmatprep.subr.bf16.mxu0 %v1179_v19  ;;  %1770 = vmatprep.subr.bf16.mxu1 %v1181_v27  ;;  %v1216_v19 = vld [vmem:[#allocation4 + $0x370] sm:$0xff]  ;;  %v1219_v27 = vld [vmem:[#allocation4 + $0x388] sm:$0xff] }
 0x4a5   :  { %4254 = vmatmul.mubr.msk.bf16.gmra.mrb[8].mxu0 %vm5900_vm15, %v4253_v50  ;;  %4270 = vmatmul.mubr.msk.bf16.gmra.mrb[12].mxu1 %vm5900_vm15, %v4253_v50  ;;  %v1221_v50 = vld [vmem:[#allocation4 + $0x398] sm:$0xff] }
 0x4a6   :  { %1506 = vmatpush1.bf16.msra.mxu0 %v1178_v29  ;;  %1771 = vmatpush1.bf16.msra.mxu1 %v1180_v30  ;;  %v1223_v29 = vld [vmem:[#allocation4 + $0x3a8] sm:$0xff]  ;;  %v1225_v30 = vld [vmem:[#allocation4 + $0x3b8] sm:$0xff] }
 0x4a7   :  { %1507 = vmatprep.subr.bf16.mxu0 %v1183_v34  ;;  %1772 = vmatprep.subr.bf16.mxu1 %v1185_v35  ;;  %v6048_v34 = vsel %vm574_vm10, 0.0, %v5978_v2  ;;  %v6052_v35 = vsel %vm574_vm10, %v5982_v3, 0.0  ;;  %v6063_v3 = vsel %vm574_vm10, %v5990_v62, 0.0  ;;  %v1230_v62 = vld [vmem:[#allocation4 + $0x3e0] sm:$0xff] }
 0x4a8   :  { %1533 = vmatprep.mubr.bf16.mxu0 %v1089_v36  ;;  %1798 = vmatprep.mubr.bf16.mxu1 %v1089_v36  ;;  %v1222_v36 = vld [vmem:[#allocation4 + $0x3a0] sm:$0xff]  ;;  %v980_v2 = vrot.slane %v6052_v35, 1 }
 0x4aa   :  { %1508 = vmatpush1.bf16.msra.mxu0 %v1182_v37  ;;  %1773 = vmatpush1.bf16.msra.mxu1 %v1184_v38  ;;  %v1224_v37 = vld [vmem:[#allocation4 + $0x3b0] sm:$0xff]  ;;  %v1227_v38 = vld [vmem:[#allocation4 + $0x3c8] sm:$0xff] }
 0x4ab   :  { %1509 = vmatprep.subr.bf16.mxu0 %v1187_v41  ;;  %1774 = vmatprep.subr.bf16.mxu1 %v1189_v46  ;;  %v1229_v41 = vld [vmem:[#allocation4 + $0x3d8] sm:$0xff]  ;;  %v974_v46 = vrot.slane %v6048_v34, 1 }
 0x4ae   :  { %1510 = vmatpush1.bf16.msra.mxu0 %v1186_v47  ;;  %1775 = vmatpush1.bf16.msra.mxu1 %v1188_v48  ;;  %v975_v47 = vrot.slane %v5995_v20, 1  ;;  %v6059_v48 = vsel %vm574_vm10, 0.0, %v5986_v61 }
 0x4af   :  { %1511 = vmatprep.subr.bf16.mxu0 %v1191_v49  ;;  %1776 = vmatprep.subr.bf16.mxu1 %v1193_v51  ;;  %v1226_v49 = vld [vmem:[#allocation4 + $0x3c0] sm:$0xff]  ;;  %v1228_v51 = vld [vmem:[#allocation4 + $0x3d0] sm:$0xff] }
 0x4b0   :  { %v976_v61 = vsel %vm428_vm1, %v974_v46, %v975_v47 }
 0x4b2   :  { %1512 = vmatpush1.bf16.msra.mxu0 %v1190_v52  ;;  %1777 = vmatpush1.bf16.msra.mxu1 %v1192_v53  ;;  %v1231_v52 = vld [vmem:[#allocation4 + $0x3e8] sm:$0xff]  ;;  %v1233_v53 = vld [vmem:[#allocation4 + $0x3f8] sm:$0xff] }
 0x4b3   :  { %1513 = vmatprep.subr.bf16.mxu0 %v1195_v43  ;;  %1778 = vmatprep.subr.bf16.mxu1 %v1197_v44  ;;  %v987_v43 = vrot.slane %v6059_v48, 1  ;;  %v988_v44 = vrot.slane %v6002_v40, 1 }
 0x4b6   :  { %1514 = vmatpush1.bf16.msra.mxu0 %v1194_v45  ;;  %1779 = vmatpush1.bf16.msra.mxu1 %v1196_v1  ;;  %v992_v45 = vrot.slane %v6063_v3, 1  ;;  %v981_v1 = vsel %vm428_vm1, %v975_v47, %v980_v2  ;;  %v1246_v47 = vld [vmem:[#allocation4 + $0x460] sm:$0xff]  ;;  %v1248_v2 = vld [vmem:[#allocation4 + $0x470] sm:$0xff] }
 0x4b7   :  { %1515 = vmatprep.subr.bf16.mxu0 %v1199_v58  ;;  %1780 = vmatprep.subr.bf16.mxu1 %v1201_v4  ;;  %v1232_v58 = vld [vmem:[#allocation4 + $0x3f0] sm:$0xff]  ;;  %v6072_v4 = vsel %vm574_vm10, 0.0, %v6010_v25 }
 0x4ba   :  { %1516 = vmatpush1.bf16.msra.mxu0 %v1198_v5  ;;  %1781 = vmatpush1.bf16.msra.mxu1 %v1200_v7  ;;  %v6076_v5 = vsel %vm574_vm10, %v6014_v23, 0.0  ;;  %v1235_v7 = vld [vmem:[#allocation4 + $0x408] sm:$0xff]  ;;  %v1236_v23 = vld [vmem:[#allocation4 + $0x410] sm:$0xff] }
 0x4bb   :  { %1517 = vmatprep.subr.bf16.mxu0 %v1203_v33  ;;  %1782 = vmatprep.subr.bf16.mxu1 %v1205_v0  ;;  %v1237_v33 = vld [vmem:[#allocation4 + $0x418] sm:$0xff]  ;;  %v1088_v0 = vpack.c.bf16 %v981_v1, %v976_v61  ;;  %v990_v25 = vrot.slane %v6076_v5, 1  ;;  %v1256_v61 = vld [vmem:[#allocation4 + $0x4b0] sm:$0xff]  ;;  %v1259_v1 = vld [vmem:[#allocation4 + $0x4c8] sm:$0xff] }
 0x4be   :  { %1518 = vmatpush1.bf16.msra.mxu0 %v1202_v17  ;;  %1783 = vmatpush1.bf16.msra.mxu1 %v1204_v22  ;;  %v989_v17 = vsel %vm428_vm1, %v987_v43, %v988_v44  ;;  %v993_v22 = vsel %vm428_vm1, %v988_v44, %v992_v45  ;;  %v1255_v43 = vld [vmem:[#allocation4 + $0x4a8] sm:$0xff]  ;;  %v1257_v44 = vld [vmem:[#allocation4 + $0x4b8] sm:$0xff]  ;;  %v1254_v45 = vld [vmem:[#allocation4 + $0x4a0] sm:$0xff] }
 0x4bf   :  { %1519 = vmatprep.subr.bf16.mxu0 %v1207_v54  ;;  %1784 = vmatprep.subr.bf16.mxu1 %v1209_v31  ;;  %v984_v54 = vrot.slane %v6072_v4, 1  ;;  %v985_v31 = vrot.slane %v6032_v24, 1 }
 0x4c2   :  { %1520 = vmatpush1.bf16.msra.mxu0 %v1206_v32  ;;  %1785 = vmatpush1.bf16.msra.mxu1 %v1208_v6  ;;  %v1234_v32 = vld [vmem:[#allocation4 + $0x400] sm:$0xff]  ;;  %v1239_v6 = vld [vmem:[#allocation4 + $0x428] sm:$0xff] }
 0x4c3   :  { %1521 = vmatprep.subr.bf16.mxu0 %v1211_v8  ;;  %1786 = vmatprep.subr.bf16.mxu1 %v1213_v21  ;;  %v1241_v8 = vld [vmem:[#allocation4 + $0x438] sm:$0xff]  ;;  %v1099_v21 = vpack.c.bf16 %v993_v22, %v989_v17  ;;  %v1262_v17 = vld [vmem:[#allocation4 + $0x4e0] sm:$0xff]  ;;  %v1264_v22 = vld [vmem:[#allocation4 + $0x4f0] sm:$0xff] }
 0x4c6   :  { %1522 = vmatpush1.bf16.msra.mxu0 %v1210_v10  ;;  %1787 = vmatpush1.bf16.msra.mxu1 %v1212_v14  ;;  %v1005_v10 = vrot.slane %v6006_v42, 2  ;;  %v1006_v14 = vrot.slane %v5968_v28, 2 }
 0x4c7   :  { %1523 = vmatprep.subr.bf16.mxu0 %v1215_v18  ;;  %1788 = vmatprep.subr.bf16.mxu1 %v1217_v26  ;;  %v1010_v18 = vrot.slane %v6018_v63, 2  ;;  %v986_v26 = vsel %vm428_vm1, %v984_v54, %v985_v31  ;;  %v1267_v54 = vld [vmem:[#allocation4 + $0x508] sm:$0xff] }
 0x4ca   :  { %1524 = vmatpush1.bf16.msra.mxu0 %v1214_v9  ;;  %1789 = vmatpush1.bf16.msra.mxu1 %v1216_v19  ;;  %v991_v9 = vsel %vm428_vm1, %v985_v31, %v990_v25  ;;  %v1238_v19 = vld [vmem:[#allocation4 + $0x420] sm:$0xff]  ;;  %v1269_v31 = vld [vmem:[#allocation4 + $0x518] sm:$0xff] }
 0x4cb   :  { %1525 = vmatprep.subr.bf16.mxu0 %v1219_v27  ;;  %1790 = vmatprep.subr.bf16.mxu1 %v1221_v50  ;;  %v1240_v27 = vld [vmem:[#allocation4 + $0x430] sm:$0xff]  ;;  %v1243_v50 = vld [vmem:[#allocation4 + $0x448] sm:$0xff]  ;;  %v1266_v25 = vld [vmem:[#allocation4 + $0x500] sm:$0xff] }
 0x4ce   :  { %1526 = vmatpush1.bf16.msra.mxu0 %v1218_v12  ;;  %1791 = vmatpush1.bf16.msra.mxu1 %v1220_v39  ;;  %v1245_v12 = vld [vmem:[#allocation4 + $0x458] sm:$0xff]  ;;  %v1098_v39 = vpack.c.bf16 %v991_v9, %v986_v26  ;;  %v1276_v26 = vld [vmem:[#allocation4 + $0x550] sm:$0xff]  ;;  %v1279_v9 = vld [vmem:[#allocation4 + $0x568] sm:$0xff] }
 0x4cf   :  { %1527 = vmatprep.subr.bf16.mxu0 %v1223_v29  ;;  %1792 = vmatprep.subr.bf16.mxu1 %v1225_v30  ;;  %v1007_v29 = vsel %vm439_vm2, %v1005_v10, %v1006_v14  ;;  %v1011_v30 = vsel %vm439_vm2, %v1006_v14, %v1010_v18  ;;  %v1275_v10 = vld [vmem:[#allocation4 + $0x548] sm:$0xff]  ;;  %v1277_v14 = vld [vmem:[#allocation4 + $0x558] sm:$0xff]  ;;  %v1274_v18 = vld [vmem:[#allocation4 + $0x540] sm:$0xff] }
 0x4d0   :  { %v1091_v46 = vpack.c.bf16 %v1011_v30, %v1007_v29  ;;  %v1282_v29 = vld [vmem:[#allocation4 + $0x580] sm:$0xff]  ;;  %v1284_v30 = vld [vmem:[#allocation4 + $0x590] sm:$0xff] }
 0x4d2   :  { %1528 = vmatpush1.bf16.msra.mxu0 %v1222_v36  ;;  %1793 = vmatpush1.bf16.msra.mxu1 %v1224_v37  ;;  %v1242_v36 = vld [vmem:[#allocation4 + $0x440] sm:$0xff]  ;;  %v1244_v37 = vld [vmem:[#allocation4 + $0x450] sm:$0xff] }
 0x4d3   :  { %1529 = vmatprep.subr.bf16.mxu0 %v1227_v38  ;;  %1794 = vmatprep.subr.bf16.mxu1 %v1229_v41  ;;  %v1247_v38 = vld [vmem:[#allocation4 + $0x468] sm:$0xff]  ;;  %v1249_v41 = vld [vmem:[#allocation4 + $0x478] sm:$0xff] }
 0x4d6   :  { %1530 = vmatpush1.bf16.msra.mxu0 %v1226_v49  ;;  %1795 = vmatpush1.bf16.msra.mxu1 %v1228_v51  ;;  %v1251_v49 = vld [vmem:[#allocation4 + $0x488] sm:$0xff]  ;;  %v1253_v51 = vld [vmem:[#allocation4 + $0x498] sm:$0xff] }
 0x4d7   :  { %1531 = vmatprep.subr.bf16.mxu0 %v1231_v52  ;;  %1796 = vmatprep.subr.bf16.mxu1 %v1233_v53  ;;  %v1250_v52 = vld [vmem:[#allocation4 + $0x480] sm:$0xff]  ;;  %v1252_v53 = vld [vmem:[#allocation4 + $0x490] sm:$0xff] }
 0x4da   :  { %1532 = vmatpush1.bf16.msra.mxu0 %v1230_v62  ;;  %1797 = vmatpush1.bf16.msra.mxu1 %v1232_v58  ;;  %v1261_v62 = vld [vmem:[#allocation4 + $0x4d8] sm:$0xff]  ;;  %v1258_v58 = vld [vmem:[#allocation4 + $0x4c0] sm:$0xff] }
 0x4db   :  { %1554 = vmatprep.subr.bf16.mxu0 %v1235_v7  ;;  %1819 = vmatprep.subr.bf16.mxu1 %v1237_v33  ;;  %v1260_v7 = vld [vmem:[#allocation4 + $0x4d0] sm:$0xff]  ;;  %v1263_v33 = vld [vmem:[#allocation4 + $0x4e8] sm:$0xff] }
 0x4dd   :  { %1534 = vmatmul.mubr.bf16.vlgmr.msra.gmra.mrb[4].mxu0 %v1088_v0  ;;  %1799 = vmatmul.mubr.bf16.vlgmr.msra.gmra.mrb[8].mxu1 %v1088_v0  ;;  %v1265_v0 = vld [vmem:[#allocation4 + $0x4f8] sm:$0xff] }
 0x4de   :  { %1555 = vmatpush1.bf16.msra.mxu0 %v1234_v32  ;;  %1820 = vmatpush1.bf16.msra.mxu1 %v1236_v23  ;;  %v1268_v32 = vld [vmem:[#allocation4 + $0x510] sm:$0xff]  ;;  %v1271_v23 = vld [vmem:[#allocation4 + $0x528] sm:$0xff] }
 0x4df   :  { %1556 = vmatprep.subr.bf16.mxu0 %v1239_v6  ;;  %1821 = vmatprep.subr.bf16.mxu1 %v1241_v8  ;;  %v1273_v6 = vld [vmem:[#allocation4 + $0x538] sm:$0xff]  ;;  %v1270_v8 = vld [vmem:[#allocation4 + $0x520] sm:$0xff] }
 0x4e0   :  { %1543 = vmatprep.mubr.bf16.mxu0 %v1099_v21  ;;  %1808 = vmatprep.mubr.bf16.mxu1 %v1099_v21  ;;  %v1272_v21 = vld [vmem:[#allocation4 + $0x530] sm:$0xff] }
 0x4e2   :  { %1557 = vmatpush1.bf16.msra.mxu0 %v1238_v19  ;;  %1822 = vmatpush1.bf16.msra.mxu1 %v1240_v27  ;;  %v1281_v19 = vld [vmem:[#allocation4 + $0x578] sm:$0xff]  ;;  %v1278_v27 = vld [vmem:[#allocation4 + $0x560] sm:$0xff] }
 0x4e3   :  { %1558 = vmatprep.subr.bf16.mxu0 %v1243_v50  ;;  %1823 = vmatprep.subr.bf16.mxu1 %v1245_v12  ;;  %v1280_v50 = vld [vmem:[#allocation4 + $0x570] sm:$0xff]  ;;  %v1283_v12 = vld [vmem:[#allocation4 + $0x588] sm:$0xff] }
 0x4e5   :  { %1544 = vmatmul.mubr.bf16.gmra.mrb[8].mxu0 %v1098_v39  ;;  %1809 = vmatmul.mubr.bf16.gmra.mrb[12].mxu1 %v1098_v39  ;;  %v1285_v39 = vld [vmem:[#allocation4 + $0x598] sm:$0xff] }
 0x4e6   :  { %1559 = vmatpush1.bf16.msra.mxu0 %v1242_v36  ;;  %1824 = vmatpush1.bf16.msra.mxu1 %v1244_v37  ;;  %v1287_v36 = vld [vmem:[#allocation4 + $0x5a8] sm:$0xff]  ;;  %v1289_v37 = vld [vmem:[#allocation4 + $0x5b8] sm:$0xff] }
 0x4e7   :  { %1560 = vmatprep.subr.bf16.mxu0 %v1247_v38  ;;  %1825 = vmatprep.subr.bf16.mxu1 %v1249_v41  ;;  %v1286_v38 = vld [vmem:[#allocation4 + $0x5a0] sm:$0xff]  ;;  %v1288_v41 = vld [vmem:[#allocation4 + $0x5b0] sm:$0xff] }
 0x4e8   :  { %1586 = vmatprep.mubr.bf16.mxu0 %v1091_v46  ;;  %1851 = vmatprep.mubr.bf16.mxu1 %v1091_v46  ;;  %v1291_v46 = vld [vmem:[#allocation4 + $0x5c8] sm:$0xff] }
 0x4ea   :  { %1561 = vmatpush1.bf16.msra.mxu0 %v1246_v47  ;;  %1826 = vmatpush1.bf16.msra.mxu1 %v1248_v2  ;;  %v1293_v47 = vld [vmem:[#allocation4 + $0x5d8] sm:$0xff]  ;;  %v1002_v2 = vrot.slane %v6048_v34, 2 }
 0x4eb   :  { %1562 = vmatprep.subr.bf16.mxu0 %v1251_v49  ;;  %1827 = vmatprep.subr.bf16.mxu1 %v1253_v51  ;;  %v1003_v49 = vrot.slane %v5995_v20, 2  ;;  %v1008_v51 = vrot.slane %v6052_v35, 2 }
 0x4ee   :  { %1563 = vmatpush1.bf16.msra.mxu0 %v1250_v52  ;;  %1828 = vmatpush1.bf16.msra.mxu1 %v1252_v53  ;;  %v1290_v52 = vld [vmem:[#allocation4 + $0x5c0] sm:$0xff]  ;;  %v1292_v53 = vld [vmem:[#allocation4 + $0x5d0] sm:$0xff] }
 0x4ef   :  { %1564 = vmatprep.subr.bf16.mxu0 %v1255_v43  ;;  %1829 = vmatprep.subr.bf16.mxu1 %v1257_v44  ;;  %v1295_v43 = vld [vmem:[#allocation4 + $0x5e8] sm:$0xff]  ;;  %v1297_v44 = vld [vmem:[#allocation4 + $0x5f8] sm:$0xff] }
 0x4f2   :  { %1565 = vmatpush1.bf16.msra.mxu0 %v1254_v45  ;;  %1830 = vmatpush1.bf16.msra.mxu1 %v1256_v61  ;;  %v1015_v45 = vrot.slane %v6059_v48, 2  ;;  %v1016_v61 = vrot.slane %v6002_v40, 2 }
 0x4f3   :  { %1566 = vmatprep.subr.bf16.mxu0 %v1259_v1  ;;  %1831 = vmatprep.subr.bf16.mxu1 %v1261_v62  ;;  %v1020_v1 = vrot.slane %v6063_v3, 2  ;;  %v1004_v62 = vsel %vm439_vm2, %v1002_v2, %v1003_v49 }
 0x4f6   :  { %1567 = vmatpush1.bf16.msra.mxu0 %v1258_v58  ;;  %1832 = vmatpush1.bf16.msra.mxu1 %v1260_v7  ;;  %v1009_v58 = vsel %vm439_vm2, %v1003_v49, %v1008_v51  ;;  %v1294_v7 = vld [vmem:[#allocation4 + $0x5e0] sm:$0xff]  ;;  %v1312_v51 = vld [vmem:[#allocation4 + $0x670] sm:$0xff] }
 0x4f7   :  { %1568 = vmatprep.subr.bf16.mxu0 %v1263_v33  ;;  %1833 = vmatprep.subr.bf16.mxu1 %v1265_v0  ;;  %v1296_v33 = vld [vmem:[#allocation4 + $0x5f0] sm:$0xff]  ;;  %v1299_v0 = vld [vmem:[#allocation4 + $0x608] sm:$0xff]  ;;  %v1310_v49 = vld [vmem:[#allocation4 + $0x660] sm:$0xff] }
 0x4fa   :  { %1569 = vmatpush1.bf16.msra.mxu0 %v1262_v17  ;;  %1834 = vmatpush1.bf16.msra.mxu1 %v1264_v22  ;;  %v1301_v17 = vld [vmem:[#allocation4 + $0x618] sm:$0xff]  ;;  %v1090_v22 = vpack.c.bf16 %v1009_v58, %v1004_v62  ;;  %v1320_v62 = vld [vmem:[#allocation4 + $0x6b0] sm:$0xff]  ;;  %v1323_v58 = vld [vmem:[#allocation4 + $0x6c8] sm:$0xff] }
 0x4fb   :  { %1570 = vmatprep.subr.bf16.mxu0 %v1267_v54  ;;  %1835 = vmatprep.subr.bf16.mxu1 %v1269_v31  ;;  %v1017_v54 = vsel %vm439_vm2, %v1015_v45, %v1016_v61  ;;  %v1021_v31 = vsel %vm439_vm2, %v1016_v61, %v1020_v1  ;;  %v1319_v45 = vld [vmem:[#allocation4 + $0x6a8] sm:$0xff]  ;;  %v1321_v61 = vld [vmem:[#allocation4 + $0x6b8] sm:$0xff]  ;;  %v1318_v1 = vld [vmem:[#allocation4 + $0x6a0] sm:$0xff] }
 0x4fe   :  { %1571 = vmatpush1.bf16.msra.mxu0 %v1266_v25  ;;  %1836 = vmatpush1.bf16.msra.mxu1 %v1268_v32  ;;  %v1012_v25 = vrot.slane %v6072_v4, 2  ;;  %v1013_v32 = vrot.slane %v6032_v24, 2 }
 0x4ff   :  { %1572 = vmatprep.subr.bf16.mxu0 %v1271_v23  ;;  %1837 = vmatprep.subr.bf16.mxu1 %v1273_v6  ;;  %v1018_v23 = vrot.slane %v6076_v5, 2  ;;  %v1298_v6 = vld [vmem:[#allocation4 + $0x600] sm:$0xff] }
 0x502   :  { %1573 = vmatpush1.bf16.msra.mxu0 %v1270_v8  ;;  %1838 = vmatpush1.bf16.msra.mxu1 %v1272_v21  ;;  %v1300_v8 = vld [vmem:[#allocation4 + $0x610] sm:$0xff]  ;;  %v1303_v21 = vld [vmem:[#allocation4 + $0x628] sm:$0xff] }
 0x503   :  { %1574 = vmatprep.subr.bf16.mxu0 %v1275_v10  ;;  %1839 = vmatprep.subr.bf16.mxu1 %v1277_v14  ;;  %v1305_v10 = vld [vmem:[#allocation4 + $0x638] sm:$0xff]  ;;  %v1101_v14 = vpack.c.bf16 %v1021_v31, %v1017_v54  ;;  %v1326_v54 = vld [vmem:[#allocation4 + $0x6e0] sm:$0xff]  ;;  %v1328_v31 = vld [vmem:[#allocation4 + $0x6f0] sm:$0xff] }
 0x506   :  { %1575 = vmatpush1.bf16.msra.mxu0 %v1274_v18  ;;  %1840 = vmatpush1.bf16.msra.mxu1 %v1276_v26  ;;  %v1033_v18 = vrot.slane %v6006_v42, 3  ;;  %v1034_v26 = vrot.slane %v5968_v28, 3 }
 0x507   :  { %1576 = vmatprep.subr.bf16.mxu0 %v1279_v9  ;;  %1841 = vmatprep.subr.bf16.mxu1 %v1281_v19  ;;  %v1038_v9 = vrot.slane %v6018_v63, 3  ;;  %v1014_v19 = vsel %vm439_vm2, %v1012_v25, %v1013_v32  ;;  %v1331_v25 = vld [vmem:[#allocation4 + $0x708] sm:$0xff] }
 0x50a   :  { %1577 = vmatpush1.bf16.msra.mxu0 %v1278_v27  ;;  %1842 = vmatpush1.bf16.msra.mxu1 %v1280_v50  ;;  %v1019_v27 = vsel %vm439_vm2, %v1013_v32, %v1018_v23  ;;  %v1302_v50 = vld [vmem:[#allocation4 + $0x620] sm:$0xff]  ;;  %v1333_v32 = vld [vmem:[#allocation4 + $0x718] sm:$0xff] }
 0x50b   :  { %1578 = vmatprep.subr.bf16.mxu0 %v1283_v12  ;;  %1843 = vmatprep.subr.bf16.mxu1 %v1285_v39  ;;  %v1304_v12 = vld [vmem:[#allocation4 + $0x630] sm:$0xff]  ;;  %v1307_v39 = vld [vmem:[#allocation4 + $0x648] sm:$0xff]  ;;  %v1330_v23 = vld [vmem:[#allocation4 + $0x700] sm:$0xff] }
 0x50e   :  { %1579 = vmatpush1.bf16.msra.mxu0 %v1282_v29  ;;  %1844 = vmatpush1.bf16.msra.mxu1 %v1284_v30  ;;  %v1309_v29 = vld [vmem:[#allocation4 + $0x658] sm:$0xff]  ;;  %v1100_v30 = vpack.c.bf16 %v1019_v27, %v1014_v19  ;;  %v1340_v19 = vld [vmem:[#allocation4 + $0x750] sm:$0xff]  ;;  %v1343_v27 = vld [vmem:[#allocation4 + $0x768] sm:$0xff] }
 0x50f   :  { %1580 = vmatprep.subr.bf16.mxu0 %v1287_v36  ;;  %1845 = vmatprep.subr.bf16.mxu1 %v1289_v37  ;;  %v1035_v36 = vsel %vm623_vm11, %v1033_v18, %v1034_v26  ;;  %v1039_v37 = vsel %vm623_vm11, %v1034_v26, %v1038_v9  ;;  %v1339_v18 = vld [vmem:[#allocation4 + $0x748] sm:$0xff]  ;;  %v1341_v26 = vld [vmem:[#allocation4 + $0x758] sm:$0xff]  ;;  %v1338_v9 = vld [vmem:[#allocation4 + $0x740] sm:$0xff] }
 0x510   :  { %v1093_v2 = vpack.c.bf16 %v1039_v37, %v1035_v36  ;;  %v1346_v36 = vld [vmem:[#allocation4 + $0x780] sm:$0xff]  ;;  %v1348_v37 = vld [vmem:[#allocation4 + $0x790] sm:$0xff] }
 0x512   :  { %1581 = vmatpush1.bf16.msra.mxu0 %v1286_v38  ;;  %1846 = vmatpush1.bf16.msra.mxu1 %v1288_v41  ;;  %v1306_v38 = vld [vmem:[#allocation4 + $0x640] sm:$0xff]  ;;  %v1308_v41 = vld [vmem:[#allocation4 + $0x650] sm:$0xff] }
 0x513   :  { %1582 = vmatprep.subr.bf16.mxu0 %v1291_v46  ;;  %1847 = vmatprep.subr.bf16.mxu1 %v1293_v47  ;;  %v1311_v46 = vld [vmem:[#allocation4 + $0x668] sm:$0xff]  ;;  %v1313_v47 = vld [vmem:[#allocation4 + $0x678] sm:$0xff] }
 0x516   :  { %1583 = vmatpush1.bf16.msra.mxu0 %v1290_v52  ;;  %1848 = vmatpush1.bf16.msra.mxu1 %v1292_v53  ;;  %v1315_v52 = vld [vmem:[#allocation4 + $0x688] sm:$0xff]  ;;  %v1317_v53 = vld [vmem:[#allocation4 + $0x698] sm:$0xff] }
 0x517   :  { %1584 = vmatprep.subr.bf16.mxu0 %v1295_v43  ;;  %1849 = vmatprep.subr.bf16.mxu1 %v1297_v44  ;;  %v1314_v43 = vld [vmem:[#allocation4 + $0x680] sm:$0xff]  ;;  %v1316_v44 = vld [vmem:[#allocation4 + $0x690] sm:$0xff] }
 0x51a   :  { %1585 = vmatpush1.bf16.msra.mxu0 %v1294_v7  ;;  %1850 = vmatpush1.bf16.msra.mxu1 %v1296_v33  ;;  %v1325_v7 = vld [vmem:[#allocation4 + $0x6d8] sm:$0xff]  ;;  %v1322_v33 = vld [vmem:[#allocation4 + $0x6c0] sm:$0xff] }
 0x51b   :  { %1607 = vmatprep.subr.bf16.mxu0 %v1299_v0  ;;  %1872 = vmatprep.subr.bf16.mxu1 %v1301_v17  ;;  %v1324_v0 = vld [vmem:[#allocation4 + $0x6d0] sm:$0xff]  ;;  %v1327_v17 = vld [vmem:[#allocation4 + $0x6e8] sm:$0xff] }
 0x51d   :  { %1587 = vmatmul.mubr.bf16.vlgmr.msra.gmra.mrb[4].mxu0 %v1090_v22  ;;  %1852 = vmatmul.mubr.bf16.vlgmr.msra.gmra.mrb[8].mxu1 %v1090_v22  ;;  %v1329_v22 = vld [vmem:[#allocation4 + $0x6f8] sm:$0xff] }
 0x51e   :  { %1608 = vmatpush1.bf16.msra.mxu0 %v1298_v6  ;;  %1873 = vmatpush1.bf16.msra.mxu1 %v1300_v8  ;;  %v1332_v6 = vld [vmem:[#allocation4 + $0x710] sm:$0xff]  ;;  %v1335_v8 = vld [vmem:[#allocation4 + $0x728] sm:$0xff] }
 0x51f   :  { %1609 = vmatprep.subr.bf16.mxu0 %v1303_v21  ;;  %1874 = vmatprep.subr.bf16.mxu1 %v1305_v10  ;;  %v1337_v21 = vld [vmem:[#allocation4 + $0x738] sm:$0xff]  ;;  %v1334_v10 = vld [vmem:[#allocation4 + $0x720] sm:$0xff] }
 0x520   :  { %1596 = vmatprep.mubr.bf16.mxu0 %v1101_v14  ;;  %1861 = vmatprep.mubr.bf16.mxu1 %v1101_v14  ;;  %v1336_v14 = vld [vmem:[#allocation4 + $0x730] sm:$0xff] }
 0x522   :  { %1610 = vmatpush1.bf16.msra.mxu0 %v1302_v50  ;;  %1875 = vmatpush1.bf16.msra.mxu1 %v1304_v12  ;;  %v1345_v50 = vld [vmem:[#allocation4 + $0x778] sm:$0xff]  ;;  %v1342_v12 = vld [vmem:[#allocation4 + $0x760] sm:$0xff] }
 0x523   :  { %1611 = vmatprep.subr.bf16.mxu0 %v1307_v39  ;;  %1876 = vmatprep.subr.bf16.mxu1 %v1309_v29  ;;  %v1344_v39 = vld [vmem:[#allocation4 + $0x770] sm:$0xff]  ;;  %v1347_v29 = vld [vmem:[#allocation4 + $0x788] sm:$0xff] }
 0x525   :  { %1597 = vmatmul.mubr.bf16.gmra.mrb[8].mxu0 %v1100_v30  ;;  %1862 = vmatmul.mubr.bf16.gmra.mrb[12].mxu1 %v1100_v30  ;;  %v1349_v30 = vld [vmem:[#allocation4 + $0x798] sm:$0xff] }
 0x526   :  { %1612 = vmatpush1.bf16.msra.mxu0 %v1306_v38  ;;  %1877 = vmatpush1.bf16.msra.mxu1 %v1308_v41  ;;  %v1351_v38 = vld [vmem:[#allocation4 + $0x7a8] sm:$0xff]  ;;  %v1353_v41 = vld [vmem:[#allocation4 + $0x7b8] sm:$0xff] }
 0x527   :  { %1613 = vmatprep.subr.bf16.mxu0 %v1311_v46  ;;  %1878 = vmatprep.subr.bf16.mxu1 %v1313_v47  ;;  %v1350_v46 = vld [vmem:[#allocation4 + $0x7a0] sm:$0xff]  ;;  %v1352_v47 = vld [vmem:[#allocation4 + $0x7b0] sm:$0xff] }
 0x528   :  { %1639 = vmatprep.mubr.bf16.mxu0 %v1093_v2  ;;  %1904 = vmatprep.mubr.bf16.mxu1 %v1093_v2  ;;  %v1355_v2 = vld [vmem:[#allocation4 + $0x7c8] sm:$0xff] }
 0x52a   :  { %1614 = vmatpush1.bf16.msra.mxu0 %v1310_v49  ;;  %1879 = vmatpush1.bf16.msra.mxu1 %v1312_v51  ;;  %v1357_v49 = vld [vmem:[#allocation4 + $0x7d8] sm:$0xff]  ;;  %v1030_v51 = vrot.slane %v6048_v34, 3 }
 0x52b   :  { %1615 = vmatprep.subr.bf16.mxu0 %v1315_v52  ;;  %1880 = vmatprep.subr.bf16.mxu1 %v1317_v53  ;;  %v1031_v52 = vrot.slane %v5995_v20, 3  ;;  %v1036_v53 = vrot.slane %v6052_v35, 3 }
 0x52e   :  { %1616 = vmatpush1.bf16.msra.mxu0 %v1314_v43  ;;  %1881 = vmatpush1.bf16.msra.mxu1 %v1316_v44  ;;  %v1354_v43 = vld [vmem:[#allocation4 + $0x7c0] sm:$0xff]  ;;  %v1356_v44 = vld [vmem:[#allocation4 + $0x7d0] sm:$0xff] }
 0x52f   :  { %1617 = vmatprep.subr.bf16.mxu0 %v1319_v45  ;;  %1882 = vmatprep.subr.bf16.mxu1 %v1321_v61  ;;  %v1359_v45 = vld [vmem:[#allocation4 + $0x7e8] sm:$0xff]  ;;  %v1361_v61 = vld [vmem:[#allocation4 + $0x7f8] sm:$0xff] }
 0x532   :  { %1618 = vmatpush1.bf16.msra.mxu0 %v1318_v1  ;;  %1883 = vmatpush1.bf16.msra.mxu1 %v1320_v62  ;;  %v1043_v1 = vrot.slane %v6059_v48, 3  ;;  %v1044_v62 = vrot.slane %v6002_v40, 3 }
 0x533   :  { %1619 = vmatprep.subr.bf16.mxu0 %v1323_v58  ;;  %1884 = vmatprep.subr.bf16.mxu1 %v1325_v7  ;;  %v1048_v58 = vrot.slane %v6063_v3, 3  ;;  %v1032_v7 = vsel %vm623_vm11, %v1030_v51, %v1031_v52  ;;  %v1379_v51 = vld [vmem:[#allocation4 + $0x888] sm:$0xff] }
 0x536   :  { %1620 = vmatpush1.bf16.msra.mxu0 %v1322_v33  ;;  %1885 = vmatpush1.bf16.msra.mxu1 %v1324_v0  ;;  %v1037_v33 = vsel %vm623_vm11, %v1031_v52, %v1036_v53  ;;  %v1358_v0 = vld [vmem:[#allocation4 + $0x7e0] sm:$0xff]  ;;  %v1381_v52 = vld [vmem:[#allocation4 + $0x898] sm:$0xff] }
 0x537   :  { %1621 = vmatprep.subr.bf16.mxu0 %v1327_v17  ;;  %1886 = vmatprep.subr.bf16.mxu1 %v1329_v22  ;;  %v1360_v17 = vld [vmem:[#allocation4 + $0x7f0] sm:$0xff]  ;;  %v1363_v22 = vld [vmem:[#allocation4 + $0x808] sm:$0xff]  ;;  %v1378_v53 = vld [vmem:[#allocation4 + $0x880] sm:$0xff] }
 0x53a   :  { %1622 = vmatpush1.bf16.msra.mxu0 %v1326_v54  ;;  %1887 = vmatpush1.bf16.msra.mxu1 %v1328_v31  ;;  %v1365_v54 = vld [vmem:[#allocation4 + $0x818] sm:$0xff]  ;;  %v1092_v31 = vpack.c.bf16 %v1037_v33, %v1032_v7  ;;  %v1386_v7 = vld [vmem:[#allocation4 + $0x8c0] sm:$0xff]  ;;  %v1388_v33 = vld [vmem:[#allocation4 + $0x8d0] sm:$0xff] }
 0x53b   :  { %1623 = vmatprep.subr.bf16.mxu0 %v1331_v25  ;;  %1888 = vmatprep.subr.bf16.mxu1 %v1333_v32  ;;  %v1045_v25 = vsel %vm623_vm11, %v1043_v1, %v1044_v62  ;;  %v1049_v32 = vsel %vm623_vm11, %v1044_v62, %v1048_v58  ;;  %v1384_v1 = vld [vmem:[#allocation4 + $0x8b0] sm:$0xff]  ;;  %v1387_v62 = vld [vmem:[#allocation4 + $0x8c8] sm:$0xff]  ;;  %v1389_v58 = vld [vmem:[#allocation4 + $0x8d8] sm:$0xff] }
 0x53e   :  { %1624 = vmatpush1.bf16.msra.mxu0 %v1330_v23  ;;  %1889 = vmatpush1.bf16.msra.mxu1 %v1332_v6  ;;  %v1040_v23 = vrot.slane %v6072_v4, 3  ;;  %v1041_v6 = vrot.slane %v6032_v24, 3 }
 0x53f   :  { %1625 = vmatprep.subr.bf16.mxu0 %v1335_v8  ;;  %1890 = vmatprep.subr.bf16.mxu1 %v1337_v21  ;;  %v1046_v8 = vrot.slane %v6076_v5, 3  ;;  %v1362_v21 = vld [vmem:[#allocation4 + $0x800] sm:$0xff] }
 0x542   :  { %1626 = vmatpush1.bf16.msra.mxu0 %v1334_v10  ;;  %1891 = vmatpush1.bf16.msra.mxu1 %v1336_v14  ;;  %v1364_v10 = vld [vmem:[#allocation4 + $0x810] sm:$0xff]  ;;  %v1367_v14 = vld [vmem:[#allocation4 + $0x828] sm:$0xff] }
 0x543   :  { %1627 = vmatprep.subr.bf16.mxu0 %v1339_v18  ;;  %1892 = vmatprep.subr.bf16.mxu1 %v1341_v26  ;;  %v1369_v18 = vld [vmem:[#allocation4 + $0x838] sm:$0xff]  ;;  %v1103_v26 = vpack.c.bf16 %v1049_v32, %v1045_v25  ;;  %v1394_v32 = vld [vmem:[#allocation4 + $0x900] sm:$0xff] }
 0x544   :  { %v1397_v25 = vld [vmem:[#allocation4 + $0x918] sm:$0xff] }
 0x546   :  { %1628 = vmatpush1.bf16.msra.mxu0 %v1338_v9  ;;  %1893 = vmatpush1.bf16.msra.mxu1 %v1340_v19  ;;  %v1061_v9 = vrot.slane %v6006_v42, 4  ;;  %v1062_v19 = vrot.slane %v5968_v28, 4 }
 0x547   :  { %1629 = vmatprep.subr.bf16.mxu0 %v1343_v27  ;;  %1894 = vmatprep.subr.bf16.mxu1 %v1345_v50  ;;  %v1066_v27 = vrot.slane %v6018_v63, 4  ;;  %v1042_v50 = vsel %vm623_vm11, %v1040_v23, %v1041_v6  ;;  %v1370_v63 = vld [vmem:[#allocation4 + $0x840] sm:$0xff]  ;;  %v1396_v23 = vld [vmem:[#allocation4 + $0x910] sm:$0xff] }
 0x548   :  { %v1063_v42 = vsel %vm638_vm12, %v1061_v9, %v1062_v19  ;;  %v1404_v9 = vld [vmem:[#allocation4 + $0x950] sm:$0xff] }
 0x549   :  { %v1067_v28 = vsel %vm638_vm12, %v1062_v19, %v1066_v27  ;;  %v1407_v19 = vld [vmem:[#allocation4 + $0x968] sm:$0xff]  ;;  %v1409_v27 = vld [vmem:[#allocation4 + $0x978] sm:$0xff] }
 0x54a   :  { %1630 = vmatpush1.bf16.msra.mxu0 %v1342_v12  ;;  %1895 = vmatpush1.bf16.msra.mxu1 %v1344_v39  ;;  %v1047_v12 = vsel %vm623_vm11, %v1041_v6, %v1046_v8  ;;  %v1366_v39 = vld [vmem:[#allocation4 + $0x820] sm:$0xff]  ;;  %v1399_v6 = vld [vmem:[#allocation4 + $0x928] sm:$0xff]  ;;  %v1401_v8 = vld [vmem:[#allocation4 + $0x938] sm:$0xff] }
 0x54b   :  { %1631 = vmatprep.subr.bf16.mxu0 %v1347_v29  ;;  %1896 = vmatprep.subr.bf16.mxu1 %v1349_v30  ;;  %v1368_v29 = vld [vmem:[#allocation4 + $0x830] sm:$0xff]  ;;  %v1371_v30 = vld [vmem:[#allocation4 + $0x848] sm:$0xff] }
 0x54e   :  { %1632 = vmatpush1.bf16.msra.mxu0 %v1346_v36  ;;  %1897 = vmatpush1.bf16.msra.mxu1 %v1348_v37  ;;  %v1373_v36 = vld [vmem:[#allocation4 + $0x858] sm:$0xff]  ;;  %v1102_v37 = vpack.c.bf16 %v1047_v12, %v1042_v50  ;;  %v1406_v50 = vld [vmem:[#allocation4 + $0x960] sm:$0xff]  ;;  %v1408_v12 = vld [vmem:[#allocation4 + $0x970] sm:$0xff] }
 0x54f   :  { %1633 = vmatprep.subr.bf16.mxu0 %v1351_v38  ;;  %1898 = vmatprep.subr.bf16.mxu1 %v1353_v41  ;;  %v1372_v38 = vld [vmem:[#allocation4 + $0x850] sm:$0xff]  ;;  %v1375_v41 = vld [vmem:[#allocation4 + $0x868] sm:$0xff] }
 0x552   :  { %1634 = vmatpush1.bf16.msra.mxu0 %v1350_v46  ;;  %1899 = vmatpush1.bf16.msra.mxu1 %v1352_v47  ;;  %v1377_v46 = vld [vmem:[#allocation4 + $0x878] sm:$0xff]  ;;  %v1095_v47 = vpack.c.bf16 %v1067_v28, %v1063_v42  ;;  %v1414_v28 = vld [vmem:[#allocation4 + $0x9a0] sm:$0xff] }
 0x553   :  { %1635 = vmatprep.subr.bf16.mxu0 %v1355_v2  ;;  %1900 = vmatprep.subr.bf16.mxu1 %v1357_v49  ;;  %v1374_v2 = vld [vmem:[#allocation4 + $0x860] sm:$0xff]  ;;  %v1376_v49 = vld [vmem:[#allocation4 + $0x870] sm:$0xff]  ;;  %v1417_v42 = vld [vmem:[#allocation4 + $0x9b8] sm:$0xff] }
 0x556   :  { %1636 = vmatpush1.bf16.msra.mxu0 %v1354_v43  ;;  %1901 = vmatpush1.bf16.msra.mxu1 %v1356_v44  ;;  %v1380_v43 = vld [vmem:[#allocation4 + $0x890] sm:$0xff]  ;;  %v1383_v44 = vld [vmem:[#allocation4 + $0x8a8] sm:$0xff] }
 0x557   :  { %1637 = vmatprep.subr.bf16.mxu0 %v1359_v45  ;;  %1902 = vmatprep.subr.bf16.mxu1 %v1361_v61  ;;  %v1385_v45 = vld [vmem:[#allocation4 + $0x8b8] sm:$0xff]  ;;  %v1382_v61 = vld [vmem:[#allocation4 + $0x8a0] sm:$0xff] }
 0x55a   :  { %1638 = vmatpush1.bf16.msra.mxu0 %v1358_v0  ;;  %1903 = vmatpush1.bf16.msra.mxu1 %v1360_v17  ;;  %v1391_v0 = vld [vmem:[#allocation4 + $0x8e8] sm:$0xff]  ;;  %v1393_v17 = vld [vmem:[#allocation4 + $0x8f8] sm:$0xff] }
 0x55b   :  { %1660 = vmatprep.subr.bf16.mxu0 %v1363_v22  ;;  %1925 = vmatprep.subr.bf16.mxu1 %v1365_v54  ;;  %v1390_v22 = vld [vmem:[#allocation4 + $0x8e0] sm:$0xff]  ;;  %v1392_v54 = vld [vmem:[#allocation4 + $0x8f0] sm:$0xff] }
 0x55d   :  { %1640 = vmatmul.mubr.bf16.vlgmr.msra.gmra.mrb[4].mxu0 %v1092_v31  ;;  %1905 = vmatmul.mubr.bf16.vlgmr.msra.gmra.mrb[8].mxu1 %v1092_v31  ;;  %v1395_v31 = vld [vmem:[#allocation4 + $0x908] sm:$0xff] }
 0x55e   :  { %1661 = vmatpush1.bf16.msra.mxu0 %v1362_v21  ;;  %1926 = vmatpush1.bf16.msra.mxu1 %v1364_v10  ;;  %v1398_v21 = vld [vmem:[#allocation4 + $0x920] sm:$0xff]  ;;  %v1400_v10 = vld [vmem:[#allocation4 + $0x930] sm:$0xff] }
 0x55f   :  { %1662 = vmatprep.subr.bf16.mxu0 %v1367_v14  ;;  %1927 = vmatprep.subr.bf16.mxu1 %v1369_v18  ;;  %v1403_v14 = vld [vmem:[#allocation4 + $0x948] sm:$0xff]  ;;  %v1405_v18 = vld [vmem:[#allocation4 + $0x958] sm:$0xff] }
 0x560   :  { %1649 = vmatprep.mubr.bf16.mxu0 %v1103_v26  ;;  %1914 = vmatprep.mubr.bf16.mxu1 %v1103_v26  ;;  %v1402_v26 = vld [vmem:[#allocation4 + $0x940] sm:$0xff] }
 0x562   :  { %1663 = vmatpush1.bf16.msra.mxu0 %v1366_v39  ;;  %1928 = vmatpush1.bf16.msra.mxu1 %v1368_v29  ;;  %v1411_v39 = vld [vmem:[#allocation4 + $0x988] sm:$0xff]  ;;  %v1413_v29 = vld [vmem:[#allocation4 + $0x998] sm:$0xff] }
 0x563   :  { %1664 = vmatprep.subr.bf16.mxu0 %v1371_v30  ;;  %1929 = vmatprep.subr.bf16.mxu1 %v1373_v36  ;;  %v1410_v30 = vld [vmem:[#allocation4 + $0x980] sm:$0xff]  ;;  %v1412_v36 = vld [vmem:[#allocation4 + $0x990] sm:$0xff] }
 0x565   :  { %1650 = vmatmul.mubr.bf16.gmra.mrb[8].mxu0 %v1102_v37  ;;  %1915 = vmatmul.mubr.bf16.gmra.mrb[12].mxu1 %v1102_v37  ;;  %v1415_v37 = vld [vmem:[#allocation4 + $0x9a8] sm:$0xff] }
 0x566   :  { %1665 = vmatpush1.bf16.msra.mxu0 %v1370_v63  ;;  %1930 = vmatpush1.bf16.msra.mxu1 %v1372_v38  ;;  %v1416_v63 = vld [vmem:[#allocation4 + $0x9b0] sm:$0xff]  ;;  %v1419_v38 = vld [vmem:[#allocation4 + $0x9c8] sm:$0xff] }
 0x567   :  { %1666 = vmatprep.subr.bf16.mxu0 %v1375_v41  ;;  %1931 = vmatprep.subr.bf16.mxu1 %v1377_v46  ;;  %v1421_v41 = vld [vmem:[#allocation4 + $0x9d8] sm:$0xff]  ;;  %v1058_v46 = vrot.slane %v6048_v34, 4 }
 0x568   :  { %1692 = vmatprep.mubr.bf16.mxu0 %v1095_v47  ;;  %1957 = vmatprep.mubr.bf16.mxu1 %v1095_v47  ;;  %v1059_v47 = vrot.slane %v5995_v20, 4 }
 0x56a   :  { %1667 = vmatpush1.bf16.msra.mxu0 %v1374_v2  ;;  %1932 = vmatpush1.bf16.msra.mxu1 %v1376_v49  ;;  %v1064_v2 = vrot.slane %v6052_v35, 4  ;;  %v1418_v49 = vld [vmem:[#allocation4 + $0x9c0] sm:$0xff]  ;;  %v1060_v34 = vsel %vm638_vm12, %v1058_v46, %v1059_v47 }
 0x56b   :  { %1668 = vmatprep.subr.bf16.mxu0 %v1379_v51  ;;  %1933 = vmatprep.subr.bf16.mxu1 %v1381_v52  ;;  %v1420_v51 = vld [vmem:[#allocation4 + $0x9d0] sm:$0xff]  ;;  %v1071_v52 = vrot.slane %v6059_v48, 4  ;;  %v1422_v35 = vld [vmem:[#allocation4 + $0x9e0] sm:$0xff] }
 0x56c   :  { %v1065_v20 = vsel %vm638_vm12, %v1059_v47, %v1064_v2 }
 0x56e   :  { %1669 = vmatpush1.bf16.msra.mxu0 %v1378_v53  ;;  %1934 = vmatpush1.bf16.msra.mxu1 %v1380_v43  ;;  %v1072_v53 = vrot.slane %v6002_v40, 4  ;;  %v1076_v43 = vrot.slane %v6063_v3, 4  ;;  %v1068_v3 = vrot.slane %v6072_v4, 4  ;;  %v1442_v4 = vsub.s32 3, %v5933_v59 }
 0x56f   :  { %1670 = vmatprep.subr.bf16.mxu0 %v1383_v44  ;;  %1935 = vmatprep.subr.bf16.mxu1 %v1385_v45  ;;  %v1423_v44 = vld [vmem:[#allocation4 + $0x9e8] sm:$0xff]  ;;  %v1425_v45 = vld [vmem:[#allocation4 + $0x9f8] sm:$0xff] }
 0x570   :  { %v1077_v48 = vsel %vm638_vm12, %v1072_v53, %v1076_v43 }
 0x572   :  { %1671 = vmatpush1.bf16.msra.mxu0 %v1382_v61  ;;  %1936 = vmatpush1.bf16.msra.mxu1 %v1384_v1  ;;  %v1424_v61 = vld [vmem:[#allocation4 + $0x9f0] sm:$0xff]  ;;  %v1073_v1 = vsel %vm638_vm12, %v1071_v52, %v1072_v53 }
 0x573   :  { %1672 = vmatprep.subr.bf16.mxu0 %v1387_v62  ;;  %1937 = vmatprep.subr.bf16.mxu1 %v1389_v58  ;;  %v1094_v62 = vpack.c.bf16 %v1065_v20, %v1060_v34  ;;  %v1105_v40 = vpack.c.bf16 %v1077_v48, %v1073_v1  ;;  %v1069_v58 = vrot.slane %v6032_v24, 4 }
 0x576   :  { %1673 = vmatpush1.bf16.msra.mxu0 %v1386_v7  ;;  %1938 = vmatpush1.bf16.msra.mxu1 %v1388_v33  ;;  %v1074_v7 = vrot.slane %v6076_v5, 4  ;;  %v1070_v33 = vsel %vm638_vm12, %v1068_v3, %v1069_v58 }
 0x577   :  { %1674 = vmatprep.subr.bf16.mxu0 %v1391_v0  ;;  %1939 = vmatprep.subr.bf16.mxu1 %v1393_v17 }
 0x578   :  { %v1075_v0 = vsel %vm638_vm12, %v1069_v58, %v1074_v7 }
 0x579   :  { %v1104_v17 = vpack.c.bf16 %v1075_v0, %v1070_v33 }
 0x57a   :  { %1675 = vmatpush1.bf16.msra.mxu0 %v1390_v22  ;;  %1940 = vmatpush1.bf16.msra.mxu1 %v1392_v54  ;;  %v1438_v22 = vsub.s32 2, %v5933_v59  ;;  %v1426_v54 = vld [vmem:[#allocation20] sm:$0xf] }
 0x57b   :  { %1676 = vmatprep.subr.bf16.mxu0 %v1395_v31  ;;  %1941 = vmatprep.subr.bf16.mxu1 %v1397_v25  ;;  %v1431_v24 = vrot.slane %v1426_v54, %v5936_v60  ;;  %v1435_v31 = vrot.slane %v1426_v54, %v5939_v56  ;;  %v1443_v25 = vrot.slane %v1426_v54, %v1442_v4 }
 0x57c   :  { %v1439_v5 = vrot.slane %v1426_v54, %v1438_v22 }
 0x57e   :  { %1677 = vmatpush1.bf16.msra.mxu0 %v1394_v32  ;;  %1942 = vmatpush1.bf16.msra.mxu1 %v1396_v23 }
 0x57f   :  { %1678 = vmatprep.subr.bf16.mxu0 %v1399_v6  ;;  %1943 = vmatprep.subr.bf16.mxu1 %v1401_v8 }
 0x582   :  { %1679 = vmatpush1.bf16.msra.mxu0 %v1398_v21  ;;  %1944 = vmatpush1.bf16.msra.mxu1 %v1400_v10 }
 0x583   :  { %1680 = vmatprep.subr.bf16.mxu0 %v1403_v14  ;;  %1945 = vmatprep.subr.bf16.mxu1 %v1405_v18 }
 0x586   :  { %1681 = vmatpush1.bf16.msra.mxu0 %v1402_v26  ;;  %1946 = vmatpush1.bf16.msra.mxu1 %v1404_v9 }
 0x587   :  { %1682 = vmatprep.subr.bf16.mxu0 %v1407_v19  ;;  %1947 = vmatprep.subr.bf16.mxu1 %v1409_v27 }
 0x58a   :  { %1683 = vmatpush1.bf16.msra.mxu0 %v1406_v50  ;;  %1948 = vmatpush1.bf16.msra.mxu1 %v1408_v12 }
 0x58b   :  { %1684 = vmatprep.subr.bf16.mxu0 %v1411_v39  ;;  %1949 = vmatprep.subr.bf16.mxu1 %v1413_v29 }
 0x58e   :  { %1685 = vmatpush1.bf16.msra.mxu0 %v1410_v30  ;;  %1950 = vmatpush1.bf16.msra.mxu1 %v1412_v36 }
 0x58f   :  { %1686 = vmatprep.subr.bf16.mxu0 %v1415_v37  ;;  %1951 = vmatprep.subr.bf16.mxu1 %v1417_v42 }
 0x592   :  { %1687 = vmatpush1.bf16.msra.mxu0 %v1414_v28  ;;  %1952 = vmatpush1.bf16.msra.mxu1 %v1416_v63 }
 0x593   :  { %1688 = vmatprep.subr.bf16.mxu0 %v1419_v38  ;;  %1953 = vmatprep.subr.bf16.mxu1 %v1421_v41 }
 0x596   :  { %1689 = vmatpush1.bf16.msra.mxu0 %v1418_v49  ;;  %1954 = vmatpush1.bf16.msra.mxu1 %v1420_v51 }
 0x597   :  { %1690 = vmatprep.subr.bf16.mxu0 %v1423_v44  ;;  %1955 = vmatprep.subr.bf16.mxu1 %v1425_v45 }
 0x59a   :  { %1691 = vmatpush1.bf16.msra.mxu0 %v1422_v35  ;;  %1956 = vmatpush1.bf16.msra.mxu1 %v1424_v61 }
 0x59d   :  { %1693 = vmatmul.mubr.bf16.vlgmr.msra.gmra.mrb[4].mxu0 %v1094_v62  ;;  %1958 = vmatmul.mubr.bf16.vlgmr.msra.gmra.mrb[8].mxu1 %v1094_v62 }
 0x59e   :  { %1702 = vmatprep.mubr.bf16.mxu0 %v1105_v40  ;;  %1967 = vmatprep.mubr.bf16.mxu1 %v1105_v40 }
 0x5a5   :  { %1703 = vmatmul.mubr.bf16.gmra.mrb[8].mxu0 %v1104_v17  ;;  %1968 = vmatmul.mubr.bf16.gmra.mrb[12].mxu1 %v1104_v17 }
 0x670   :  { %v1694_v32 = vpop.f32.mrb[4].mxu0  ;;  %v1959_v23 = vpop.f32.mrb[8].mxu1 }
 0x671   :  { %v6153_v6 = vadd.f32 %v1694_v32, %v1431_v24  ;;  %v6155_v8 = vadd.f32 %v1959_v23, %v1439_v5  ;;  %v1696_v21 = vpop.f32.mrb[5].mxu0  ;;  %v1961_v10 = vpop.f32.mrb[9].mxu1 }
 0x672   :  { %v4615_v14 = vadd.f32 %v1696_v21, %v1435_v31  ;;  %v6157_v18 = vadd.f32 %v1961_v10, %v1443_v25  ;;  %v1698_v26 = vpop.f32.mrb[6].mxu0  ;;  %v1963_v9 = vpop.f32.mrb[10].mxu1 }
 0x673   :  { %v1978_v19 = vmax.f32 %v6153_v6, 0.0  ;;  %v1980_v27 = vmax.f32 %v6155_v8, 0.0  ;;  %v6161_v50 = vadd.f32 %v1698_v26, %v1431_v24  ;;  %v6163_v12 = vadd.f32 %v1963_v9, %v1439_v5  ;;  %v1700_v39 = vpop.f32.mrb[7].mxu0  ;;  %v1965_v29 = vpop.f32.mrb[11].mxu1 }
 0x674   :  { %v1979_v30 = vmax.f32 %v4615_v14, 0.0  ;;  %v1981_v36 = vmax.f32 %v6157_v18, 0.0  ;;  %v4617_v37 = vadd.f32 %v1700_v39, %v1435_v31  ;;  %v6166_v42 = vadd.f32 %v1965_v29, %v1443_v25 }
 0x675   :  { %v1982_v28 = vmax.f32 %v6161_v50, 0.0  ;;  %v1984_v63 = vmax.f32 %v6163_v12, 0.0 }
 0x676   :  { %v1983_v38 = vmax.f32 %v4617_v37, 0.0  ;;  %v1985_v41 = vmax.f32 %v6166_v42, 0.0 }
 0x678   :  { %v1704_v46 = vpop.f32.mrb[8].mxu0  ;;  %v1969_v47 = vpop.f32.mrb[12].mxu1 }
 0x679   :  { %v6171_v2 = vadd.f32 %v1704_v46, %v1431_v24  ;;  %v6173_v49 = vadd.f32 %v1969_v47, %v1439_v5  ;;  %v1706_v51 = vpop.f32.mrb[9].mxu0  ;;  %v1971_v52 = vpop.f32.mrb[13].mxu1 }
 0x67a   :  { %v4619_v53 = vadd.f32 %v1706_v51, %v1435_v31  ;;  %v6175_v43 = vadd.f32 %v1971_v52, %v1443_v25  ;;  %v1708_v44 = vpop.f32.mrb[10].mxu0  ;;  %v1973_v45 = vpop.f32.mrb[14].mxu1 }
 0x67b   :  { %v1986_v34 = vmax.f32 %v6171_v2, 0.0  ;;  %v1988_v20 = vmax.f32 %v6173_v49, 0.0  ;;  %v4620_v35 = vadd.f32 %v1708_v44, %v1431_v24  ;;  %v6179_v61 = vadd.f32 %v1973_v45, %v1439_v5  ;;  %v1710_v1 = vpop.f32.mrb[11].mxu0  ;;  %v1975_v48 = vpop.f32.mrb[15].mxu1 }
 0x67c   :  { %v1987_v62 = vmax.f32 %v4619_v53, 0.0  ;;  %v1989_v40 = vmax.f32 %v6175_v43, 0.0  ;;  %v4621_v3 = vadd.f32 %v1710_v1, %v1435_v31  ;;  %v6182_v58 = vadd.f32 %v1975_v48, %v1443_v25 }
 0x67d   :  { %v1990_v7 = vmax.f32 %v4620_v35, 0.0  ;;  %v1992_v33 = vmax.f32 %v6179_v61, 0.0 }
 0x67e   :  { %v1991_v0 = vmax.f32 %v4621_v3, 0.0  ;;  %v1993_v17 = vmax.f32 %v6182_v58, 0.0 }
 0x67f   :  { %5291 = dma.done.wait [#allocation12 + $0x3], 4096 }
 0x680   :  { %5292 = vsyncadd [#allocation12 + $0x3], 4294963200  ;;  %v1999_v54 = vpack.c.bf16 %v1983_v38, %v1979_v30  ;;  %v2014_v24 = vld [vmem:[#allocation5 + $0x40] sm:$0xff]  ;;  %v2015_v32 = vld [vmem:[#allocation5 + $0x48] sm:$0xff]  ;;  %v1998_v47 = vpack.c.bf16 %v1982_v28, %v1978_v19  ;;  %v2003_v2 = vpack.c.bf16 %v1991_v0, %v1987_v62  ;;  %v2002_v45 = vpack.c.bf16 %v1990_v7, %v1986_v34 }
 0x681   :  { %v2006_v5 = vld [vmem:[#allocation5] sm:$0xff]  ;;  %4339 = vmatprep.subr.bf16.mxu0 %v2014_v24  ;;  %v2007_v23 = vld [vmem:[#allocation5 + $0x8] sm:$0xff]  ;;  %v2016_v31 = vld [vmem:[#allocation5 + $0x50] sm:$0xff]  ;;  %v2001_v6 = vpack.c.bf16 %v1985_v41, %v1981_v36  ;;  %v2000_v62 = vpack.c.bf16 %v1984_v63, %v1980_v27  ;;  %v2005_v3 = vpack.c.bf16 %v1993_v17, %v1989_v40  ;;  %v2004_v7 = vpack.c.bf16 %v1992_v33, %v1988_v20 }
 0x682   :  { %2077 = vmatprep.mubr.bf16.mxu0 %v1999_v54  ;;  %4340 = vmatpush3.bf16.msra.mxu0 %v2006_v5  ;;  %v2008_v25 = vld [vmem:[#allocation5 + $0x10] sm:$0xff]  ;;  %v2017_v21 = vld [vmem:[#allocation5 + $0x58] sm:$0xff]  ;;  %v2018_v14 = vld [vmem:[#allocation5 + $0x60] sm:$0xff] }
 0x683   :  { %4341 = vmatprep.subr.bf16.mxu0 %v2015_v32  ;;  %v2009_v10 = vld [vmem:[#allocation5 + $0x18] sm:$0xff]  ;;  %v2010_v26 = vld [vmem:[#allocation5 + $0x20] sm:$0xff]  ;;  %v2019_v9 = vld [vmem:[#allocation5 + $0x68] sm:$0xff] }
 0x684   :  { %v2011_v39 = vld [vmem:[#allocation5 + $0x28] sm:$0xff]  ;;  %v2020_v29 = vld [vmem:[#allocation5 + $0x70] sm:$0xff]  ;;  %v2021_v37 = vld [vmem:[#allocation5 + $0x78] sm:$0xff] }
 0x685   :  { %v2012_v30 = vld [vmem:[#allocation5 + $0x30] sm:$0xff]  ;;  %v2013_v38 = vld [vmem:[#allocation5 + $0x38] sm:$0xff]  ;;  %v2030_v46 = vld [vmem:[#allocation5 + $0xc0] sm:$0xff] }
 0x686   :  { %4342 = vmatpush3.bf16.msra.mxu0 %v2007_v23  ;;  %v2022_v51 = vld [vmem:[#allocation5 + $0x80] sm:$0xff]  ;;  %v2031_v52 = vld [vmem:[#allocation5 + $0xc8] sm:$0xff]  ;;  %v2032_v44 = vld [vmem:[#allocation5 + $0xd0] sm:$0xff] }
 0x687   :  { %4343 = vmatprep.subr.bf16.mxu0 %v2016_v31  ;;  %v2023_v53 = vld [vmem:[#allocation5 + $0x88] sm:$0xff]  ;;  %v2024_v19 = vld [vmem:[#allocation5 + $0x90] sm:$0xff]  ;;  %v2033_v50 = vld [vmem:[#allocation5 + $0xd8] sm:$0xff] }
 0x688   :  { %v2025_v28 = vld [vmem:[#allocation5 + $0x98] sm:$0xff]  ;;  %v2034_v35 = vld [vmem:[#allocation5 + $0xe0] sm:$0xff]  ;;  %v2035_v48 = vld [vmem:[#allocation5 + $0xe8] sm:$0xff] }
 0x689   :  { %v2026_v1 = vld [vmem:[#allocation5 + $0xa0] sm:$0xff]  ;;  %v2027_v34 = vld [vmem:[#allocation5 + $0xa8] sm:$0xff]  ;;  %v2036_v18 = vld [vmem:[#allocation5 + $0xf0] sm:$0xff] }
 0x68a   :  { %4344 = vmatpush3.bf16.msra.mxu0 %v2008_v25  ;;  %v2028_v36 = vld [vmem:[#allocation5 + $0xb0] sm:$0xff]  ;;  %v2037_v42 = vld [vmem:[#allocation5 + $0xf8] sm:$0xff]  ;;  %v4271_v17 = vld [vmem:[#allocation22] ss:$0 sm:$0xff] }
 0x68b   :  { %4345 = vmatprep.subr.bf16.mxu0 %v2017_v21  ;;  %v2029_v41 = vld [vmem:[#allocation5 + $0xb8] sm:$0xff] }
 0x68e   :  { %4346 = vmatpush3.bf16.msra.mxu0 %v2009_v10 }
 0x68f   :  { %4347 = vmatprep.subr.bf16.mxu0 %v2018_v14 }
 0x692   :  { %4348 = vmatpush3.bf16.msra.mxu0 %v2010_v26 }
 0x693   :  { %4349 = vmatprep.subr.bf16.mxu0 %v2019_v9 }
 0x696   :  { %4350 = vmatpush3.bf16.msra.mxu0 %v2011_v39 }
 0x697   :  { %4351 = vmatprep.subr.bf16.mxu0 %v2020_v29 }
 0x69a   :  { %4352 = vmatpush3.bf16.msra.mxu0 %v2012_v30 }
 0x69b   :  { %4353 = vmatprep.subr.bf16.mxu0 %v2021_v37 }
 0x69e   :  { %4354 = vmatpush3.bf16.msra.mxu0 %v2013_v38 }
 0x69f   :  { %4367 = vmatprep.subr.bf16.mxu0 %v2030_v46 }
 0x6a1   :  { %2078 = vmatmul.mubr.bf16.vlgmr.msra.gmra.mrb[12].mxu0 %v1998_v47 }
 0x6a2   :  { %4368 = vmatpush3.bf16.msra.mxu0 %v2022_v51  ;;  %2085 = vmatprep.mubr.bf16.mxu0 %v2003_v2 }
 0x6a3   :  { %4369 = vmatprep.subr.bf16.mxu0 %v2031_v52 }
 0x6a6   :  { %4370 = vmatpush3.bf16.msra.mxu0 %v2023_v53 }
 0x6a7   :  { %4371 = vmatprep.subr.bf16.mxu0 %v2032_v44 }
 0x6a9   :  { %2086 = vmatmul.mubr.bf16.gmra.mrb[16].mxu0 %v2002_v45 }
 0x6aa   :  { %4372 = vmatpush3.bf16.msra.mxu0 %v2024_v19  ;;  %2126 = vmatprep.mubr.bf16.mxu0 %v2001_v6 }
 0x6ab   :  { %4373 = vmatprep.subr.bf16.mxu0 %v2033_v50 }
 0x6ae   :  { %4374 = vmatpush3.bf16.msra.mxu0 %v2025_v28 }
 0x6af   :  { %4375 = vmatprep.subr.bf16.mxu0 %v2034_v35 }
 0x6b2   :  { %4376 = vmatpush3.bf16.msra.mxu0 %v2026_v1 }
 0x6b3   :  { %4377 = vmatprep.subr.bf16.mxu0 %v2035_v48 }
 0x6b6   :  { %4378 = vmatpush3.bf16.msra.mxu0 %v2027_v34 }
 0x6b7   :  { %4379 = vmatprep.subr.bf16.mxu0 %v2036_v18 }
 0x6ba   :  { %4380 = vmatpush3.bf16.msra.mxu0 %v2028_v36 }
 0x6bb   :  { %4381 = vmatprep.subr.bf16.mxu0 %v2037_v42 }
 0x6be   :  { %4382 = vmatpush3.bf16.msra.mxu0 %v2029_v41 }
 0x6c1   :  { %2127 = vmatmul.mubr.bf16.vlgmr.msra.gmra.mrb[20].mxu0 %v2000_v62 }
 0x6c2   :  { %2134 = vmatprep.mubr.bf16.mxu0 %v2005_v3 }
 0x6c9   :  { %2135 = vmatmul.mubr.bf16.gmra.mrb[24].mxu0 %v2004_v7 }
 0x774   :  { %v4355_v0 = vpop.f32.mrb[12].mxu0 }
 0x775   :  { %v4356_v54 = vpop.f32.mrb[13].mxu0 }
 0x776   :  { %v4357_v8 = vadd.f32 %v4356_v54, %v4355_v0  ;;  %v4358_v24 = vpop.f32.mrb[14].mxu0 }
 0x777   :  { %v4359_v12 = vpop.f32.mrb[15].mxu0 }
 0x778   :  { %v4360_v27 = vadd.f32 %v4359_v12, %v4358_v24  ;;  %v2080_v49 = vadd.f32 %v4357_v8, %v4271_v17 }
 0x77a   :  { %v2083_v33 = vadd.f32 %v4360_v27, %v4271_v17 }
 0x77c   :  { %v4361_v63 = vpop.f32.mrb[16].mxu0 }
 0x77d   :  { %v4362_v5 = vpop.f32.mrb[17].mxu0 }
 0x77e   :  { %v4363_v43 = vadd.f32 %v4362_v5, %v4361_v63  ;;  %v4364_v32 = vpop.f32.mrb[18].mxu0 }
 0x77f   :  { %v4365_v58 = vpop.f32.mrb[19].mxu0 }
 0x780   :  { %v4366_v40 = vadd.f32 %v4365_v58, %v4364_v32  ;;  %v2088_v30 = vadd.f32 %v4363_v43, %v4271_v17 }
 0x782   :  { %v2091_v47 = vadd.f32 %v4366_v40, %v4271_v17 }
 0x794   :  { %v4383_v23 = vpop.f32.mrb[20].mxu0 }
 0x795   :  { %v4384_v31 = vpop.f32.mrb[21].mxu0 }
 0x796   :  { %v4385_v25 = vadd.f32 %v4384_v31, %v4383_v23  ;;  %v4386_v61 = vpop.f32.mrb[22].mxu0 }
 0x797   :  { %v4387_v20 = vpop.f32.mrb[23].mxu0 }
 0x798   :  { %v2129_v21 = vadd.f32 %v4385_v25, %v2080_v49  ;;  %v4388_v10 = vadd.f32 %v4387_v20, %v4386_v61 }
 0x79a   :  { %v6207_v14 = vadd.f32 %v2129_v21, %v5784_v13  ;;  %v2132_v26 = vadd.f32 %v4388_v10, %v2083_v33 }
 0x79c   :  { %v6210_v9 = vadd.f32 %v2132_v26, %v5788_v16  ;;  %v4389_v39 = vpop.f32.mrb[24].mxu0 }
 0x79d   :  { %v4390_v29 = vpop.f32.mrb[25].mxu0 }
 0x79e   :  { %v4391_v37 = vadd.f32 %v4390_v29, %v4389_v39  ;;  %v4392_v38 = vpop.f32.mrb[26].mxu0 }
 0x79f   :  { %v4393_v46 = vpop.f32.mrb[27].mxu0 }
 0x7a0   :  { %v2137_v2 = vadd.f32 %v4391_v37, %v2088_v30  ;;  %v4394_v51 = vadd.f32 %v4393_v46, %v4392_v38 }
 0x7a2   :  { %v6213_v52 = vadd.f32 %v2137_v2, %v5782_v11  ;;  %v2140_v53 = vadd.f32 %v4394_v51, %v2091_v47 }
 0x7a4   :  { %v6216_v44 = vadd.f32 %v2140_v53, %v5786_v15 }
 0x7a5   :  { %5293 = dma.done.wait [#allocation12 + $0x4], 10240 }
 0x7a6   :  { %5294 = vsyncadd [#allocation12 + $0x4], 4294957056  ;;  %v6219_v45 = vrot.slane %v6207_v14, 6  ;;  %v2154_v6 = vrot.slane %v6210_v9, 6  ;;  %v2240_v3 = vld [vmem:[#allocation6 + $0x8] sm:$0xff]  ;;  %v2239_v7 = vld [vmem:[#allocation6] sm:$0xff] }
 0x7a7   :  { %v2242_v0 = vld [vmem:[#allocation6 + $0x18] sm:$0xff]  ;;  %2331 = vmatprep.subr.bf16.mxu0 %v2240_v3  ;;  %v2241_v5 = vld [vmem:[#allocation6 + $0x10] sm:$0xff]  ;;  %v2244_v40 = vld [vmem:[#allocation6 + $0x28] sm:$0xff]  ;;  %v6263_v61 = vrot.slane %v6213_v52, 6  ;;  %v2157_v20 = vrot.slane %v6216_v44, 6 }
 0x7a8   :  { %v6224_v19 = vsel %vm574_vm10, %v6219_v45, %v2154_v6  ;;  %v6228_v50 = vsel %vm574_vm10, 0.0, %v6219_v45  ;;  %v6231_v28 = vsel %vm574_vm10, %v2154_v6, 0.0  ;;  %2332 = vmatpush1.bf16.msra.mxu0 %v2239_v7  ;;  %v2243_v23 = vld [vmem:[#allocation6 + $0x20] sm:$0xff]  ;;  %v2246_v31 = vld [vmem:[#allocation6 + $0x38] sm:$0xff]  ;;  %v2245_v49 = vld [vmem:[#allocation6 + $0x30] sm:$0xff] }
 0x7a9   :  { %v2173_v35 = vrot.slane %v6228_v50, 1  ;;  %v2174_v1 = vrot.slane %v6224_v19, 1  ;;  %v2176_v48 = vrot.slane %v6231_v28, 1  ;;  %v4274_v34 = vpack.c.bf16 %v6224_v19, %v6219_v45  ;;  %2333 = vmatprep.subr.bf16.mxu0 %v2242_v0  ;;  %v2248_v25 = vld [vmem:[#allocation6 + $0x48] sm:$0xff]  ;;  %v2247_v33 = vld [vmem:[#allocation6 + $0x40] sm:$0xff]  ;;  %v2250_v21 = vld [vmem:[#allocation6 + $0x58] sm:$0xff] }
 0x7aa   :  { %v2187_v42 = vrot.slane %v6228_v50, 2  ;;  %v2190_v41 = vrot.slane %v6231_v28, 2  ;;  %v2201_v54 = vrot.slane %v6228_v50, 3  ;;  %v2202_v8 = vrot.slane %v6224_v19, 3  ;;  %v2249_v29 = vld [vmem:[#allocation6 + $0x50] sm:$0xff]  ;;  %v2252_v46 = vld [vmem:[#allocation6 + $0x68] sm:$0xff] }
 0x7ab   :  { %v2175_v18 = vsel %vm428_vm1, %v2173_v35, %v2174_v1  ;;  %v2177_v36 = vsel %vm428_vm1, %v2174_v1, %v2176_v48  ;;  %v2204_v24 = vrot.slane %v6231_v28, 3  ;;  %v2188_v12 = vrot.slane %v6224_v19, 2  ;;  %v2253_v3 = vld [vmem:[#allocation6 + $0x70] sm:$0xff]  ;;  %v2256_v7 = vld [vmem:[#allocation6 + $0x88] sm:$0xff] }
 0x7ac   :  { %v2230_v62 = vpack.c.bf16 %v2177_v36, %v2175_v18  ;;  %v6247_v27 = vsel %vm623_vm11, %v2201_v54, %v2202_v8  ;;  %2334 = vmatpush1.bf16.msra.mxu0 %v2241_v5  ;;  %v6268_v10 = vsel %vm574_vm10, %v6263_v61, %v2157_v20  ;;  %v6272_v26 = vsel %vm574_vm10, 0.0, %v6263_v61  ;;  %v2251_v18 = vld [vmem:[#allocation6 + $0x60] sm:$0xff]  ;;  %v2277_v45 = vld [vmem:[#allocation6 + $0x130] sm:$0xff] }
 0x7ad   :  { %v6250_v63 = vsel %vm623_vm11, %v2202_v8, %v2204_v24  ;;  %v6255_v32 = vsel %vm439_vm2, %v2187_v42, %v2188_v12  ;;  %v6258_v58 = vsel %vm439_vm2, %v2188_v12, %v2190_v41  ;;  %2335 = vmatprep.subr.bf16.mxu0 %v2244_v40  ;;  %v6275_v39 = vsel %vm574_vm10, %v2157_v20, 0.0  ;;  %v2254_v42 = vld [vmem:[#allocation6 + $0x78] sm:$0xff]  ;;  %v2255_v24 = vld [vmem:[#allocation6 + $0x80] sm:$0xff] }
 0x7ae   :  { %2363 = vmatprep.mubr.bf16.mxu0 %v2230_v62  ;;  %v2232_v43 = vpack.c.bf16 %v6250_v63, %v6247_v27  ;;  %v2231_v17 = vpack.c.bf16 %v6258_v58, %v6255_v32  ;;  %v2206_v30 = vrot.slane %v6272_v26, 3  ;;  %v2207_v37 = vrot.slane %v6268_v10, 3  ;;  %v2288_v27 = vld [vmem:[#allocation6 + $0x188] sm:$0xff]  ;;  %v2287_v63 = vld [vmem:[#allocation6 + $0x180] sm:$0xff]  ;;  %v2309_v32 = vld [vmem:[#allocation6 + $0x230] sm:$0xff] }
 0x7af   :  { %v2209_v38 = vrot.slane %v6275_v39, 3  ;;  %v2192_v47 = vrot.slane %v6272_v26, 2  ;;  %v2193_v2 = vrot.slane %v6268_v10, 2  ;;  %v2195_v51 = vrot.slane %v6275_v39, 2  ;;  %v2312_v58 = vld [vmem:[#allocation6 + $0x248] sm:$0xff] }
 0x7b0   :  { %2336 = vmatpush1.bf16.msra.mxu0 %v2243_v23  ;;  %v6284_v53 = vsel %vm623_vm11, %v2206_v30, %v2207_v37  ;;  %v2215_v41 = vrot.slane %v6228_v50, 4  ;;  %v2218_v62 = vrot.slane %v6231_v28, 4  ;;  %v2216_v0 = vrot.slane %v6224_v19, 4  ;;  %v2258_v50 = vld [vmem:[#allocation6 + $0x98] sm:$0xff]  ;;  %v2257_v23 = vld [vmem:[#allocation6 + $0x90] sm:$0xff]  ;;  %v2264_v30 = vld [vmem:[#allocation6 + $0xc8] sm:$0xff] }
 0x7b1   :  { %2337 = vmatprep.subr.bf16.mxu0 %v2246_v31  ;;  %v6287_v6 = vsel %vm623_vm11, %v2207_v37, %v2209_v38  ;;  %v6292_v1 = vsel %vm439_vm2, %v2192_v47, %v2193_v2  ;;  %v6295_v48 = vsel %vm439_vm2, %v2193_v2, %v2195_v51  ;;  %v2220_v28 = vrot.slane %v6272_v26, 4  ;;  %v2260_v31 = vld [vmem:[#allocation6 + $0xa8] sm:$0xff]  ;;  %v2263_v37 = vld [vmem:[#allocation6 + $0xc0] sm:$0xff]  ;;  %v2266_v38 = vld [vmem:[#allocation6 + $0xd8] sm:$0xff] }
 0x7b2   :  { %v2237_v35 = vpack.c.bf16 %v6287_v6, %v6284_v53  ;;  %v2236_v36 = vpack.c.bf16 %v6295_v48, %v6292_v1  ;;  %v6303_v54 = vsel %vm638_vm12, %v2215_v41, %v2216_v0  ;;  %v6306_v8 = vsel %vm638_vm12, %v2216_v0, %v2218_v62  ;;  %v2268_v47 = vld [vmem:[#allocation6 + $0xe8] sm:$0xff]  ;;  %v2267_v2 = vld [vmem:[#allocation6 + $0xe0] sm:$0xff]  ;;  %v2270_v41 = vld [vmem:[#allocation6 + $0xf8] sm:$0xff] }
 0x7b3   :  { %v2233_v12 = vpack.c.bf16 %v6306_v8, %v6303_v54  ;;  %v2221_v5 = vrot.slane %v6268_v10, 4  ;;  %v2223_v40 = vrot.slane %v6275_v39, 4  ;;  %v2178_v51 = vrot.slane %v6272_v26, 1  ;;  %v2269_v62 = vld [vmem:[#allocation6 + $0xf0] sm:$0xff]  ;;  %v2272_v0 = vld [vmem:[#allocation6 + $0x108] sm:$0xff]  ;;  %v2314_v53 = vld [vmem:[#allocation6 + $0x258] sm:$0xff] }
 0x7b4   :  { %2338 = vmatpush1.bf16.msra.mxu0 %v2245_v49  ;;  %v2273_v26 = vld [vmem:[#allocation6 + $0x110] sm:$0xff]  ;;  %v2280_v19 = vld [vmem:[#allocation6 + $0x148] sm:$0xff] }
 0x7b5   :  { %2339 = vmatprep.subr.bf16.mxu0 %v2248_v25  ;;  %v6314_v49 = vsel %vm638_vm12, %v2220_v28, %v2221_v5  ;;  %v6317_v25 = vsel %vm638_vm12, %v2221_v5, %v2223_v40  ;;  %v2274_v28 = vld [vmem:[#allocation6 + $0x118] sm:$0xff]  ;;  %v4278_v5 = vpack.c.bf16 %v6268_v10, %v6263_v61  ;;  %v2275_v40 = vld [vmem:[#allocation6 + $0x120] sm:$0xff]  ;;  %v2281_v61 = vld [vmem:[#allocation6 + $0x150] sm:$0xff] }
 0x7b6   :  { %v2238_v20 = vpack.c.bf16 %v6317_v25, %v6314_v49  ;;  %v2313_v6 = vld [vmem:[#allocation6 + $0x250] sm:$0xff]  ;;  %v2319_v48 = vld [vmem:[#allocation23] sm:$0x3] }
 0x7b7   :  { %v2317_v1 = vld [vmem:[#allocation6 + $0x270] sm:$0xff] }
 0x7b8   :  { %2340 = vmatpush1.bf16.msra.mxu0 %v2247_v33  ;;  %v2259_v33 = vld [vmem:[#allocation6 + $0xa0] sm:$0xff] }
 0x7b9   :  { %2341 = vmatprep.subr.bf16.mxu0 %v2250_v21  ;;  %v2262_v21 = vld [vmem:[#allocation6 + $0xb8] sm:$0xff] }
 0x7bc   :  { %2342 = vmatpush1.bf16.msra.mxu0 %v2249_v29  ;;  %v2261_v29 = vld [vmem:[#allocation6 + $0xb0] sm:$0xff] }
 0x7bd   :  { %2343 = vmatprep.subr.bf16.mxu0 %v2252_v46  ;;  %v2265_v46 = vld [vmem:[#allocation6 + $0xd0] sm:$0xff] }
 0x7c0   :  { %2344 = vmatpush1.bf16.msra.mxu0 %v2251_v18  ;;  %v2179_v18 = vrot.slane %v6268_v10, 1  ;;  %v2284_v10 = vld [vmem:[#allocation6 + $0x168] sm:$0xff] }
 0x7c1   :  { %2345 = vmatprep.subr.bf16.mxu0 %v2254_v42  ;;  %v2181_v42 = vrot.slane %v6275_v39, 1  ;;  %v2276_v39 = vld [vmem:[#allocation6 + $0x128] sm:$0xff] }
 0x7c4   :  { %2346 = vmatpush1.bf16.msra.mxu0 %v2253_v3  ;;  %v2180_v3 = vsel %vm428_vm1, %v2178_v51, %v2179_v18  ;;  %v2295_v51 = vld [vmem:[#allocation6 + $0x1c0] sm:$0xff] }
 0x7c5   :  { %2347 = vmatprep.subr.bf16.mxu0 %v2256_v7  ;;  %v2182_v7 = vsel %vm428_vm1, %v2179_v18, %v2181_v42  ;;  %v2298_v18 = vld [vmem:[#allocation6 + $0x1d8] sm:$0xff]  ;;  %v2297_v42 = vld [vmem:[#allocation6 + $0x1d0] sm:$0xff] }
 0x7c8   :  { %2348 = vmatpush1.bf16.msra.mxu0 %v2255_v24  ;;  %v2235_v24 = vpack.c.bf16 %v2182_v7, %v2180_v3  ;;  %v2302_v3 = vld [vmem:[#allocation6 + $0x1f8] sm:$0xff]  ;;  %v2301_v7 = vld [vmem:[#allocation6 + $0x1f0] sm:$0xff] }
 0x7c9   :  { %2349 = vmatprep.subr.bf16.mxu0 %v2258_v50  ;;  %v2271_v50 = vld [vmem:[#allocation6 + $0x100] sm:$0xff] }
 0x7cc   :  { %2350 = vmatpush1.bf16.msra.mxu0 %v2257_v23  ;;  %v2278_v23 = vld [vmem:[#allocation6 + $0x138] sm:$0xff] }
 0x7cd   :  { %2351 = vmatprep.subr.bf16.mxu0 %v2260_v31  ;;  %v2282_v31 = vld [vmem:[#allocation6 + $0x158] sm:$0xff] }
 0x7d0   :  { %2352 = vmatpush1.bf16.msra.mxu0 %v2259_v33  ;;  %v2283_v33 = vld [vmem:[#allocation6 + $0x160] sm:$0xff] }
 0x7d1   :  { %2353 = vmatprep.subr.bf16.mxu0 %v2262_v21  ;;  %v2286_v21 = vld [vmem:[#allocation6 + $0x178] sm:$0xff] }
 0x7d4   :  { %2354 = vmatpush1.bf16.msra.mxu0 %v2261_v29  ;;  %v2285_v29 = vld [vmem:[#allocation6 + $0x170] sm:$0xff] }
 0x7d5   :  { %2355 = vmatprep.subr.bf16.mxu0 %v2264_v30  ;;  %v2289_v30 = vld [vmem:[#allocation6 + $0x190] sm:$0xff] }
 0x7d8   :  { %2356 = vmatpush1.bf16.msra.mxu0 %v2263_v37  ;;  %v2292_v37 = vld [vmem:[#allocation6 + $0x1a8] sm:$0xff] }
 0x7d9   :  { %2357 = vmatprep.subr.bf16.mxu0 %v2266_v38  ;;  %v2291_v38 = vld [vmem:[#allocation6 + $0x1a0] sm:$0xff] }
 0x7dc   :  { %2358 = vmatpush1.bf16.msra.mxu0 %v2265_v46  ;;  %v2294_v46 = vld [vmem:[#allocation6 + $0x1b8] sm:$0xff] }
 0x7dd   :  { %2359 = vmatprep.subr.bf16.mxu0 %v2268_v47  ;;  %v2293_v47 = vld [vmem:[#allocation6 + $0x1b0] sm:$0xff] }
 0x7e0   :  { %2360 = vmatpush1.bf16.msra.mxu0 %v2267_v2  ;;  %v2296_v2 = vld [vmem:[#allocation6 + $0x1c8] sm:$0xff] }
 0x7e1   :  { %2361 = vmatprep.subr.bf16.mxu0 %v2270_v41  ;;  %v2300_v41 = vld [vmem:[#allocation6 + $0x1e8] sm:$0xff] }
 0x7e4   :  { %2362 = vmatpush1.bf16.msra.mxu0 %v2269_v62  ;;  %v2299_v62 = vld [vmem:[#allocation6 + $0x1e0] sm:$0xff] }
 0x7e5   :  { %2384 = vmatprep.subr.bf16.mxu0 %v2272_v0  ;;  %v2304_v0 = vld [vmem:[#allocation6 + $0x208] sm:$0xff] }
 0x7e7   :  { %4275 = vmatmul.mubr.msk.bf16.vlgmr.msra.gmra.mrb[28].mxu0 %vm5900_vm15, %v4274_v34  ;;  %v2279_v34 = vld [vmem:[#allocation6 + $0x140] sm:$0xff] }
 0x7e8   :  { %2385 = vmatpush1.bf16.msra.mxu0 %v2271_v50  ;;  %2373 = vmatprep.mubr.bf16.mxu0 %v2235_v24  ;;  %v2303_v24 = vld [vmem:[#allocation6 + $0x200] sm:$0xff]  ;;  %v2306_v50 = vld [vmem:[#allocation6 + $0x218] sm:$0xff] }
 0x7e9   :  { %2386 = vmatprep.subr.bf16.mxu0 %v2274_v28  ;;  %v2305_v28 = vld [vmem:[#allocation6 + $0x210] sm:$0xff] }
 0x7ec   :  { %2387 = vmatpush1.bf16.msra.mxu0 %v2273_v26  ;;  %v2308_v26 = vld [vmem:[#allocation6 + $0x228] sm:$0xff] }
 0x7ed   :  { %2388 = vmatprep.subr.bf16.mxu0 %v2276_v39  ;;  %v2307_v39 = vld [vmem:[#allocation6 + $0x220] sm:$0xff] }
 0x7ef   :  { %4279 = vmatmul.mubr.msk.bf16.gmra.mrb[32].mxu0 %vm5900_vm15, %v4278_v5  ;;  %v2310_v5 = vld [vmem:[#allocation6 + $0x238] sm:$0xff] }
 0x7f0   :  { %2389 = vmatpush1.bf16.msra.mxu0 %v2275_v40  ;;  %2416 = vmatprep.mubr.bf16.mxu0 %v2232_v43  ;;  %v2290_v43 = vld [vmem:[#allocation6 + $0x198] sm:$0xff]  ;;  %v2315_v40 = vld [vmem:[#allocation6 + $0x260] sm:$0xff] }
 0x7f1   :  { %2390 = vmatprep.subr.bf16.mxu0 %v2278_v23  ;;  %v2318_v23 = vld [vmem:[#allocation6 + $0x278] sm:$0xff] }
 0x7f4   :  { %2391 = vmatpush1.bf16.msra.mxu0 %v2277_v45  ;;  %v2328_v45 = vrot.slane %v2319_v48, %v5939_v56 }
 0x7f5   :  { %2392 = vmatprep.subr.bf16.mxu0 %v2280_v19 }
 0x7f8   :  { %2393 = vmatpush1.bf16.msra.mxu0 %v2279_v34 }
 0x7f9   :  { %2394 = vmatprep.subr.bf16.mxu0 %v2282_v31 }
 0x7fc   :  { %2395 = vmatpush1.bf16.msra.mxu0 %v2281_v61 }
 0x7fd   :  { %2396 = vmatprep.subr.bf16.mxu0 %v2284_v10 }
 0x800   :  { %2397 = vmatpush1.bf16.msra.mxu0 %v2283_v33 }
 0x801   :  { %2398 = vmatprep.subr.bf16.mxu0 %v2286_v21 }
 0x804   :  { %2399 = vmatpush1.bf16.msra.mxu0 %v2285_v29 }
 0x805   :  { %2400 = vmatprep.subr.bf16.mxu0 %v2288_v27 }
 0x808   :  { %2401 = vmatpush1.bf16.msra.mxu0 %v2287_v63 }
 0x809   :  { %2402 = vmatprep.subr.bf16.mxu0 %v2290_v43 }
 0x80c   :  { %2403 = vmatpush1.bf16.msra.mxu0 %v2289_v30 }
 0x80d   :  { %2404 = vmatprep.subr.bf16.mxu0 %v2292_v37 }
 0x810   :  { %2405 = vmatpush1.bf16.msra.mxu0 %v2291_v38 }
 0x811   :  { %2406 = vmatprep.subr.bf16.mxu0 %v2294_v46 }
 0x814   :  { %2407 = vmatpush1.bf16.msra.mxu0 %v2293_v47 }
 0x815   :  { %2408 = vmatprep.subr.bf16.mxu0 %v2296_v2 }
 0x818   :  { %2409 = vmatpush1.bf16.msra.mxu0 %v2295_v51 }
 0x819   :  { %2410 = vmatprep.subr.bf16.mxu0 %v2298_v18 }
 0x81c   :  { %2411 = vmatpush1.bf16.msra.mxu0 %v2297_v42 }
 0x81d   :  { %2412 = vmatprep.subr.bf16.mxu0 %v2300_v41 }
 0x820   :  { %2413 = vmatpush1.bf16.msra.mxu0 %v2299_v62 }
 0x821   :  { %2414 = vmatprep.subr.bf16.mxu0 %v2302_v3 }
 0x824   :  { %2415 = vmatpush1.bf16.msra.mxu0 %v2301_v7 }
 0x825   :  { %2437 = vmatprep.subr.bf16.mxu0 %v2304_v0 }
 0x827   :  { %2417 = vmatmul.mubr.bf16.vlgmr.msra.gmra.mrb[28].mxu0 %v2231_v17  ;;  %v2311_v17 = vld [vmem:[#allocation6 + $0x240] sm:$0xff] }
 0x828   :  { %2438 = vmatpush1.bf16.msra.mxu0 %v2303_v24  ;;  %2426 = vmatprep.mubr.bf16.mxu0 %v2237_v35  ;;  %v2316_v35 = vld [vmem:[#allocation6 + $0x268] sm:$0xff] }
 0x829   :  { %2439 = vmatprep.subr.bf16.mxu0 %v2306_v50 }
 0x82c   :  { %2440 = vmatpush1.bf16.msra.mxu0 %v2305_v28 }
 0x82d   :  { %2441 = vmatprep.subr.bf16.mxu0 %v2308_v26 }
 0x82f   :  { %2427 = vmatmul.mubr.bf16.gmra.mrb[32].mxu0 %v2236_v36  ;;  %v2324_v36 = vrot.slane %v2319_v48, %v5936_v60 }
 0x830   :  { %2442 = vmatpush1.bf16.msra.mxu0 %v2307_v39  ;;  %2469 = vmatprep.mubr.bf16.mxu0 %v5346_v57 }
 0x831   :  { %2443 = vmatprep.subr.bf16.mxu0 %v2310_v5 }
 0x834   :  { %2444 = vmatpush1.bf16.msra.mxu0 %v2309_v32 }
 0x835   :  { %2445 = vmatprep.subr.bf16.mxu0 %v2312_v58 }
 0x838   :  { %2446 = vmatpush1.bf16.msra.mxu0 %v2311_v17 }
 0x839   :  { %2447 = vmatprep.subr.bf16.mxu0 %v2314_v53 }
 0x83c   :  { %2448 = vmatpush1.bf16.msra.mxu0 %v2313_v6 }
 0x83d   :  { %2449 = vmatprep.subr.bf16.mxu0 %v2316_v35 }
 0x840   :  { %2450 = vmatpush1.bf16.msra.mxu0 %v2315_v40 }
 0x841   :  { %2451 = vmatprep.subr.bf16.mxu0 %v2318_v23 }
 0x844   :  { %2452 = vmatpush1.bf16.msra.mxu0 %v2317_v1 }
 0x847   :  { %2470 = vmatmul.mubr.bf16.vlgmr.msra.gmra.mrb[28].mxu0 %v2233_v12 }
 0x848   :  { %2479 = vmatprep.mubr.bf16.mxu0 %v5346_v57 }
 0x84f   :  { %2480 = vmatmul.mubr.bf16.gmra.mrb[32].mxu0 %v2238_v20 }
 0x91a   :  { %v2471_v19 = vpop.f32.mrb[28].mxu0 }
 0x91b   :  { %v6357_v34 = vadd.f32 %v2471_v19, %v2324_v36  ;;  %v2473_v31 = vpop.f32.mrb[29].mxu0 }
 0x91c   :  { %v4631_v61 = vadd.f32 %v2473_v31, %v2328_v45  ;;  %v2475_v10 = vpop.f32.mrb[30].mxu0 }
 0x91d   :  { %v2490_v54 = vmax.f32 %v6357_v34, 0.0  ;;  %v6360_v8 = vadd.f32 %v2475_v10, %v2324_v36  ;;  %v2477_v57 = vpop.f32.mrb[31].mxu0 }
 0x91e   :  { %v2491_v12 = vmax.f32 %v4631_v61, 0.0  ;;  %v4633_v33 = vadd.f32 %v2477_v57, %v2328_v45 }
 0x91f   :  { %v2492_v49 = vmax.f32 %v6360_v8, 0.0 }
 0x920   :  { %v2493_v25 = vmax.f32 %v4633_v33, 0.0 }
 0x922   :  { %v2481_v20 = vpop.f32.mrb[32].mxu0 }
 0x923   :  { %v6363_v21 = vadd.f32 %v2481_v20, %v2324_v36  ;;  %v2483_v29 = vpop.f32.mrb[33].mxu0 }
 0x924   :  { %v6365_v27 = vadd.f32 %v2483_v29, %v2328_v45  ;;  %v2485_v63 = vpop.f32.mrb[34].mxu0 }
 0x925   :  { %v2494_v43 = vmax.f32 %v6363_v21, 0.0  ;;  %v6368_v30 = vadd.f32 %v2485_v63, %v2324_v36  ;;  %v2487_v37 = vpop.f32.mrb[35].mxu0 }
 0x926   :  { %v2495_v38 = vmax.f32 %v6365_v27, 0.0  ;;  %v6371_v46 = vadd.f32 %v2487_v37, %v2328_v45 }
 0x927   :  { %v2496_v47 = vmax.f32 %v6368_v30, 0.0 }
 0x928   :  { %v2497_v2 = vmax.f32 %v6371_v46, 0.0 }
 0x929   :  { %5295 = dma.done.wait [#allocation12 + $0x5], 40960 }
 0x92a   :  { %5296 = vsyncadd [#allocation12 + $0x5], 4294926336  ;;  %v6375_v51 = vrot.slane %v2491_v12, 6  ;;  %v6377_v18 = vrot.slane %v2493_v25, 6  ;;  %v2681_v62 = vld [vmem:[#allocation7 + $0x8] sm:$0xff]  ;;  %v2683_v3 = vld [vmem:[#allocation7 + $0x18] sm:$0xff] }
 0x92b   :  { %v2680_v7 = vld [vmem:[#allocation7] sm:$0xff]  ;;  %3022 = vmatprep.subr.bf16.mxu1 %v2681_v62  ;;  %3287 = vmatprep.subr.bf16.mxu0 %v2683_v3  ;;  %v2682_v0 = vld [vmem:[#allocation7 + $0x10] sm:$0xff]  ;;  %v2685_v24 = vld [vmem:[#allocation7 + $0x28] sm:$0xff] }
 0x92c   :  { %v6382_v42 = vsel %vm574_vm10, %v6375_v51, %v6377_v18  ;;  %v2687_v50 = vld [vmem:[#allocation7 + $0x38] sm:$0xff]  ;;  %3023 = vmatpush1.bf16.msra.mxu1 %v2680_v7  ;;  %3288 = vmatpush1.bf16.msra.mxu0 %v2682_v0  ;;  %v2684_v28 = vld [vmem:[#allocation7 + $0x20] sm:$0xff]  ;;  %v2686_v26 = vld [vmem:[#allocation7 + $0x30] sm:$0xff]  ;;  %v6420_v46 = vsel %vm574_vm10, 0.0, %v6375_v51 }
 0x92d   :  { %v4282_v41 = vpack.c.bf16 %v6382_v42, %v6375_v51  ;;  %3024 = vmatprep.subr.bf16.mxu1 %v2685_v24  ;;  %3289 = vmatprep.subr.bf16.mxu0 %v2687_v50  ;;  %v2689_v39 = vld [vmem:[#allocation7 + $0x48] sm:$0xff]  ;;  %v2691_v5 = vld [vmem:[#allocation7 + $0x58] sm:$0xff]  ;;  %v2688_v32 = vld [vmem:[#allocation7 + $0x40] sm:$0xff]  ;;  %v2551_v21 = vrot.slane %v6420_v46, 1 }
 0x92e   :  { %v2690_v58 = vld [vmem:[#allocation7 + $0x50] sm:$0xff]  ;;  %v2693_v17 = vld [vmem:[#allocation7 + $0x68] sm:$0xff]  ;;  %v2695_v53 = vld [vmem:[#allocation7 + $0x78] sm:$0xff] }
 0x92f   :  { %4283 = vmatprep.mubr.msk.bf16.mxu1 %vm5900_vm15, %v4282_v41  ;;  %4299 = vmatprep.mubr.msk.bf16.mxu0 %vm5900_vm15, %v4282_v41  ;;  %v2692_v6 = vld [vmem:[#allocation7 + $0x60] sm:$0xff]  ;;  %v2694_v35 = vld [vmem:[#allocation7 + $0x70] sm:$0xff]  ;;  %v2697_v40 = vld [vmem:[#allocation7 + $0x88] sm:$0xff] }
 0x930   :  { %3025 = vmatpush1.bf16.msra.mxu1 %v2684_v28  ;;  %3290 = vmatpush1.bf16.msra.mxu0 %v2686_v26  ;;  %v2699_v23 = vld [vmem:[#allocation7 + $0x98] sm:$0xff]  ;;  %v2696_v1 = vld [vmem:[#allocation7 + $0x80] sm:$0xff]  ;;  %v2698_v48 = vld [vmem:[#allocation7 + $0x90] sm:$0xff] }
 0x931   :  { %3026 = vmatprep.subr.bf16.mxu1 %v2689_v39  ;;  %3291 = vmatprep.subr.bf16.mxu0 %v2691_v5  ;;  %v2701_v36 = vld [vmem:[#allocation7 + $0xa8] sm:$0xff]  ;;  %v2703_v45 = vld [vmem:[#allocation7 + $0xb8] sm:$0xff]  ;;  %v2700_v19 = vld [vmem:[#allocation7 + $0xa0] sm:$0xff] }
 0x932   :  { %v2702_v31 = vld [vmem:[#allocation7 + $0xb0] sm:$0xff]  ;;  %v2705_v61 = vld [vmem:[#allocation7 + $0xc8] sm:$0xff]  ;;  %v2707_v10 = vld [vmem:[#allocation7 + $0xd8] sm:$0xff] }
 0x933   :  { %v2704_v57 = vld [vmem:[#allocation7 + $0xc0] sm:$0xff]  ;;  %v2706_v12 = vld [vmem:[#allocation7 + $0xd0] sm:$0xff]  ;;  %v2709_v33 = vld [vmem:[#allocation7 + $0xe8] sm:$0xff] }
 0x934   :  { %3027 = vmatpush1.bf16.msra.mxu1 %v2688_v32  ;;  %3292 = vmatpush1.bf16.msra.mxu0 %v2690_v58  ;;  %v2711_v25 = vld [vmem:[#allocation7 + $0xf8] sm:$0xff]  ;;  %v2708_v20 = vld [vmem:[#allocation7 + $0xe0] sm:$0xff]  ;;  %v2710_v29 = vld [vmem:[#allocation7 + $0xf0] sm:$0xff] }
 0x935   :  { %3028 = vmatprep.subr.bf16.mxu1 %v2693_v17  ;;  %3293 = vmatprep.subr.bf16.mxu0 %v2695_v53  ;;  %v2713_v63 = vld [vmem:[#allocation7 + $0x108] sm:$0xff]  ;;  %v2715_v37 = vld [vmem:[#allocation7 + $0x118] sm:$0xff]  ;;  %v2712_v41 = vld [vmem:[#allocation7 + $0x100] sm:$0xff] }
 0x936   :  { %v2714_v62 = vld [vmem:[#allocation7 + $0x110] sm:$0xff]  ;;  %v2717_v3 = vld [vmem:[#allocation7 + $0x128] sm:$0xff]  ;;  %v2719_v7 = vld [vmem:[#allocation7 + $0x138] sm:$0xff] }
 0x937   :  { %v2716_v0 = vld [vmem:[#allocation7 + $0x120] sm:$0xff]  ;;  %v2718_v24 = vld [vmem:[#allocation7 + $0x130] sm:$0xff]  ;;  %v2721_v50 = vld [vmem:[#allocation7 + $0x148] sm:$0xff] }
 0x938   :  { %3029 = vmatpush1.bf16.msra.mxu1 %v2692_v6  ;;  %3294 = vmatpush1.bf16.msra.mxu0 %v2694_v35  ;;  %v2723_v28 = vld [vmem:[#allocation7 + $0x158] sm:$0xff]  ;;  %v2720_v26 = vld [vmem:[#allocation7 + $0x140] sm:$0xff]  ;;  %v2722_v39 = vld [vmem:[#allocation7 + $0x150] sm:$0xff] }
 0x939   :  { %3030 = vmatprep.subr.bf16.mxu1 %v2697_v40  ;;  %3295 = vmatprep.subr.bf16.mxu0 %v2699_v23  ;;  %v2725_v5 = vld [vmem:[#allocation7 + $0x168] sm:$0xff]  ;;  %v2727_v32 = vld [vmem:[#allocation7 + $0x178] sm:$0xff]  ;;  %v2724_v58 = vld [vmem:[#allocation7 + $0x160] sm:$0xff] }
 0x93a   :  { %v2726_v17 = vld [vmem:[#allocation7 + $0x170] sm:$0xff]  ;;  %v2729_v53 = vld [vmem:[#allocation7 + $0x188] sm:$0xff]  ;;  %v2731_v6 = vld [vmem:[#allocation7 + $0x198] sm:$0xff] }
 0x93b   :  { %v2728_v35 = vld [vmem:[#allocation7 + $0x180] sm:$0xff]  ;;  %v2730_v40 = vld [vmem:[#allocation7 + $0x190] sm:$0xff]  ;;  %v2733_v23 = vld [vmem:[#allocation7 + $0x1a8] sm:$0xff] }
 0x93c   :  { %3031 = vmatpush1.bf16.msra.mxu1 %v2696_v1  ;;  %3296 = vmatpush1.bf16.msra.mxu0 %v2698_v48  ;;  %v2735_v1 = vld [vmem:[#allocation7 + $0x1b8] sm:$0xff]  ;;  %v2732_v48 = vld [vmem:[#allocation7 + $0x1a0] sm:$0xff]  ;;  %v2742_v8 = vld [vmem:[#allocation7 + $0x1f0] sm:$0xff] }
 0x93d   :  { %3032 = vmatprep.subr.bf16.mxu1 %v2701_v36  ;;  %3297 = vmatprep.subr.bf16.mxu0 %v2703_v45  ;;  %v2734_v36 = vld [vmem:[#allocation7 + $0x1b0] sm:$0xff]  ;;  %v2737_v45 = vld [vmem:[#allocation7 + $0x1c8] sm:$0xff]  ;;  %v2764_v55 = vld [vmem:[#allocation7 + $0x2a0] sm:$0xff] }
 0x940   :  { %3033 = vmatpush1.bf16.msra.mxu1 %v2700_v19  ;;  %3298 = vmatpush1.bf16.msra.mxu0 %v2702_v31  ;;  %v2739_v19 = vld [vmem:[#allocation7 + $0x1d8] sm:$0xff]  ;;  %v6392_v31 = vrot.slane %v2490_v54, 6  ;;  %v2740_v54 = vld [vmem:[#allocation7 + $0x1e0] sm:$0xff] }
 0x941   :  { %3034 = vmatprep.subr.bf16.mxu1 %v2705_v61  ;;  %3299 = vmatprep.subr.bf16.mxu0 %v2707_v10  ;;  %v6396_v61 = vrot.slane %v2492_v49, 6  ;;  %v2736_v10 = vld [vmem:[#allocation7 + $0x1c0] sm:$0xff]  ;;  %v2745_v49 = vld [vmem:[#allocation7 + $0x208] sm:$0xff] }
 0x943   :  { %v6409_v34 = vsel %vm574_vm10, %v6392_v31, %v6396_v61 }
 0x944   :  { %3035 = vmatpush1.bf16.msra.mxu1 %v2704_v57  ;;  %3300 = vmatpush1.bf16.msra.mxu0 %v2706_v12  ;;  %v2738_v57 = vld [vmem:[#allocation7 + $0x1d0] sm:$0xff]  ;;  %v2741_v12 = vld [vmem:[#allocation7 + $0x1e8] sm:$0xff]  ;;  %v4286_v27 = vpack.c.bf16 %v6409_v34, %v6392_v31 }
 0x945   :  { %3036 = vmatprep.subr.bf16.mxu1 %v2709_v33  ;;  %3301 = vmatprep.subr.bf16.mxu0 %v2711_v25  ;;  %v2743_v33 = vld [vmem:[#allocation7 + $0x1f8] sm:$0xff]  ;;  %v6400_v25 = vrot.slane %v2495_v38, 6 }
 0x948   :  { %3037 = vmatpush1.bf16.msra.mxu1 %v2708_v20  ;;  %3302 = vmatpush1.bf16.msra.mxu0 %v2710_v29  ;;  %v6404_v20 = vrot.slane %v2497_v2, 6  ;;  %v2747_v29 = vld [vmem:[#allocation7 + $0x218] sm:$0xff]  ;;  %v6424_v2 = vrot.slane %v2494_v43, 6  ;;  %v2552_v43 = vrot.slane %v6382_v42, 1 }
 0x949   :  { %3038 = vmatprep.subr.bf16.mxu1 %v2713_v63  ;;  %3303 = vmatprep.subr.bf16.mxu0 %v2715_v37  ;;  %v6428_v63 = vrot.slane %v2496_v47, 6  ;;  %v6432_v37 = vsel %vm574_vm10, %v6377_v18, 0.0  ;;  %v2748_v18 = vld [vmem:[#allocation7 + $0x220] sm:$0xff] }
 0x94a   :  { %v6416_v38 = vsel %vm574_vm10, %v6400_v25, %v6404_v20  ;;  %v2556_v30 = vrot.slane %v6432_v37, 1 }
 0x94b   :  { %v4290_v51 = vpack.c.bf16 %v6416_v38, %v6400_v25  ;;  %v6446_v47 = vsel %vm574_vm10, %v6424_v2, %v6428_v63 }
 0x94c   :  { %3039 = vmatpush1.bf16.msra.mxu1 %v2712_v41  ;;  %3304 = vmatpush1.bf16.msra.mxu0 %v2714_v62  ;;  %v2744_v41 = vld [vmem:[#allocation7 + $0x200] sm:$0xff]  ;;  %v2746_v62 = vld [vmem:[#allocation7 + $0x210] sm:$0xff] }
 0x94d   :  { %3040 = vmatprep.subr.bf16.mxu1 %v2717_v3  ;;  %3305 = vmatprep.subr.bf16.mxu0 %v2719_v7  ;;  %v2749_v3 = vld [vmem:[#allocation7 + $0x228] sm:$0xff]  ;;  %v2751_v7 = vld [vmem:[#allocation7 + $0x238] sm:$0xff] }
 0x950   :  { %3041 = vmatpush1.bf16.msra.mxu1 %v2716_v0  ;;  %3306 = vmatpush1.bf16.msra.mxu0 %v2718_v24  ;;  %v2750_v0 = vld [vmem:[#allocation7 + $0x230] sm:$0xff]  ;;  %v2753_v24 = vld [vmem:[#allocation7 + $0x248] sm:$0xff] }
 0x951   :  { %3042 = vmatprep.subr.bf16.mxu1 %v2721_v50  ;;  %3307 = vmatprep.subr.bf16.mxu0 %v2723_v28  ;;  %v2755_v50 = vld [vmem:[#allocation7 + $0x258] sm:$0xff]  ;;  %v4294_v28 = vpack.c.bf16 %v6446_v47, %v6424_v2 }
 0x954   :  { %3043 = vmatpush1.bf16.msra.mxu1 %v2720_v26  ;;  %3308 = vmatpush1.bf16.msra.mxu0 %v2722_v39  ;;  %v2553_v26 = vsel %vm428_vm1, %v2551_v21, %v2552_v43  ;;  %v2557_v39 = vsel %vm428_vm1, %v2552_v43, %v2556_v30  ;;  %v2780_v21 = vld [vmem:[#allocation7 + $0x320] sm:$0xff]  ;;  %v2782_v43 = vld [vmem:[#allocation7 + $0x330] sm:$0xff]  ;;  %v2785_v30 = vld [vmem:[#allocation7 + $0x348] sm:$0xff] }
 0x955   :  { %3044 = vmatprep.subr.bf16.mxu1 %v2725_v5  ;;  %3309 = vmatprep.subr.bf16.mxu0 %v2727_v32  ;;  %v2752_v5 = vld [vmem:[#allocation7 + $0x240] sm:$0xff]  ;;  %v2754_v32 = vld [vmem:[#allocation7 + $0x250] sm:$0xff] }
 0x958   :  { %3045 = vmatpush1.bf16.msra.mxu1 %v2724_v58  ;;  %3310 = vmatpush1.bf16.msra.mxu0 %v2726_v17  ;;  %v2757_v58 = vld [vmem:[#allocation7 + $0x268] sm:$0xff]  ;;  %v2759_v17 = vld [vmem:[#allocation7 + $0x278] sm:$0xff] }
 0x959   :  { %3046 = vmatprep.subr.bf16.mxu1 %v2729_v53  ;;  %3311 = vmatprep.subr.bf16.mxu0 %v2731_v6  ;;  %v2663_v53 = vpack.c.bf16 %v2557_v39, %v2553_v26  ;;  %v2756_v6 = vld [vmem:[#allocation7 + $0x260] sm:$0xff]  ;;  %v2790_v39 = vld [vmem:[#allocation7 + $0x370] sm:$0xff] }
 0x95a   :  { %v2788_v26 = vld [vmem:[#allocation7 + $0x360] sm:$0xff] }
 0x95c   :  { %3047 = vmatpush1.bf16.msra.mxu1 %v2728_v35  ;;  %3312 = vmatpush1.bf16.msra.mxu0 %v2730_v40  ;;  %v2758_v35 = vld [vmem:[#allocation7 + $0x270] sm:$0xff]  ;;  %v2761_v40 = vld [vmem:[#allocation7 + $0x288] sm:$0xff] }
 0x95d   :  { %3048 = vmatprep.subr.bf16.mxu1 %v2733_v23  ;;  %3313 = vmatprep.subr.bf16.mxu0 %v2735_v1  ;;  %v2763_v23 = vld [vmem:[#allocation7 + $0x298] sm:$0xff]  ;;  %v2760_v1 = vld [vmem:[#allocation7 + $0x280] sm:$0xff] }
 0x960   :  { %3049 = vmatpush1.bf16.msra.mxu1 %v2732_v48  ;;  %3314 = vmatpush1.bf16.msra.mxu0 %v2734_v36  ;;  %v2762_v48 = vld [vmem:[#allocation7 + $0x290] sm:$0xff]  ;;  %v2765_v36 = vld [vmem:[#allocation7 + $0x2a8] sm:$0xff] }
 0x961   :  { %3050 = vmatprep.subr.bf16.mxu1 %v2737_v45  ;;  %3315 = vmatprep.subr.bf16.mxu0 %v2739_v19  ;;  %v2767_v45 = vld [vmem:[#allocation7 + $0x2b8] sm:$0xff]  ;;  %v2766_v19 = vld [vmem:[#allocation7 + $0x2b0] sm:$0xff] }
 0x964   :  { %3051 = vmatpush1.bf16.msra.mxu1 %v2736_v10  ;;  %3316 = vmatpush1.bf16.msra.mxu0 %v2738_v57  ;;  %v2769_v10 = vld [vmem:[#allocation7 + $0x2c8] sm:$0xff]  ;;  %v2771_v57 = vld [vmem:[#allocation7 + $0x2d8] sm:$0xff] }
 0x965   :  { %3052 = vmatprep.subr.bf16.mxu1 %v2741_v12  ;;  %3317 = vmatprep.subr.bf16.mxu0 %v2743_v33  ;;  %v2768_v12 = vld [vmem:[#allocation7 + $0x2c0] sm:$0xff]  ;;  %v2770_v33 = vld [vmem:[#allocation7 + $0x2d0] sm:$0xff] }
 0x968   :  { %3053 = vmatpush1.bf16.msra.mxu1 %v2740_v54  ;;  %3318 = vmatpush1.bf16.msra.mxu0 %v2742_v8  ;;  %v2773_v54 = vld [vmem:[#allocation7 + $0x2e8] sm:$0xff]  ;;  %v2775_v8 = vld [vmem:[#allocation7 + $0x2f8] sm:$0xff] }
 0x969   :  { %3075 = vmatprep.subr.bf16.mxu1 %v2745_v49  ;;  %3340 = vmatprep.subr.bf16.mxu0 %v2747_v29  ;;  %v2772_v49 = vld [vmem:[#allocation7 + $0x2e0] sm:$0xff]  ;;  %v2774_v29 = vld [vmem:[#allocation7 + $0x2f0] sm:$0xff] }
 0x96b   :  { %4287 = vmatmul.mubr.msk.bf16.vlgmr.msra.gmra.mrb[16].mxu1 %vm5900_vm15, %v4286_v27  ;;  %4303 = vmatmul.mubr.msk.bf16.vlgmr.msra.gmra.mrb[36].mxu0 %vm5900_vm15, %v4286_v27  ;;  %v2777_v27 = vld [vmem:[#allocation7 + $0x308] sm:$0xff] }
 0x96c   :  { %3076 = vmatpush1.bf16.msra.mxu1 %v2744_v41  ;;  %3341 = vmatpush1.bf16.msra.mxu0 %v2746_v62  ;;  %v2779_v41 = vld [vmem:[#allocation7 + $0x318] sm:$0xff]  ;;  %v2776_v62 = vld [vmem:[#allocation7 + $0x300] sm:$0xff] }
 0x96d   :  { %3077 = vmatprep.subr.bf16.mxu1 %v2749_v3  ;;  %3342 = vmatprep.subr.bf16.mxu0 %v2751_v7  ;;  %v2778_v3 = vld [vmem:[#allocation7 + $0x310] sm:$0xff]  ;;  %v2781_v7 = vld [vmem:[#allocation7 + $0x328] sm:$0xff] }
 0x96e   :  { %4291 = vmatprep.mubr.msk.bf16.mxu1 %vm5900_vm15, %v4290_v51  ;;  %4307 = vmatprep.mubr.msk.bf16.mxu0 %vm5900_vm15, %v4290_v51  ;;  %v2783_v51 = vld [vmem:[#allocation7 + $0x338] sm:$0xff] }
 0x970   :  { %3078 = vmatpush1.bf16.msra.mxu1 %v2748_v18  ;;  %3343 = vmatpush1.bf16.msra.mxu0 %v2750_v0  ;;  %v2787_v18 = vld [vmem:[#allocation7 + $0x358] sm:$0xff]  ;;  %v2784_v0 = vld [vmem:[#allocation7 + $0x340] sm:$0xff] }
 0x971   :  { %3079 = vmatprep.subr.bf16.mxu1 %v2753_v24  ;;  %3344 = vmatprep.subr.bf16.mxu0 %v2755_v50  ;;  %v2786_v24 = vld [vmem:[#allocation7 + $0x350] sm:$0xff]  ;;  %v2789_v50 = vld [vmem:[#allocation7 + $0x368] sm:$0xff] }
 0x973   :  { %4295 = vmatmul.mubr.msk.bf16.gmra.mrb[20].mxu1 %vm5900_vm15, %v4294_v28  ;;  %4311 = vmatmul.mubr.msk.bf16.gmra.mrb[40].mxu0 %vm5900_vm15, %v4294_v28  ;;  %v2791_v28 = vld [vmem:[#allocation7 + $0x378] sm:$0xff] }
 0x974   :  { %3080 = vmatpush1.bf16.msra.mxu1 %v2752_v5  ;;  %3345 = vmatpush1.bf16.msra.mxu0 %v2754_v32  ;;  %v2793_v5 = vld [vmem:[#allocation7 + $0x388] sm:$0xff]  ;;  %v2795_v32 = vld [vmem:[#allocation7 + $0x398] sm:$0xff] }
 0x975   :  { %3081 = vmatprep.subr.bf16.mxu1 %v2757_v58  ;;  %3346 = vmatprep.subr.bf16.mxu0 %v2759_v17  ;;  %v2792_v58 = vld [vmem:[#allocation7 + $0x380] sm:$0xff]  ;;  %v2794_v17 = vld [vmem:[#allocation7 + $0x390] sm:$0xff] }
 0x976   :  { %3107 = vmatprep.mubr.bf16.mxu1 %v2663_v53  ;;  %3372 = vmatprep.mubr.bf16.mxu0 %v2663_v53  ;;  %v2797_v53 = vld [vmem:[#allocation7 + $0x3a8] sm:$0xff] }
 0x978   :  { %3082 = vmatpush1.bf16.msra.mxu1 %v2756_v6  ;;  %3347 = vmatpush1.bf16.msra.mxu0 %v2758_v35  ;;  %v2799_v6 = vld [vmem:[#allocation7 + $0x3b8] sm:$0xff]  ;;  %v6462_v35 = vsel %vm574_vm10, 0.0, %v6392_v31 }
 0x979   :  { %3083 = vmatprep.subr.bf16.mxu1 %v2761_v40  ;;  %3348 = vmatprep.subr.bf16.mxu0 %v2763_v23  ;;  %v6466_v40 = vsel %vm574_vm10, %v6396_v61, 0.0  ;;  %v2796_v23 = vld [vmem:[#allocation7 + $0x3a0] sm:$0xff]  ;;  %v6477_v61 = vsel %vm574_vm10, %v6404_v20, 0.0 }
 0x97a   :  { %v2554_v31 = vrot.slane %v6466_v40, 1  ;;  %v2804_v20 = vld [vmem:[#allocation7 + $0x3e0] sm:$0xff] }
 0x97c   :  { %3084 = vmatpush1.bf16.msra.mxu1 %v2760_v1  ;;  %3349 = vmatpush1.bf16.msra.mxu0 %v2762_v48  ;;  %v2798_v1 = vld [vmem:[#allocation7 + $0x3b0] sm:$0xff]  ;;  %v2801_v48 = vld [vmem:[#allocation7 + $0x3c8] sm:$0xff] }
 0x97d   :  { %3085 = vmatprep.subr.bf16.mxu1 %v2765_v36  ;;  %3350 = vmatprep.subr.bf16.mxu0 %v2767_v45  ;;  %v2803_v36 = vld [vmem:[#allocation7 + $0x3d8] sm:$0xff]  ;;  %v2548_v45 = vrot.slane %v6462_v35, 1 }
 0x980   :  { %3086 = vmatpush1.bf16.msra.mxu1 %v2764_v55  ;;  %3351 = vmatpush1.bf16.msra.mxu0 %v2766_v19  ;;  %v2549_v55 = vrot.slane %v6409_v34, 1  ;;  %v6473_v19 = vsel %vm574_vm10, 0.0, %v6400_v25 }
 0x981   :  { %3087 = vmatprep.subr.bf16.mxu1 %v2769_v10  ;;  %3352 = vmatprep.subr.bf16.mxu0 %v2771_v57  ;;  %v2800_v10 = vld [vmem:[#allocation7 + $0x3c0] sm:$0xff]  ;;  %v2802_v57 = vld [vmem:[#allocation7 + $0x3d0] sm:$0xff] }
 0x982   :  { %v2550_v25 = vsel %vm428_vm1, %v2548_v45, %v2549_v55  ;;  %v2816_v45 = vld [vmem:[#allocation7 + $0x440] sm:$0xff] }
 0x984   :  { %3088 = vmatpush1.bf16.msra.mxu1 %v2768_v12  ;;  %3353 = vmatpush1.bf16.msra.mxu0 %v2770_v33  ;;  %v2805_v12 = vld [vmem:[#allocation7 + $0x3e8] sm:$0xff]  ;;  %v2807_v33 = vld [vmem:[#allocation7 + $0x3f8] sm:$0xff] }
 0x985   :  { %3089 = vmatprep.subr.bf16.mxu1 %v2773_v54  ;;  %3354 = vmatprep.subr.bf16.mxu0 %v2775_v8  ;;  %v2561_v54 = vrot.slane %v6473_v19, 1  ;;  %v2562_v8 = vrot.slane %v6416_v38, 1 }
 0x988   :  { %3090 = vmatpush1.bf16.msra.mxu1 %v2772_v49  ;;  %3355 = vmatpush1.bf16.msra.mxu0 %v2774_v29  ;;  %v2566_v49 = vrot.slane %v6477_v61, 1  ;;  %v2555_v29 = vsel %vm428_vm1, %v2549_v55, %v2554_v31  ;;  %v2818_v55 = vld [vmem:[#allocation7 + $0x450] sm:$0xff]  ;;  %v2821_v31 = vld [vmem:[#allocation7 + $0x468] sm:$0xff] }
 0x989   :  { %3091 = vmatprep.subr.bf16.mxu1 %v2777_v27  ;;  %3356 = vmatprep.subr.bf16.mxu0 %v2779_v41  ;;  %v2806_v27 = vld [vmem:[#allocation7 + $0x3f0] sm:$0xff]  ;;  %v6486_v41 = vsel %vm574_vm10, 0.0, %v6424_v2 }
 0x98c   :  { %3092 = vmatpush1.bf16.msra.mxu1 %v2776_v62  ;;  %3357 = vmatpush1.bf16.msra.mxu0 %v2778_v3  ;;  %v6490_v62 = vsel %vm574_vm10, %v6428_v63, 0.0  ;;  %v2809_v3 = vld [vmem:[#allocation7 + $0x408] sm:$0xff]  ;;  %v2810_v63 = vld [vmem:[#allocation7 + $0x410] sm:$0xff] }
 0x98d   :  { %3093 = vmatprep.subr.bf16.mxu1 %v2781_v7  ;;  %3358 = vmatprep.subr.bf16.mxu0 %v2783_v51  ;;  %v2811_v7 = vld [vmem:[#allocation7 + $0x418] sm:$0xff]  ;;  %v2662_v51 = vpack.c.bf16 %v2555_v29, %v2550_v25  ;;  %v2564_v2 = vrot.slane %v6490_v62, 1  ;;  %v2826_v25 = vld [vmem:[#allocation7 + $0x490] sm:$0xff]  ;;  %v2829_v29 = vld [vmem:[#allocation7 + $0x4a8] sm:$0xff] }
 0x990   :  { %3094 = vmatpush1.bf16.msra.mxu1 %v2780_v21  ;;  %3359 = vmatpush1.bf16.msra.mxu0 %v2782_v43  ;;  %v2563_v21 = vsel %vm428_vm1, %v2561_v54, %v2562_v8  ;;  %v2567_v43 = vsel %vm428_vm1, %v2562_v8, %v2566_v49  ;;  %v2825_v54 = vld [vmem:[#allocation7 + $0x488] sm:$0xff]  ;;  %v2827_v8 = vld [vmem:[#allocation7 + $0x498] sm:$0xff]  ;;  %v2824_v49 = vld [vmem:[#allocation7 + $0x480] sm:$0xff] }
 0x991   :  { %3095 = vmatprep.subr.bf16.mxu1 %v2785_v30  ;;  %3360 = vmatprep.subr.bf16.mxu0 %v2787_v18  ;;  %v2558_v30 = vrot.slane %v6486_v41, 1  ;;  %v2559_v18 = vrot.slane %v6446_v47, 1 }
 0x994   :  { %3096 = vmatpush1.bf16.msra.mxu1 %v2784_v0  ;;  %3361 = vmatpush1.bf16.msra.mxu0 %v2786_v24  ;;  %v2808_v0 = vld [vmem:[#allocation7 + $0x400] sm:$0xff]  ;;  %v2813_v24 = vld [vmem:[#allocation7 + $0x428] sm:$0xff] }
 0x995   :  { %3097 = vmatprep.subr.bf16.mxu1 %v2789_v50  ;;  %3362 = vmatprep.subr.bf16.mxu0 %v2791_v28  ;;  %v2815_v50 = vld [vmem:[#allocation7 + $0x438] sm:$0xff]  ;;  %v2673_v28 = vpack.c.bf16 %v2567_v43, %v2563_v21  ;;  %v2832_v21 = vld [vmem:[#allocation7 + $0x4c0] sm:$0xff]  ;;  %v2834_v43 = vld [vmem:[#allocation7 + $0x4d0] sm:$0xff] }
 0x998   :  { %3098 = vmatpush1.bf16.msra.mxu1 %v2788_v26  ;;  %3363 = vmatpush1.bf16.msra.mxu0 %v2790_v39  ;;  %v2579_v26 = vrot.slane %v6420_v46, 2  ;;  %v2580_v39 = vrot.slane %v6382_v42, 2 }
 0x999   :  { %3099 = vmatprep.subr.bf16.mxu1 %v2793_v5  ;;  %3364 = vmatprep.subr.bf16.mxu0 %v2795_v32  ;;  %v2584_v5 = vrot.slane %v6432_v37, 2  ;;  %v2560_v32 = vsel %vm428_vm1, %v2558_v30, %v2559_v18  ;;  %v2837_v30 = vld [vmem:[#allocation7 + $0x4e8] sm:$0xff] }
 0x99c   :  { %3100 = vmatpush1.bf16.msra.mxu1 %v2792_v58  ;;  %3365 = vmatpush1.bf16.msra.mxu0 %v2794_v17  ;;  %v2565_v58 = vsel %vm428_vm1, %v2559_v18, %v2564_v2  ;;  %v2812_v17 = vld [vmem:[#allocation7 + $0x420] sm:$0xff]  ;;  %v2839_v18 = vld [vmem:[#allocation7 + $0x4f8] sm:$0xff] }
 0x99d   :  { %3101 = vmatprep.subr.bf16.mxu1 %v2797_v53  ;;  %3366 = vmatprep.subr.bf16.mxu0 %v2799_v6  ;;  %v2814_v53 = vld [vmem:[#allocation7 + $0x430] sm:$0xff]  ;;  %v2817_v6 = vld [vmem:[#allocation7 + $0x448] sm:$0xff]  ;;  %v2836_v2 = vld [vmem:[#allocation7 + $0x4e0] sm:$0xff] }
 0x9a0   :  { %3102 = vmatpush1.bf16.msra.mxu1 %v2796_v23  ;;  %3367 = vmatpush1.bf16.msra.mxu0 %v2798_v1  ;;  %v2819_v23 = vld [vmem:[#allocation7 + $0x458] sm:$0xff]  ;;  %v2672_v1 = vpack.c.bf16 %v2565_v58, %v2560_v32  ;;  %v2846_v32 = vld [vmem:[#allocation7 + $0x530] sm:$0xff]  ;;  %v2849_v58 = vld [vmem:[#allocation7 + $0x548] sm:$0xff] }
 0x9a1   :  { %3103 = vmatprep.subr.bf16.mxu1 %v2801_v48  ;;  %3368 = vmatprep.subr.bf16.mxu0 %v2803_v36  ;;  %v2581_v48 = vsel %vm439_vm2, %v2579_v26, %v2580_v39  ;;  %v2585_v36 = vsel %vm439_vm2, %v2580_v39, %v2584_v5  ;;  %v2845_v26 = vld [vmem:[#allocation7 + $0x528] sm:$0xff]  ;;  %v2847_v39 = vld [vmem:[#allocation7 + $0x538] sm:$0xff]  ;;  %v2844_v5 = vld [vmem:[#allocation7 + $0x520] sm:$0xff] }
 0x9a4   :  { %3104 = vmatpush1.bf16.msra.mxu1 %v2800_v10  ;;  %3369 = vmatpush1.bf16.msra.mxu0 %v2802_v57  ;;  %v2823_v10 = vld [vmem:[#allocation7 + $0x478] sm:$0xff]  ;;  %v2665_v57 = vpack.c.bf16 %v2585_v36, %v2581_v48  ;;  %v2852_v48 = vld [vmem:[#allocation7 + $0x560] sm:$0xff]  ;;  %v2854_v36 = vld [vmem:[#allocation7 + $0x570] sm:$0xff] }
 0x9a5   :  { %3105 = vmatprep.subr.bf16.mxu1 %v2805_v12  ;;  %3370 = vmatprep.subr.bf16.mxu0 %v2807_v33  ;;  %v2820_v12 = vld [vmem:[#allocation7 + $0x460] sm:$0xff]  ;;  %v2822_v33 = vld [vmem:[#allocation7 + $0x470] sm:$0xff] }
 0x9a8   :  { %3106 = vmatpush1.bf16.msra.mxu1 %v2804_v20  ;;  %3371 = vmatpush1.bf16.msra.mxu0 %v2806_v27  ;;  %v2831_v20 = vld [vmem:[#allocation7 + $0x4b8] sm:$0xff]  ;;  %v2828_v27 = vld [vmem:[#allocation7 + $0x4a0] sm:$0xff] }
 0x9a9   :  { %3128 = vmatprep.subr.bf16.mxu1 %v2809_v3  ;;  %3393 = vmatprep.subr.bf16.mxu0 %v2811_v7  ;;  %v2830_v3 = vld [vmem:[#allocation7 + $0x4b0] sm:$0xff]  ;;  %v2833_v7 = vld [vmem:[#allocation7 + $0x4c8] sm:$0xff] }
 0x9ab   :  { %3108 = vmatmul.mubr.bf16.vlgmr.msra.gmra.mrb[16].mxu1 %v2662_v51  ;;  %3373 = vmatmul.mubr.bf16.vlgmr.msra.gmra.mrb[36].mxu0 %v2662_v51  ;;  %v2835_v51 = vld [vmem:[#allocation7 + $0x4d8] sm:$0xff] }
 0x9ac   :  { %3129 = vmatpush1.bf16.msra.mxu1 %v2808_v0  ;;  %3394 = vmatpush1.bf16.msra.mxu0 %v2810_v63  ;;  %v2838_v0 = vld [vmem:[#allocation7 + $0x4f0] sm:$0xff]  ;;  %v2841_v63 = vld [vmem:[#allocation7 + $0x508] sm:$0xff] }
 0x9ad   :  { %3130 = vmatprep.subr.bf16.mxu1 %v2813_v24  ;;  %3395 = vmatprep.subr.bf16.mxu0 %v2815_v50  ;;  %v2843_v24 = vld [vmem:[#allocation7 + $0x518] sm:$0xff]  ;;  %v2840_v50 = vld [vmem:[#allocation7 + $0x500] sm:$0xff] }
 0x9ae   :  { %3117 = vmatprep.mubr.bf16.mxu1 %v2673_v28  ;;  %3382 = vmatprep.mubr.bf16.mxu0 %v2673_v28  ;;  %v2842_v28 = vld [vmem:[#allocation7 + $0x510] sm:$0xff] }
 0x9b0   :  { %3131 = vmatpush1.bf16.msra.mxu1 %v2812_v17  ;;  %3396 = vmatpush1.bf16.msra.mxu0 %v2814_v53  ;;  %v2851_v17 = vld [vmem:[#allocation7 + $0x558] sm:$0xff]  ;;  %v2848_v53 = vld [vmem:[#allocation7 + $0x540] sm:$0xff] }
 0x9b1   :  { %3132 = vmatprep.subr.bf16.mxu1 %v2817_v6  ;;  %3397 = vmatprep.subr.bf16.mxu0 %v2819_v23  ;;  %v2850_v6 = vld [vmem:[#allocation7 + $0x550] sm:$0xff]  ;;  %v2853_v23 = vld [vmem:[#allocation7 + $0x568] sm:$0xff] }
 0x9b3   :  { %3118 = vmatmul.mubr.bf16.gmra.mrb[20].mxu1 %v2672_v1  ;;  %3383 = vmatmul.mubr.bf16.gmra.mrb[40].mxu0 %v2672_v1  ;;  %v2855_v1 = vld [vmem:[#allocation7 + $0x578] sm:$0xff] }
 0x9b4   :  { %3133 = vmatpush1.bf16.msra.mxu1 %v2816_v45  ;;  %3398 = vmatpush1.bf16.msra.mxu0 %v2818_v55  ;;  %v2857_v45 = vld [vmem:[#allocation7 + $0x588] sm:$0xff]  ;;  %v2859_v55 = vld [vmem:[#allocation7 + $0x598] sm:$0xff] }
 0x9b5   :  { %3134 = vmatprep.subr.bf16.mxu1 %v2821_v31  ;;  %3399 = vmatprep.subr.bf16.mxu0 %v2823_v10  ;;  %v2856_v31 = vld [vmem:[#allocation7 + $0x580] sm:$0xff]  ;;  %v2858_v10 = vld [vmem:[#allocation7 + $0x590] sm:$0xff] }
 0x9b6   :  { %3160 = vmatprep.mubr.bf16.mxu1 %v2665_v57  ;;  %3425 = vmatprep.mubr.bf16.mxu0 %v2665_v57  ;;  %v2861_v57 = vld [vmem:[#allocation7 + $0x5a8] sm:$0xff] }
 0x9b8   :  { %3135 = vmatpush1.bf16.msra.mxu1 %v2820_v12  ;;  %3400 = vmatpush1.bf16.msra.mxu0 %v2822_v33  ;;  %v2863_v12 = vld [vmem:[#allocation7 + $0x5b8] sm:$0xff]  ;;  %v2860_v33 = vld [vmem:[#allocation7 + $0x5a0] sm:$0xff] }
 0x9b9   :  { %3136 = vmatprep.subr.bf16.mxu1 %v2825_v54  ;;  %3401 = vmatprep.subr.bf16.mxu0 %v2827_v8  ;;  %v2862_v54 = vld [vmem:[#allocation7 + $0x5b0] sm:$0xff]  ;;  %v2865_v8 = vld [vmem:[#allocation7 + $0x5c8] sm:$0xff] }
 0x9bc   :  { %3137 = vmatpush1.bf16.msra.mxu1 %v2824_v49  ;;  %3402 = vmatpush1.bf16.msra.mxu0 %v2826_v25  ;;  %v2867_v49 = vld [vmem:[#allocation7 + $0x5d8] sm:$0xff]  ;;  %v2576_v25 = vrot.slane %v6462_v35, 2 }
 0x9bd   :  { %3138 = vmatprep.subr.bf16.mxu1 %v2829_v29  ;;  %3403 = vmatprep.subr.bf16.mxu0 %v2831_v20  ;;  %v2577_v29 = vrot.slane %v6409_v34, 2  ;;  %v2582_v20 = vrot.slane %v6466_v40, 2 }
 0x9c0   :  { %3139 = vmatpush1.bf16.msra.mxu1 %v2828_v27  ;;  %3404 = vmatpush1.bf16.msra.mxu0 %v2830_v3  ;;  %v2864_v27 = vld [vmem:[#allocation7 + $0x5c0] sm:$0xff]  ;;  %v2866_v3 = vld [vmem:[#allocation7 + $0x5d0] sm:$0xff] }
 0x9c1   :  { %3140 = vmatprep.subr.bf16.mxu1 %v2833_v7  ;;  %3405 = vmatprep.subr.bf16.mxu0 %v2835_v51  ;;  %v2869_v7 = vld [vmem:[#allocation7 + $0x5e8] sm:$0xff]  ;;  %v2871_v51 = vld [vmem:[#allocation7 + $0x5f8] sm:$0xff] }
 0x9c4   :  { %3141 = vmatpush1.bf16.msra.mxu1 %v2832_v21  ;;  %3406 = vmatpush1.bf16.msra.mxu0 %v2834_v43  ;;  %v2589_v21 = vrot.slane %v6473_v19, 2  ;;  %v2590_v43 = vrot.slane %v6416_v38, 2 }
 0x9c5   :  { %3142 = vmatprep.subr.bf16.mxu1 %v2837_v30  ;;  %3407 = vmatprep.subr.bf16.mxu0 %v2839_v18  ;;  %v2594_v30 = vrot.slane %v6477_v61, 2  ;;  %v2578_v18 = vsel %vm439_vm2, %v2576_v25, %v2577_v29  ;;  %v2880_v25 = vld [vmem:[#allocation7 + $0x640] sm:$0xff] }
 0x9c8   :  { %3143 = vmatpush1.bf16.msra.mxu1 %v2836_v2  ;;  %3408 = vmatpush1.bf16.msra.mxu0 %v2838_v0  ;;  %v2583_v2 = vsel %vm439_vm2, %v2577_v29, %v2582_v20  ;;  %v2868_v0 = vld [vmem:[#allocation7 + $0x5e0] sm:$0xff]  ;;  %v2882_v29 = vld [vmem:[#allocation7 + $0x650] sm:$0xff]  ;;  %v2885_v20 = vld [vmem:[#allocation7 + $0x668] sm:$0xff] }
 0x9c9   :  { %3144 = vmatprep.subr.bf16.mxu1 %v2841_v63  ;;  %3409 = vmatprep.subr.bf16.mxu0 %v2843_v24  ;;  %v2870_v63 = vld [vmem:[#allocation7 + $0x5f0] sm:$0xff]  ;;  %v2873_v24 = vld [vmem:[#allocation7 + $0x608] sm:$0xff] }
 0x9cc   :  { %3145 = vmatpush1.bf16.msra.mxu1 %v2840_v50  ;;  %3410 = vmatpush1.bf16.msra.mxu0 %v2842_v28  ;;  %v2875_v50 = vld [vmem:[#allocation7 + $0x618] sm:$0xff]  ;;  %v2664_v28 = vpack.c.bf16 %v2583_v2, %v2578_v18  ;;  %v2890_v18 = vld [vmem:[#allocation7 + $0x690] sm:$0xff]  ;;  %v2893_v2 = vld [vmem:[#allocation7 + $0x6a8] sm:$0xff] }
 0x9cd   :  { %3146 = vmatprep.subr.bf16.mxu1 %v2845_v26  ;;  %3411 = vmatprep.subr.bf16.mxu0 %v2847_v39  ;;  %v2591_v26 = vsel %vm439_vm2, %v2589_v21, %v2590_v43  ;;  %v2595_v39 = vsel %vm439_vm2, %v2590_v43, %v2594_v30  ;;  %v2889_v21 = vld [vmem:[#allocation7 + $0x688] sm:$0xff]  ;;  %v2891_v43 = vld [vmem:[#allocation7 + $0x698] sm:$0xff]  ;;  %v2888_v30 = vld [vmem:[#allocation7 + $0x680] sm:$0xff] }
 0x9d0   :  { %3147 = vmatpush1.bf16.msra.mxu1 %v2844_v5  ;;  %3412 = vmatpush1.bf16.msra.mxu0 %v2846_v32  ;;  %v2586_v5 = vrot.slane %v6486_v41, 2  ;;  %v2587_v32 = vrot.slane %v6446_v47, 2 }
 0x9d1   :  { %3148 = vmatprep.subr.bf16.mxu1 %v2849_v58  ;;  %3413 = vmatprep.subr.bf16.mxu0 %v2851_v17  ;;  %v2592_v58 = vrot.slane %v6490_v62, 2  ;;  %v2872_v17 = vld [vmem:[#allocation7 + $0x600] sm:$0xff] }
 0x9d4   :  { %3149 = vmatpush1.bf16.msra.mxu1 %v2848_v53  ;;  %3414 = vmatpush1.bf16.msra.mxu0 %v2850_v6  ;;  %v2874_v53 = vld [vmem:[#allocation7 + $0x610] sm:$0xff]  ;;  %v2877_v6 = vld [vmem:[#allocation7 + $0x628] sm:$0xff] }
 0x9d5   :  { %3150 = vmatprep.subr.bf16.mxu1 %v2853_v23  ;;  %3415 = vmatprep.subr.bf16.mxu0 %v2855_v1  ;;  %v2879_v23 = vld [vmem:[#allocation7 + $0x638] sm:$0xff]  ;;  %v2675_v1 = vpack.c.bf16 %v2595_v39, %v2591_v26  ;;  %v2896_v26 = vld [vmem:[#allocation7 + $0x6c0] sm:$0xff]  ;;  %v2898_v39 = vld [vmem:[#allocation7 + $0x6d0] sm:$0xff] }
 0x9d8   :  { %3151 = vmatpush1.bf16.msra.mxu1 %v2852_v48  ;;  %3416 = vmatpush1.bf16.msra.mxu0 %v2854_v36  ;;  %v2607_v48 = vrot.slane %v6420_v46, 3  ;;  %v2608_v36 = vrot.slane %v6382_v42, 3 }
 0x9d9   :  { %3152 = vmatprep.subr.bf16.mxu1 %v2857_v45  ;;  %3417 = vmatprep.subr.bf16.mxu0 %v2859_v55  ;;  %v2612_v45 = vrot.slane %v6432_v37, 3  ;;  %v2588_v55 = vsel %vm439_vm2, %v2586_v5, %v2587_v32  ;;  %v2901_v5 = vld [vmem:[#allocation7 + $0x6e8] sm:$0xff] }
 0x9dc   :  { %3153 = vmatpush1.bf16.msra.mxu1 %v2856_v31  ;;  %3418 = vmatpush1.bf16.msra.mxu0 %v2858_v10  ;;  %v2593_v31 = vsel %vm439_vm2, %v2587_v32, %v2592_v58  ;;  %v2876_v10 = vld [vmem:[#allocation7 + $0x620] sm:$0xff]  ;;  %v2903_v32 = vld [vmem:[#allocation7 + $0x6f8] sm:$0xff] }
 0x9dd   :  { %3154 = vmatprep.subr.bf16.mxu1 %v2861_v57  ;;  %3419 = vmatprep.subr.bf16.mxu0 %v2863_v12  ;;  %v2878_v57 = vld [vmem:[#allocation7 + $0x630] sm:$0xff]  ;;  %v2881_v12 = vld [vmem:[#allocation7 + $0x648] sm:$0xff]  ;;  %v2900_v58 = vld [vmem:[#allocation7 + $0x6e0] sm:$0xff] }
 0x9e0   :  { %3155 = vmatpush1.bf16.msra.mxu1 %v2860_v33  ;;  %3420 = vmatpush1.bf16.msra.mxu0 %v2862_v54  ;;  %v2883_v33 = vld [vmem:[#allocation7 + $0x658] sm:$0xff]  ;;  %v2674_v54 = vpack.c.bf16 %v2593_v31, %v2588_v55  ;;  %v2910_v55 = vld [vmem:[#allocation7 + $0x730] sm:$0xff]  ;;  %v2913_v31 = vld [vmem:[#allocation7 + $0x748] sm:$0xff] }
 0x9e1   :  { %3156 = vmatprep.subr.bf16.mxu1 %v2865_v8  ;;  %3421 = vmatprep.subr.bf16.mxu0 %v2867_v49  ;;  %v2609_v8 = vsel %vm623_vm11, %v2607_v48, %v2608_v36  ;;  %v2613_v49 = vsel %vm623_vm11, %v2608_v36, %v2612_v45  ;;  %v2909_v48 = vld [vmem:[#allocation7 + $0x728] sm:$0xff]  ;;  %v2911_v36 = vld [vmem:[#allocation7 + $0x738] sm:$0xff]  ;;  %v2908_v45 = vld [vmem:[#allocation7 + $0x720] sm:$0xff] }
 0x9e4   :  { %3157 = vmatpush1.bf16.msra.mxu1 %v2864_v27  ;;  %3422 = vmatpush1.bf16.msra.mxu0 %v2866_v3  ;;  %v2887_v27 = vld [vmem:[#allocation7 + $0x678] sm:$0xff]  ;;  %v2667_v3 = vpack.c.bf16 %v2613_v49, %v2609_v8  ;;  %v2916_v8 = vld [vmem:[#allocation7 + $0x760] sm:$0xff]  ;;  %v2918_v49 = vld [vmem:[#allocation7 + $0x770] sm:$0xff] }
 0x9e5   :  { %3158 = vmatprep.subr.bf16.mxu1 %v2869_v7  ;;  %3423 = vmatprep.subr.bf16.mxu0 %v2871_v51  ;;  %v2884_v7 = vld [vmem:[#allocation7 + $0x660] sm:$0xff]  ;;  %v2886_v51 = vld [vmem:[#allocation7 + $0x670] sm:$0xff] }
 0x9e8   :  { %3159 = vmatpush1.bf16.msra.mxu1 %v2868_v0  ;;  %3424 = vmatpush1.bf16.msra.mxu0 %v2870_v63  ;;  %v2895_v0 = vld [vmem:[#allocation7 + $0x6b8] sm:$0xff]  ;;  %v2892_v63 = vld [vmem:[#allocation7 + $0x6a0] sm:$0xff] }
 0x9e9   :  { %3181 = vmatprep.subr.bf16.mxu1 %v2873_v24  ;;  %3446 = vmatprep.subr.bf16.mxu0 %v2875_v50  ;;  %v2894_v24 = vld [vmem:[#allocation7 + $0x6b0] sm:$0xff]  ;;  %v2897_v50 = vld [vmem:[#allocation7 + $0x6c8] sm:$0xff] }
 0x9eb   :  { %3161 = vmatmul.mubr.bf16.vlgmr.msra.gmra.mrb[16].mxu1 %v2664_v28  ;;  %3426 = vmatmul.mubr.bf16.vlgmr.msra.gmra.mrb[36].mxu0 %v2664_v28  ;;  %v2899_v28 = vld [vmem:[#allocation7 + $0x6d8] sm:$0xff] }
 0x9ec   :  { %3182 = vmatpush1.bf16.msra.mxu1 %v2872_v17  ;;  %3447 = vmatpush1.bf16.msra.mxu0 %v2874_v53  ;;  %v2902_v17 = vld [vmem:[#allocation7 + $0x6f0] sm:$0xff]  ;;  %v2905_v53 = vld [vmem:[#allocation7 + $0x708] sm:$0xff] }
 0x9ed   :  { %3183 = vmatprep.subr.bf16.mxu1 %v2877_v6  ;;  %3448 = vmatprep.subr.bf16.mxu0 %v2879_v23  ;;  %v2907_v6 = vld [vmem:[#allocation7 + $0x718] sm:$0xff]  ;;  %v2904_v23 = vld [vmem:[#allocation7 + $0x700] sm:$0xff] }
 0x9ee   :  { %3170 = vmatprep.mubr.bf16.mxu1 %v2675_v1  ;;  %3435 = vmatprep.mubr.bf16.mxu0 %v2675_v1  ;;  %v2906_v1 = vld [vmem:[#allocation7 + $0x710] sm:$0xff] }
 0x9f0   :  { %3184 = vmatpush1.bf16.msra.mxu1 %v2876_v10  ;;  %3449 = vmatpush1.bf16.msra.mxu0 %v2878_v57  ;;  %v2915_v10 = vld [vmem:[#allocation7 + $0x758] sm:$0xff]  ;;  %v2912_v57 = vld [vmem:[#allocation7 + $0x740] sm:$0xff] }
 0x9f1   :  { %3185 = vmatprep.subr.bf16.mxu1 %v2881_v12  ;;  %3450 = vmatprep.subr.bf16.mxu0 %v2883_v33  ;;  %v2914_v12 = vld [vmem:[#allocation7 + $0x750] sm:$0xff]  ;;  %v2917_v33 = vld [vmem:[#allocation7 + $0x768] sm:$0xff] }
 0x9f3   :  { %3171 = vmatmul.mubr.bf16.gmra.mrb[20].mxu1 %v2674_v54  ;;  %3436 = vmatmul.mubr.bf16.gmra.mrb[40].mxu0 %v2674_v54  ;;  %v2919_v54 = vld [vmem:[#allocation7 + $0x778] sm:$0xff] }
 0x9f4   :  { %3186 = vmatpush1.bf16.msra.mxu1 %v2880_v25  ;;  %3451 = vmatpush1.bf16.msra.mxu0 %v2882_v29  ;;  %v2921_v25 = vld [vmem:[#allocation7 + $0x788] sm:$0xff]  ;;  %v2923_v29 = vld [vmem:[#allocation7 + $0x798] sm:$0xff] }
 0x9f5   :  { %3187 = vmatprep.subr.bf16.mxu1 %v2885_v20  ;;  %3452 = vmatprep.subr.bf16.mxu0 %v2887_v27  ;;  %v2920_v20 = vld [vmem:[#allocation7 + $0x780] sm:$0xff]  ;;  %v2922_v27 = vld [vmem:[#allocation7 + $0x790] sm:$0xff] }
 0x9f6   :  { %3213 = vmatprep.mubr.bf16.mxu1 %v2667_v3  ;;  %3478 = vmatprep.mubr.bf16.mxu0 %v2667_v3  ;;  %v2925_v3 = vld [vmem:[#allocation7 + $0x7a8] sm:$0xff] }
 0x9f8   :  { %3188 = vmatpush1.bf16.msra.mxu1 %v2884_v7  ;;  %3453 = vmatpush1.bf16.msra.mxu0 %v2886_v51  ;;  %v2927_v7 = vld [vmem:[#allocation7 + $0x7b8] sm:$0xff]  ;;  %v2924_v51 = vld [vmem:[#allocation7 + $0x7a0] sm:$0xff] }
 0x9f9   :  { %3189 = vmatprep.subr.bf16.mxu1 %v2889_v21  ;;  %3454 = vmatprep.subr.bf16.mxu0 %v2891_v43  ;;  %v2926_v21 = vld [vmem:[#allocation7 + $0x7b0] sm:$0xff]  ;;  %v2929_v43 = vld [vmem:[#allocation7 + $0x7c8] sm:$0xff] }
 0x9fc   :  { %3190 = vmatpush1.bf16.msra.mxu1 %v2888_v30  ;;  %3455 = vmatpush1.bf16.msra.mxu0 %v2890_v18  ;;  %v2931_v30 = vld [vmem:[#allocation7 + $0x7d8] sm:$0xff]  ;;  %v2604_v18 = vrot.slane %v6462_v35, 3 }
 0x9fd   :  { %3191 = vmatprep.subr.bf16.mxu1 %v2893_v2  ;;  %3456 = vmatprep.subr.bf16.mxu0 %v2895_v0  ;;  %v2605_v2 = vrot.slane %v6409_v34, 3  ;;  %v2610_v0 = vrot.slane %v6466_v40, 3 }
 0xa00   :  { %3192 = vmatpush1.bf16.msra.mxu1 %v2892_v63  ;;  %3457 = vmatpush1.bf16.msra.mxu0 %v2894_v24  ;;  %v2928_v63 = vld [vmem:[#allocation7 + $0x7c0] sm:$0xff]  ;;  %v2930_v24 = vld [vmem:[#allocation7 + $0x7d0] sm:$0xff] }
 0xa01   :  { %3193 = vmatprep.subr.bf16.mxu1 %v2897_v50  ;;  %3458 = vmatprep.subr.bf16.mxu0 %v2899_v28  ;;  %v2933_v50 = vld [vmem:[#allocation7 + $0x7e8] sm:$0xff]  ;;  %v2935_v28 = vld [vmem:[#allocation7 + $0x7f8] sm:$0xff] }
 0xa04   :  { %3194 = vmatpush1.bf16.msra.mxu1 %v2896_v26  ;;  %3459 = vmatpush1.bf16.msra.mxu0 %v2898_v39  ;;  %v2617_v26 = vrot.slane %v6473_v19, 3  ;;  %v2618_v39 = vrot.slane %v6416_v38, 3 }
 0xa05   :  { %3195 = vmatprep.subr.bf16.mxu1 %v2901_v5  ;;  %3460 = vmatprep.subr.bf16.mxu0 %v2903_v32  ;;  %v2622_v5 = vrot.slane %v6477_v61, 3  ;;  %v2606_v32 = vsel %vm623_vm11, %v2604_v18, %v2605_v2  ;;  %v2951_v18 = vld [vmem:[#allocation7 + $0x878] sm:$0xff] }
 0xa08   :  { %3196 = vmatpush1.bf16.msra.mxu1 %v2900_v58  ;;  %3461 = vmatpush1.bf16.msra.mxu0 %v2902_v17  ;;  %v2611_v58 = vsel %vm623_vm11, %v2605_v2, %v2610_v0  ;;  %v2932_v17 = vld [vmem:[#allocation7 + $0x7e0] sm:$0xff] }
 0xa09   :  { %3197 = vmatprep.subr.bf16.mxu1 %v2905_v53  ;;  %3462 = vmatprep.subr.bf16.mxu0 %v2907_v6  ;;  %v2934_v53 = vld [vmem:[#allocation7 + $0x7f0] sm:$0xff]  ;;  %v2937_v6 = vld [vmem:[#allocation7 + $0x808] sm:$0xff]  ;;  %v2948_v0 = vld [vmem:[#allocation7 + $0x860] sm:$0xff] }
 0xa0c   :  { %3198 = vmatpush1.bf16.msra.mxu1 %v2904_v23  ;;  %3463 = vmatpush1.bf16.msra.mxu0 %v2906_v1  ;;  %v2939_v23 = vld [vmem:[#allocation7 + $0x818] sm:$0xff]  ;;  %v2666_v1 = vpack.c.bf16 %v2611_v58, %v2606_v32  ;;  %v2956_v32 = vld [vmem:[#allocation7 + $0x8a0] sm:$0xff]  ;;  %v2958_v58 = vld [vmem:[#allocation7 + $0x8b0] sm:$0xff] }
 0xa0d   :  { %3199 = vmatprep.subr.bf16.mxu1 %v2909_v48  ;;  %3464 = vmatprep.subr.bf16.mxu0 %v2911_v36  ;;  %v2619_v48 = vsel %vm623_vm11, %v2617_v26, %v2618_v39  ;;  %v2623_v36 = vsel %vm623_vm11, %v2618_v39, %v2622_v5  ;;  %v2954_v26 = vld [vmem:[#allocation7 + $0x890] sm:$0xff]  ;;  %v2957_v39 = vld [vmem:[#allocation7 + $0x8a8] sm:$0xff]  ;;  %v2959_v5 = vld [vmem:[#allocation7 + $0x8b8] sm:$0xff] }
 0xa10   :  { %3200 = vmatpush1.bf16.msra.mxu1 %v2908_v45  ;;  %3465 = vmatpush1.bf16.msra.mxu0 %v2910_v55  ;;  %v2614_v45 = vrot.slane %v6486_v41, 3  ;;  %v2615_v55 = vrot.slane %v6446_v47, 3 }
 0xa11   :  { %3201 = vmatprep.subr.bf16.mxu1 %v2913_v31  ;;  %3466 = vmatprep.subr.bf16.mxu0 %v2915_v10  ;;  %v2620_v31 = vrot.slane %v6490_v62, 3  ;;  %v2936_v10 = vld [vmem:[#allocation7 + $0x800] sm:$0xff] }
 0xa14   :  { %3202 = vmatpush1.bf16.msra.mxu1 %v2912_v57  ;;  %3467 = vmatpush1.bf16.msra.mxu0 %v2914_v12  ;;  %v2938_v57 = vld [vmem:[#allocation7 + $0x810] sm:$0xff]  ;;  %v2941_v12 = vld [vmem:[#allocation7 + $0x828] sm:$0xff] }
 0xa15   :  { %3203 = vmatprep.subr.bf16.mxu1 %v2917_v33  ;;  %3468 = vmatprep.subr.bf16.mxu0 %v2919_v54  ;;  %v2943_v33 = vld [vmem:[#allocation7 + $0x838] sm:$0xff]  ;;  %v2677_v54 = vpack.c.bf16 %v2623_v36, %v2619_v48  ;;  %v2964_v36 = vld [vmem:[#allocation7 + $0x8e0] sm:$0xff] }
 0xa16   :  { %v2967_v48 = vld [vmem:[#allocation7 + $0x8f8] sm:$0xff] }
 0xa18   :  { %3204 = vmatpush1.bf16.msra.mxu1 %v2916_v8  ;;  %3469 = vmatpush1.bf16.msra.mxu0 %v2918_v49  ;;  %v2635_v8 = vrot.slane %v6420_v46, 4  ;;  %v2636_v49 = vrot.slane %v6382_v42, 4 }
 0xa19   :  { %3205 = vmatprep.subr.bf16.mxu1 %v2921_v25  ;;  %3470 = vmatprep.subr.bf16.mxu0 %v2923_v29  ;;  %v2640_v25 = vrot.slane %v6432_v37, 4  ;;  %v2616_v29 = vsel %vm623_vm11, %v2614_v45, %v2615_v55  ;;  %v2944_v37 = vld [vmem:[#allocation7 + $0x840] sm:$0xff]  ;;  %v2966_v45 = vld [vmem:[#allocation7 + $0x8f0] sm:$0xff] }
 0xa1a   :  { %v2637_v46 = vsel %vm638_vm12, %v2635_v8, %v2636_v49  ;;  %v2974_v8 = vld [vmem:[#allocation7 + $0x930] sm:$0xff] }
 0xa1b   :  { %v2641_v42 = vsel %vm638_vm12, %v2636_v49, %v2640_v25  ;;  %v2977_v49 = vld [vmem:[#allocation7 + $0x948] sm:$0xff]  ;;  %v2979_v25 = vld [vmem:[#allocation7 + $0x958] sm:$0xff] }
 0xa1c   :  { %3206 = vmatpush1.bf16.msra.mxu1 %v2920_v20  ;;  %3471 = vmatpush1.bf16.msra.mxu0 %v2922_v27  ;;  %v2621_v20 = vsel %vm623_vm11, %v2615_v55, %v2620_v31  ;;  %v2940_v27 = vld [vmem:[#allocation7 + $0x820] sm:$0xff]  ;;  %v2669_v2 = vpack.c.bf16 %v2641_v42, %v2637_v46  ;;  %v2969_v55 = vld [vmem:[#allocation7 + $0x908] sm:$0xff]  ;;  %v2971_v31 = vld [vmem:[#allocation7 + $0x918] sm:$0xff] }
 0xa1d   :  { %3207 = vmatprep.subr.bf16.mxu1 %v2925_v3  ;;  %3472 = vmatprep.subr.bf16.mxu0 %v2927_v7  ;;  %v2942_v3 = vld [vmem:[#allocation7 + $0x830] sm:$0xff]  ;;  %v2945_v7 = vld [vmem:[#allocation7 + $0x848] sm:$0xff]  ;;  %v2987_v46 = vld [vmem:[#allocation7 + $0x998] sm:$0xff] }
 0xa1e   :  { %v2984_v42 = vld [vmem:[#allocation7 + $0x980] sm:$0xff] }
 0xa20   :  { %3208 = vmatpush1.bf16.msra.mxu1 %v2924_v51  ;;  %3473 = vmatpush1.bf16.msra.mxu0 %v2926_v21  ;;  %v2947_v51 = vld [vmem:[#allocation7 + $0x858] sm:$0xff]  ;;  %v2676_v21 = vpack.c.bf16 %v2621_v20, %v2616_v29  ;;  %v2976_v29 = vld [vmem:[#allocation7 + $0x940] sm:$0xff]  ;;  %v2978_v20 = vld [vmem:[#allocation7 + $0x950] sm:$0xff] }
 0xa21   :  { %3209 = vmatprep.subr.bf16.mxu1 %v2929_v43  ;;  %3474 = vmatprep.subr.bf16.mxu0 %v2931_v30  ;;  %v2946_v43 = vld [vmem:[#allocation7 + $0x850] sm:$0xff]  ;;  %v2949_v30 = vld [vmem:[#allocation7 + $0x868] sm:$0xff] }
 0xa24   :  { %3210 = vmatpush1.bf16.msra.mxu1 %v2928_v63  ;;  %3475 = vmatpush1.bf16.msra.mxu0 %v2930_v24  ;;  %v2950_v63 = vld [vmem:[#allocation7 + $0x870] sm:$0xff]  ;;  %v2953_v24 = vld [vmem:[#allocation7 + $0x888] sm:$0xff] }
 0xa25   :  { %3211 = vmatprep.subr.bf16.mxu1 %v2933_v50  ;;  %3476 = vmatprep.subr.bf16.mxu0 %v2935_v28  ;;  %v2955_v50 = vld [vmem:[#allocation7 + $0x898] sm:$0xff]  ;;  %v2952_v28 = vld [vmem:[#allocation7 + $0x880] sm:$0xff] }
 0xa28   :  { %3212 = vmatpush1.bf16.msra.mxu1 %v2932_v17  ;;  %3477 = vmatpush1.bf16.msra.mxu0 %v2934_v53  ;;  %v2961_v17 = vld [vmem:[#allocation7 + $0x8c8] sm:$0xff]  ;;  %v2963_v53 = vld [vmem:[#allocation7 + $0x8d8] sm:$0xff] }
 0xa29   :  { %3234 = vmatprep.subr.bf16.mxu1 %v2937_v6  ;;  %3499 = vmatprep.subr.bf16.mxu0 %v2939_v23  ;;  %v2960_v6 = vld [vmem:[#allocation7 + $0x8c0] sm:$0xff]  ;;  %v2962_v23 = vld [vmem:[#allocation7 + $0x8d0] sm:$0xff] }
 0xa2b   :  { %3214 = vmatmul.mubr.bf16.vlgmr.msra.gmra.mrb[16].mxu1 %v2666_v1  ;;  %3479 = vmatmul.mubr.bf16.vlgmr.msra.gmra.mrb[36].mxu0 %v2666_v1  ;;  %v2965_v1 = vld [vmem:[#allocation7 + $0x8e8] sm:$0xff] }
 0xa2c   :  { %3235 = vmatpush1.bf16.msra.mxu1 %v2936_v10  ;;  %3500 = vmatpush1.bf16.msra.mxu0 %v2938_v57  ;;  %v2968_v10 = vld [vmem:[#allocation7 + $0x900] sm:$0xff]  ;;  %v2970_v57 = vld [vmem:[#allocation7 + $0x910] sm:$0xff] }
 0xa2d   :  { %3236 = vmatprep.subr.bf16.mxu1 %v2941_v12  ;;  %3501 = vmatprep.subr.bf16.mxu0 %v2943_v33  ;;  %v2973_v12 = vld [vmem:[#allocation7 + $0x928] sm:$0xff]  ;;  %v2975_v33 = vld [vmem:[#allocation7 + $0x938] sm:$0xff] }
 0xa2e   :  { %3223 = vmatprep.mubr.bf16.mxu1 %v2677_v54  ;;  %3488 = vmatprep.mubr.bf16.mxu0 %v2677_v54  ;;  %v2972_v54 = vld [vmem:[#allocation7 + $0x920] sm:$0xff] }
 0xa30   :  { %3237 = vmatpush1.bf16.msra.mxu1 %v2940_v27  ;;  %3502 = vmatpush1.bf16.msra.mxu0 %v2942_v3  ;;  %v2981_v27 = vld [vmem:[#allocation7 + $0x968] sm:$0xff]  ;;  %v2983_v3 = vld [vmem:[#allocation7 + $0x978] sm:$0xff] }
 0xa31   :  { %3238 = vmatprep.subr.bf16.mxu1 %v2945_v7  ;;  %3503 = vmatprep.subr.bf16.mxu0 %v2947_v51  ;;  %v2980_v7 = vld [vmem:[#allocation7 + $0x960] sm:$0xff]  ;;  %v2982_v51 = vld [vmem:[#allocation7 + $0x970] sm:$0xff] }
 0xa33   :  { %3224 = vmatmul.mubr.bf16.gmra.mrb[20].mxu1 %v2676_v21  ;;  %3489 = vmatmul.mubr.bf16.gmra.mrb[40].mxu0 %v2676_v21  ;;  %v2985_v21 = vld [vmem:[#allocation7 + $0x988] sm:$0xff] }
 0xa34   :  { %3239 = vmatpush1.bf16.msra.mxu1 %v2944_v37  ;;  %3504 = vmatpush1.bf16.msra.mxu0 %v2946_v43  ;;  %v2986_v37 = vld [vmem:[#allocation7 + $0x990] sm:$0xff]  ;;  %v2989_v43 = vld [vmem:[#allocation7 + $0x9a8] sm:$0xff] }
 0xa35   :  { %3240 = vmatprep.subr.bf16.mxu1 %v2949_v30  ;;  %3505 = vmatprep.subr.bf16.mxu0 %v2951_v18  ;;  %v2991_v30 = vld [vmem:[#allocation7 + $0x9b8] sm:$0xff]  ;;  %v2988_v18 = vld [vmem:[#allocation7 + $0x9a0] sm:$0xff] }
 0xa36   :  { %3266 = vmatprep.mubr.bf16.mxu1 %v2669_v2  ;;  %3531 = vmatprep.mubr.bf16.mxu0 %v2669_v2  ;;  %v2990_v2 = vld [vmem:[#allocation7 + $0x9b0] sm:$0xff] }
 0xa38   :  { %3241 = vmatpush1.bf16.msra.mxu1 %v2948_v0  ;;  %3506 = vmatpush1.bf16.msra.mxu0 %v2950_v63  ;;  %v2993_v0 = vld [vmem:[#allocation7 + $0x9c8] sm:$0xff]  ;;  %v2995_v63 = vld [vmem:[#allocation7 + $0x9d8] sm:$0xff] }
 0xa39   :  { %3242 = vmatprep.subr.bf16.mxu1 %v2953_v24  ;;  %3507 = vmatprep.subr.bf16.mxu0 %v2955_v50  ;;  %v2632_v24 = vrot.slane %v6462_v35, 4  ;;  %v2633_v50 = vrot.slane %v6409_v34, 4 }
 0xa3b   :  { %v2634_v35 = vsel %vm638_vm12, %v2632_v24, %v2633_v50 }
 0xa3c   :  { %3243 = vmatpush1.bf16.msra.mxu1 %v2952_v28  ;;  %3508 = vmatpush1.bf16.msra.mxu0 %v2954_v26  ;;  %v2638_v28 = vrot.slane %v6466_v40, 4  ;;  %v2992_v26 = vld [vmem:[#allocation7 + $0x9c0] sm:$0xff] }
 0xa3d   :  { %3244 = vmatprep.subr.bf16.mxu1 %v2957_v39  ;;  %3509 = vmatprep.subr.bf16.mxu0 %v2959_v5  ;;  %v2994_v39 = vld [vmem:[#allocation7 + $0x9d0] sm:$0xff]  ;;  %v2645_v5 = vrot.slane %v6473_v19, 4  ;;  %v2996_v40 = vld [vmem:[#allocation7 + $0x9e0] sm:$0xff] }
 0xa3e   :  { %v2639_v34 = vsel %vm638_vm12, %v2633_v50, %v2638_v28 }
 0xa40   :  { %3245 = vmatpush1.bf16.msra.mxu1 %v2956_v32  ;;  %3510 = vmatpush1.bf16.msra.mxu0 %v2958_v58  ;;  %v2646_v32 = vrot.slane %v6416_v38, 4  ;;  %v2650_v58 = vrot.slane %v6477_v61, 4  ;;  %v2642_v61 = vrot.slane %v6486_v41, 4 }
 0xa41   :  { %3246 = vmatprep.subr.bf16.mxu1 %v2961_v17  ;;  %3511 = vmatprep.subr.bf16.mxu0 %v2963_v53  ;;  %v2997_v17 = vld [vmem:[#allocation7 + $0x9e8] sm:$0xff]  ;;  %v2999_v53 = vld [vmem:[#allocation7 + $0x9f8] sm:$0xff] }
 0xa42   :  { %v2651_v19 = vsel %vm638_vm12, %v2646_v32, %v2650_v58 }
 0xa44   :  { %3247 = vmatpush1.bf16.msra.mxu1 %v2960_v6  ;;  %3512 = vmatpush1.bf16.msra.mxu0 %v2962_v23  ;;  %v2998_v6 = vld [vmem:[#allocation7 + $0x9f0] sm:$0xff]  ;;  %v2647_v23 = vsel %vm638_vm12, %v2645_v5, %v2646_v32 }
 0xa45   :  { %3248 = vmatprep.subr.bf16.mxu1 %v2965_v1  ;;  %3513 = vmatprep.subr.bf16.mxu0 %v2967_v48  ;;  %v2668_v1 = vpack.c.bf16 %v2639_v34, %v2634_v35  ;;  %v2679_v38 = vpack.c.bf16 %v2651_v19, %v2647_v23  ;;  %v2643_v48 = vrot.slane %v6446_v47, 4 }
 0xa48   :  { %3249 = vmatpush1.bf16.msra.mxu1 %v2964_v36  ;;  %3514 = vmatpush1.bf16.msra.mxu0 %v2966_v45  ;;  %v2648_v36 = vrot.slane %v6490_v62, 4  ;;  %v2644_v45 = vsel %vm638_vm12, %v2642_v61, %v2643_v48 }
 0xa49   :  { %3250 = vmatprep.subr.bf16.mxu1 %v2969_v55  ;;  %3515 = vmatprep.subr.bf16.mxu0 %v2971_v31 }
 0xa4a   :  { %v2649_v55 = vsel %vm638_vm12, %v2643_v48, %v2648_v36 }
 0xa4b   :  { %v2678_v31 = vpack.c.bf16 %v2649_v55, %v2644_v45 }
 0xa4c   :  { %3251 = vmatpush1.bf16.msra.mxu1 %v2968_v10  ;;  %3516 = vmatpush1.bf16.msra.mxu0 %v2970_v57  ;;  %v3000_v10 = vld [vmem:[#allocation25] sm:$0xf] }
 0xa4d   :  { %3252 = vmatprep.subr.bf16.mxu1 %v2973_v12  ;;  %3517 = vmatprep.subr.bf16.mxu0 %v2975_v33  ;;  %v3005_v57 = vrot.slane %v3000_v10, %v5936_v60  ;;  %v3013_v41 = vrot.slane %v3000_v10, %v1438_v22  ;;  %v3009_v47 = vrot.slane %v3000_v10, %v5939_v56 }
 0xa4e   :  { %v3017_v62 = vrot.slane %v3000_v10, %v1442_v4 }
 0xa50   :  { %3253 = vmatpush1.bf16.msra.mxu1 %v2972_v54  ;;  %3518 = vmatpush1.bf16.msra.mxu0 %v2974_v8 }
 0xa51   :  { %3254 = vmatprep.subr.bf16.mxu1 %v2977_v49  ;;  %3519 = vmatprep.subr.bf16.mxu0 %v2979_v25 }
 0xa54   :  { %3255 = vmatpush1.bf16.msra.mxu1 %v2976_v29  ;;  %3520 = vmatpush1.bf16.msra.mxu0 %v2978_v20 }
 0xa55   :  { %3256 = vmatprep.subr.bf16.mxu1 %v2981_v27  ;;  %3521 = vmatprep.subr.bf16.mxu0 %v2983_v3 }
 0xa58   :  { %3257 = vmatpush1.bf16.msra.mxu1 %v2980_v7  ;;  %3522 = vmatpush1.bf16.msra.mxu0 %v2982_v51 }
 0xa59   :  { %3258 = vmatprep.subr.bf16.mxu1 %v2985_v21  ;;  %3523 = vmatprep.subr.bf16.mxu0 %v2987_v46 }
 0xa5c   :  { %3259 = vmatpush1.bf16.msra.mxu1 %v2984_v42  ;;  %3524 = vmatpush1.bf16.msra.mxu0 %v2986_v37 }
 0xa5d   :  { %3260 = vmatprep.subr.bf16.mxu1 %v2989_v43  ;;  %3525 = vmatprep.subr.bf16.mxu0 %v2991_v30 }
 0xa60   :  { %3261 = vmatpush1.bf16.msra.mxu1 %v2988_v18  ;;  %3526 = vmatpush1.bf16.msra.mxu0 %v2990_v2 }
 0xa61   :  { %3262 = vmatprep.subr.bf16.mxu1 %v2993_v0  ;;  %3527 = vmatprep.subr.bf16.mxu0 %v2995_v63 }
 0xa64   :  { %3263 = vmatpush1.bf16.msra.mxu1 %v2992_v26  ;;  %3528 = vmatpush1.bf16.msra.mxu0 %v2994_v39 }
 0xa65   :  { %3264 = vmatprep.subr.bf16.mxu1 %v2997_v17  ;;  %3529 = vmatprep.subr.bf16.mxu0 %v2999_v53 }
 0xa68   :  { %3265 = vmatpush1.bf16.msra.mxu1 %v2996_v40  ;;  %3530 = vmatpush1.bf16.msra.mxu0 %v2998_v6 }
 0xa6b   :  { %3267 = vmatmul.mubr.bf16.vlgmr.msra.gmra.mrb[16].mxu1 %v2668_v1  ;;  %3532 = vmatmul.mubr.bf16.vlgmr.msra.gmra.mrb[36].mxu0 %v2668_v1 }
 0xa6c   :  { %3276 = vmatprep.mubr.bf16.mxu1 %v2679_v38  ;;  %3541 = vmatprep.mubr.bf16.mxu0 %v2679_v38 }
 0xa73   :  { %3277 = vmatmul.mubr.bf16.gmra.mrb[20].mxu1 %v2678_v31  ;;  %3542 = vmatmul.mubr.bf16.gmra.mrb[40].mxu0 %v2678_v31 }
 0xb3e   :  { %v3268_v12 = vpop.f32.mrb[16].mxu1  ;;  %v3533_v33 = vpop.f32.mrb[36].mxu0 }
 0xb3f   :  { %v6565_v54 = vadd.f32 %v3268_v12, %v3005_v57  ;;  %v6567_v8 = vadd.f32 %v3533_v33, %v3013_v41  ;;  %v3270_v49 = vpop.f32.mrb[17].mxu1  ;;  %v3535_v25 = vpop.f32.mrb[37].mxu0 }
 0xb40   :  { %v4639_v29 = vadd.f32 %v3270_v49, %v3009_v47  ;;  %v6569_v20 = vadd.f32 %v3535_v25, %v3017_v62  ;;  %v3272_v60 = vpop.f32.mrb[18].mxu1  ;;  %v3537_v27 = vpop.f32.mrb[38].mxu0 }
 0xb41   :  { %v3552_v22 = vmax.f32 %v6565_v54, 0.0  ;;  %v3554_v56 = vmax.f32 %v6567_v8, 0.0  ;;  %v6573_v3 = vadd.f32 %v3272_v60, %v3005_v57  ;;  %v6575_v59 = vadd.f32 %v3537_v27, %v3013_v41  ;;  %v3274_v4 = vpop.f32.mrb[19].mxu1  ;;  %v3539_v7 = vpop.f32.mrb[39].mxu0 }
 0xb42   :  { %v3553_v51 = vmax.f32 %v4639_v29, 0.0  ;;  %v3555_v21 = vmax.f32 %v6569_v20, 0.0  ;;  %v4641_v46 = vadd.f32 %v3274_v4, %v3009_v47  ;;  %v6578_v42 = vadd.f32 %v3539_v7, %v3017_v62 }
 0xb43   :  { %v3556_v37 = vmax.f32 %v6573_v3, 0.0  ;;  %v3558_v43 = vmax.f32 %v6575_v59, 0.0 }
 0xb44   :  { %v3557_v30 = vmax.f32 %v4641_v46, 0.0  ;;  %v3559_v18 = vmax.f32 %v6578_v42, 0.0 }
 0xb46   :  { %v3278_v2 = vpop.f32.mrb[20].mxu1  ;;  %v3543_v0 = vpop.f32.mrb[40].mxu0 }
 0xb47   :  { %v6583_v63 = vadd.f32 %v3278_v2, %v3005_v57  ;;  %v6585_v24 = vadd.f32 %v3543_v0, %v3013_v41  ;;  %v3280_v50 = vpop.f32.mrb[21].mxu1  ;;  %v3545_v28 = vpop.f32.mrb[41].mxu0 }
 0xb48   :  { %v4643_v26 = vadd.f32 %v3280_v50, %v3009_v47  ;;  %v6587_v39 = vadd.f32 %v3545_v28, %v3017_v62  ;;  %v3282_v5 = vpop.f32.mrb[22].mxu1  ;;  %v3547_v32 = vpop.f32.mrb[42].mxu0 }
 0xb49   :  { %v3560_v58 = vmax.f32 %v6583_v63, 0.0  ;;  %v3562_v17 = vmax.f32 %v6585_v24, 0.0  ;;  %v4644_v53 = vadd.f32 %v3282_v5, %v3005_v57  ;;  %v6591_v35 = vadd.f32 %v3547_v32, %v3013_v41  ;;  %v3284_v34 = vpop.f32.mrb[23].mxu1  ;;  %v3549_v40 = vpop.f32.mrb[43].mxu0 }
 0xb4a   :  { %v3561_v6 = vmax.f32 %v4643_v26, 0.0  ;;  %v3563_v23 = vmax.f32 %v6587_v39, 0.0  ;;  %v4645_v19 = vadd.f32 %v3284_v34, %v3009_v47  ;;  %v6594_v1 = vadd.f32 %v3549_v40, %v3017_v62 }
 0xb4b   :  { %v3564_v38 = vmax.f32 %v4644_v53, 0.0  ;;  %v3566_v61 = vmax.f32 %v6591_v35, 0.0 }
 0xb4c   :  { %v3565_v48 = vmax.f32 %v4645_v19, 0.0  ;;  %v3567_v36 = vmax.f32 %v6594_v1, 0.0 }
 0xb4d   :  { %5297 = dma.done.wait [#allocation12 + $0x6], 4096 }
 0xb4e   :  { %5298 = vsyncadd [#allocation12 + $0x6], 4294963200  ;;  %v3571_v45 = vpack.c.bf16 %v3557_v30, %v3553_v51  ;;  %v3586_v55 = vld [vmem:[#allocation8 + $0x40] sm:$0xff]  ;;  %v3587_v10 = vld [vmem:[#allocation8 + $0x48] sm:$0xff]  ;;  %v3570_v46 = vpack.c.bf16 %v3556_v37, %v3552_v22  ;;  %v3575_v30 = vpack.c.bf16 %v3565_v48, %v3561_v6  ;;  %v3574_v28 = vpack.c.bf16 %v3564_v38, %v3560_v58 }
 0xb4f   :  { %v3578_v31 = vld [vmem:[#allocation8] sm:$0xff]  ;;  %4395 = vmatprep.subr.bf16.mxu1 %v3586_v55  ;;  %v3579_v57 = vld [vmem:[#allocation8 + $0x8] sm:$0xff]  ;;  %v3588_v41 = vld [vmem:[#allocation8 + $0x50] sm:$0xff]  ;;  %v3573_v54 = vpack.c.bf16 %v3559_v18, %v3555_v21  ;;  %v3572_v53 = vpack.c.bf16 %v3558_v43, %v3554_v56  ;;  %v3577_v34 = vpack.c.bf16 %v3567_v36, %v3563_v23  ;;  %v3576_v40 = vpack.c.bf16 %v3566_v61, %v3562_v17 }
 0xb50   :  { %3649 = vmatprep.mubr.bf16.mxu1 %v3571_v45  ;;  %4396 = vmatpush3.bf16.msra.mxu1 %v3578_v31  ;;  %v3580_v47 = vld [vmem:[#allocation8 + $0x10] sm:$0xff]  ;;  %v3589_v62 = vld [vmem:[#allocation8 + $0x58] sm:$0xff]  ;;  %v3590_v33 = vld [vmem:[#allocation8 + $0x60] sm:$0xff] }
 0xb51   :  { %4397 = vmatprep.subr.bf16.mxu1 %v3587_v10  ;;  %v3581_v12 = vld [vmem:[#allocation8 + $0x18] sm:$0xff]  ;;  %v3582_v49 = vld [vmem:[#allocation8 + $0x20] sm:$0xff]  ;;  %v3591_v25 = vld [vmem:[#allocation8 + $0x68] sm:$0xff] }
 0xb52   :  { %v3583_v29 = vld [vmem:[#allocation8 + $0x28] sm:$0xff]  ;;  %v3592_v60 = vld [vmem:[#allocation8 + $0x70] sm:$0xff]  ;;  %v3593_v4 = vld [vmem:[#allocation8 + $0x78] sm:$0xff] }
 0xb53   :  { %v3584_v27 = vld [vmem:[#allocation8 + $0x30] sm:$0xff]  ;;  %v3585_v7 = vld [vmem:[#allocation8 + $0x38] sm:$0xff]  ;;  %v3602_v51 = vld [vmem:[#allocation8 + $0xc0] sm:$0xff] }
 0xb54   :  { %4398 = vmatpush3.bf16.msra.mxu1 %v3579_v57  ;;  %v3594_v2 = vld [vmem:[#allocation8 + $0x80] sm:$0xff]  ;;  %v3603_v0 = vld [vmem:[#allocation8 + $0xc8] sm:$0xff]  ;;  %v3604_v50 = vld [vmem:[#allocation8 + $0xd0] sm:$0xff] }
 0xb55   :  { %4399 = vmatprep.subr.bf16.mxu1 %v3588_v41  ;;  %v3595_v63 = vld [vmem:[#allocation8 + $0x88] sm:$0xff]  ;;  %v3596_v22 = vld [vmem:[#allocation8 + $0x90] sm:$0xff]  ;;  %v3605_v3 = vld [vmem:[#allocation8 + $0xd8] sm:$0xff] }
 0xb56   :  { %v3597_v37 = vld [vmem:[#allocation8 + $0x98] sm:$0xff]  ;;  %v3606_v26 = vld [vmem:[#allocation8 + $0xe0] sm:$0xff]  ;;  %v3607_v32 = vld [vmem:[#allocation8 + $0xe8] sm:$0xff] }
 0xb57   :  { %v3598_v5 = vld [vmem:[#allocation8 + $0xa0] sm:$0xff]  ;;  %v3599_v58 = vld [vmem:[#allocation8 + $0xa8] sm:$0xff]  ;;  %v3608_v20 = vld [vmem:[#allocation8 + $0xf0] sm:$0xff] }
 0xb58   :  { %4400 = vmatpush3.bf16.msra.mxu1 %v3580_v47  ;;  %v3600_v21 = vld [vmem:[#allocation8 + $0xb0] sm:$0xff]  ;;  %v3609_v42 = vld [vmem:[#allocation8 + $0xf8] sm:$0xff] }
 0xb59   :  { %4401 = vmatprep.subr.bf16.mxu1 %v3589_v62  ;;  %v3601_v18 = vld [vmem:[#allocation8 + $0xb8] sm:$0xff]  ;;  %v4312_v36 = vld [vmem:[#allocation26] ss:$0 sm:$0xff] }
 0xb5c   :  { %4402 = vmatpush3.bf16.msra.mxu1 %v3581_v12 }
 0xb5d   :  { %4403 = vmatprep.subr.bf16.mxu1 %v3590_v33 }
 0xb60   :  { %4404 = vmatpush3.bf16.msra.mxu1 %v3582_v49 }
 0xb61   :  { %4405 = vmatprep.subr.bf16.mxu1 %v3591_v25 }
 0xb64   :  { %4406 = vmatpush3.bf16.msra.mxu1 %v3583_v29 }
 0xb65   :  { %4407 = vmatprep.subr.bf16.mxu1 %v3592_v60 }
 0xb68   :  { %4408 = vmatpush3.bf16.msra.mxu1 %v3584_v27 }
 0xb69   :  { %4409 = vmatprep.subr.bf16.mxu1 %v3593_v4 }
 0xb6c   :  { %4410 = vmatpush3.bf16.msra.mxu1 %v3585_v7 }
 0xb6d   :  { %4423 = vmatprep.subr.bf16.mxu1 %v3602_v51 }
 0xb6f   :  { %3650 = vmatmul.mubr.bf16.vlgmr.msra.gmra.mrb[24].mxu1 %v3570_v46 }
 0xb70   :  { %4424 = vmatpush3.bf16.msra.mxu1 %v3594_v2  ;;  %3657 = vmatprep.mubr.bf16.mxu1 %v3575_v30 }
 0xb71   :  { %4425 = vmatprep.subr.bf16.mxu1 %v3603_v0 }
 0xb74   :  { %4426 = vmatpush3.bf16.msra.mxu1 %v3595_v63 }
 0xb75   :  { %4427 = vmatprep.subr.bf16.mxu1 %v3604_v50 }
 0xb77   :  { %3658 = vmatmul.mubr.bf16.gmra.mrb[28].mxu1 %v3574_v28 }
 0xb78   :  { %4428 = vmatpush3.bf16.msra.mxu1 %v3596_v22  ;;  %3698 = vmatprep.mubr.bf16.mxu1 %v3573_v54 }
 0xb79   :  { %4429 = vmatprep.subr.bf16.mxu1 %v3605_v3 }
 0xb7c   :  { %4430 = vmatpush3.bf16.msra.mxu1 %v3597_v37 }
 0xb7d   :  { %4431 = vmatprep.subr.bf16.mxu1 %v3606_v26 }
 0xb80   :  { %4432 = vmatpush3.bf16.msra.mxu1 %v3598_v5 }
 0xb81   :  { %4433 = vmatprep.subr.bf16.mxu1 %v3607_v32 }
 0xb84   :  { %4434 = vmatpush3.bf16.msra.mxu1 %v3599_v58 }
 0xb85   :  { %4435 = vmatprep.subr.bf16.mxu1 %v3608_v20 }
 0xb88   :  { %4436 = vmatpush3.bf16.msra.mxu1 %v3600_v21 }
 0xb89   :  { %4437 = vmatprep.subr.bf16.mxu1 %v3609_v42 }
 0xb8c   :  { %4438 = vmatpush3.bf16.msra.mxu1 %v3601_v18 }
 0xb8f   :  { %3699 = vmatmul.mubr.bf16.vlgmr.msra.gmra.mrb[32].mxu1 %v3572_v53 }
 0xb90   :  { %3706 = vmatprep.mubr.bf16.mxu1 %v3577_v34 }
 0xb97   :  { %3707 = vmatmul.mubr.bf16.gmra.mrb[36].mxu1 %v3576_v40 }
 0xc42   :  { %v4411_v6 = vpop.f32.mrb[24].mxu1 }
 0xc43   :  { %v4412_v19 = vpop.f32.mrb[25].mxu1 }
 0xc44   :  { %v4413_v8 = vadd.f32 %v4412_v19, %v4411_v6  ;;  %v4414_v38 = vpop.f32.mrb[26].mxu1 }
 0xc45   :  { %v4415_v59 = vpop.f32.mrb[27].mxu1 }
 0xc46   :  { %v4416_v56 = vadd.f32 %v4415_v59, %v4414_v38  ;;  %v3652_v24 = vadd.f32 %v4413_v8, %v4312_v36 }
 0xc48   :  { %v3655_v61 = vadd.f32 %v4416_v56, %v4312_v36 }
 0xc4a   :  { %v4417_v43 = vpop.f32.mrb[28].mxu1 }
 0xc4b   :  { %v4418_v48 = vpop.f32.mrb[29].mxu1 }
 0xc4c   :  { %v4419_v39 = vadd.f32 %v4418_v48, %v4417_v43  ;;  %v4420_v45 = vpop.f32.mrb[30].mxu1 }
 0xc4d   :  { %v4421_v1 = vpop.f32.mrb[31].mxu1 }
 0xc4e   :  { %v4422_v23 = vadd.f32 %v4421_v1, %v4420_v45  ;;  %v3660_v25 = vadd.f32 %v4419_v39, %v4312_v36 }
 0xc50   :  { %v3663_v4 = vadd.f32 %v4422_v23, %v4312_v36 }
 0xc62   :  { %v4439_v55 = vpop.f32.mrb[32].mxu1 }
 0xc63   :  { %v4440_v31 = vpop.f32.mrb[33].mxu1 }
 0xc64   :  { %v4441_v10 = vadd.f32 %v4440_v31, %v4439_v55  ;;  %v4442_v35 = vpop.f32.mrb[34].mxu1 }
 0xc65   :  { %v4443_v17 = vpop.f32.mrb[35].mxu1 }
 0xc66   :  { %v3701_v57 = vadd.f32 %v4441_v10, %v3652_v24  ;;  %v4444_v41 = vadd.f32 %v4443_v17, %v4442_v35 }
 0xc68   :  { %v3715_v47 = vadd.f32 %v3701_v57, %v6207_v14  ;;  %v3704_v62 = vadd.f32 %v4444_v41, %v3655_v61 }
 0xc6a   :  { %v3716_v12 = vadd.f32 %v3704_v62, %v6210_v9  ;;  %v4445_v33 = vpop.f32.mrb[36].mxu1 }
 0xc6b   :  { %v4446_v49 = vpop.f32.mrb[37].mxu1 }
 0xc6c   :  { %v4447_v29 = vadd.f32 %v4446_v49, %v4445_v33  ;;  %v4448_v60 = vpop.f32.mrb[38].mxu1 }
 0xc6d   :  { %v4449_v27 = vpop.f32.mrb[39].mxu1 }
 0xc6e   :  { %v3709_v7 = vadd.f32 %v4447_v29, %v3660_v25  ;;  %v4450_v51 = vadd.f32 %v4449_v27, %v4448_v60 }
 0xc70   :  { %v6621_v46 = vadd.f32 %v3709_v7, %v6213_v52  ;;  %v3712_v30 = vadd.f32 %v4450_v51, %v3663_v4 }
 0xc72   :  { %v6624_v2 = vadd.f32 %v3712_v30, %v6216_v44 }
 0xc73   :  { %5299 = dma.done.wait [#allocation12 + $0x7], 3072 }
 0xc74   :  { %5300 = vsyncadd [#allocation12 + $0x7], 4294964224  ;;  %v3724_v0 = vpack.c.bf16 %v6210_v9, %v6207_v14  ;;  %v3725_v63 = vpack.c.bf16 %v3716_v12, %v3715_v47  ;;  %v3737_v50 = vld [vmem:[#allocation9 + $0x40] sm:$0xff]  ;;  %v3738_v54 = vld [vmem:[#allocation9 + $0x48] sm:$0xff]  ;;  %v3723_v56 = vpack.c.bf16 %v5788_v16, %v5784_v13  ;;  %v3728_v43 = vpack.c.bf16 %v6624_v2, %v6621_v46 }
 0xc75   :  { %v3729_v28 = vld [vmem:[#allocation9] sm:$0xff]  ;;  %4451 = vmatprep.subr.bf16.mxu1 %v3737_v50  ;;  %v3746_v3 = vld [vmem:[#allocation9 + $0x88] sm:$0xff]  ;;  %v3739_v26 = vld [vmem:[#allocation9 + $0x50] sm:$0xff]  ;;  %v3727_v48 = vpack.c.bf16 %v6216_v44, %v6213_v52  ;;  %v3726_v39 = vpack.c.bf16 %v5786_v15, %v5782_v11 }
 0xc76   :  { %3792 = vmatprep.mubr.bf16.mxu1 %v3724_v0  ;;  %4562 = vmatprep.mubr.bf16.mxu0 %v3725_v63  ;;  %v3745_v22 = vld [vmem:[#allocation9 + $0x80] sm:$0xff]  ;;  %v3730_v37 = vld [vmem:[#allocation9 + $0x8] sm:$0xff]  ;;  %v3747_v5 = vld [vmem:[#allocation9 + $0x90] sm:$0xff] }
 0xc77   :  { %4452 = vmatpush3.bf16.msra.mxu1 %v3729_v28  ;;  %4546 = vmatprep.subr.bf16.mxu0 %v3745_v22  ;;  %v3731_v14 = vld [vmem:[#allocation9 + $0x10] sm:$0xff]  ;;  %v3740_v9 = vld [vmem:[#allocation9 + $0x58] sm:$0xff]  ;;  %v3741_v20 = vld [vmem:[#allocation9 + $0x60] sm:$0xff] }
 0xc78   :  { %4453 = vmatprep.subr.bf16.mxu1 %v3738_v54  ;;  %4547 = vmatpush3.bf16.msra.mxu0 %v3745_v22  ;;  %v3748_v32 = vld [vmem:[#allocation9 + $0x98] sm:$0xff]  ;;  %v3749_v21 = vld [vmem:[#allocation9 + $0xa0] sm:$0xff]  ;;  %v3742_v18 = vld [vmem:[#allocation9 + $0x68] sm:$0xff] }
 0xc79   :  { %4548 = vmatprep.subr.bf16.mxu0 %v3746_v3  ;;  %v3732_v58 = vld [vmem:[#allocation9 + $0x18] sm:$0xff]  ;;  %v3733_v42 = vld [vmem:[#allocation9 + $0x20] sm:$0xff]  ;;  %v3750_v53 = vld [vmem:[#allocation9 + $0xa8] sm:$0xff] }
 0xc7a   :  { %v3734_v34 = vld [vmem:[#allocation9 + $0x28] sm:$0xff]  ;;  %v3743_v40 = vld [vmem:[#allocation9 + $0x70] sm:$0xff]  ;;  %v3744_v8 = vld [vmem:[#allocation9 + $0x78] sm:$0xff] }
 0xc7b   :  { %4454 = vmatpush3.bf16.msra.mxu1 %v3730_v37  ;;  %v3751_v6 = vld [vmem:[#allocation9 + $0xb0] sm:$0xff]  ;;  %v3752_v38 = vld [vmem:[#allocation9 + $0xb8] sm:$0xff] }
 0xc7c   :  { %4455 = vmatprep.subr.bf16.mxu1 %v3739_v26  ;;  %4549 = vmatpush3.bf16.msra.mxu0 %v3746_v3  ;;  %v3735_v19 = vld [vmem:[#allocation9 + $0x30] sm:$0xff]  ;;  %v3736_v59 = vld [vmem:[#allocation9 + $0x38] sm:$0xff] }
 0xc7d   :  { %4550 = vmatprep.subr.bf16.mxu0 %v3747_v5  ;;  %v4313_v36 = vld [vmem:[#allocation28] ss:$0 sm:$0xff] }
 0xc7f   :  { %4456 = vmatpush3.bf16.msra.mxu1 %v3731_v14 }
 0xc80   :  { %4457 = vmatprep.subr.bf16.mxu1 %v3740_v9  ;;  %4551 = vmatpush3.bf16.msra.mxu0 %v3747_v5 }
 0xc81   :  { %4552 = vmatprep.subr.bf16.mxu0 %v3748_v32 }
 0xc83   :  { %4458 = vmatpush3.bf16.msra.mxu1 %v3732_v58 }
 0xc84   :  { %4459 = vmatprep.subr.bf16.mxu1 %v3741_v20  ;;  %4553 = vmatpush3.bf16.msra.mxu0 %v3748_v32 }
 0xc85   :  { %4554 = vmatprep.subr.bf16.mxu0 %v3749_v21 }
 0xc87   :  { %4460 = vmatpush3.bf16.msra.mxu1 %v3733_v42 }
 0xc88   :  { %4461 = vmatprep.subr.bf16.mxu1 %v3742_v18  ;;  %4555 = vmatpush3.bf16.msra.mxu0 %v3749_v21 }
 0xc89   :  { %4556 = vmatprep.subr.bf16.mxu0 %v3750_v53 }
 0xc8b   :  { %4462 = vmatpush3.bf16.msra.mxu1 %v3734_v34 }
 0xc8c   :  { %4463 = vmatprep.subr.bf16.mxu1 %v3743_v40  ;;  %4557 = vmatpush3.bf16.msra.mxu0 %v3750_v53 }
 0xc8d   :  { %4558 = vmatprep.subr.bf16.mxu0 %v3751_v6 }
 0xc8f   :  { %4464 = vmatpush3.bf16.msra.mxu1 %v3735_v19 }
 0xc90   :  { %4465 = vmatprep.subr.bf16.mxu1 %v3744_v8  ;;  %4559 = vmatpush3.bf16.msra.mxu0 %v3751_v6 }
 0xc91   :  { %4560 = vmatprep.subr.bf16.mxu0 %v3752_v38 }
 0xc93   :  { %4466 = vmatpush3.bf16.msra.mxu1 %v3736_v59 }
 0xc94   :  { %4561 = vmatpush3.bf16.msra.mxu0 %v3752_v38 }
 0xc96   :  { %3793 = vmatmul.mubr.bf16.vlgmr.msra.gmra.mrb[40].mxu1 %v3723_v56 }
 0xc97   :  { %4563 = vmatmul.mubr.bf16.vlgmr.msra.gmra.mrb[44].mxu0 %v3728_v43  ;;  %3800 = vmatprep.mubr.bf16.mxu1 %v3727_v48 }
 0xc9e   :  { %3801 = vmatmul.mubr.bf16.gmra.mrb[44].mxu1 %v3726_v39 }
 0xd69   :  { %v4467_v45 = vpop.f32.mrb[40].mxu1 }
 0xd6a   :  { %v4468_v1 = vpop.f32.mrb[41].mxu1  ;;  %v4564_v23 = vpop.f32.mrb[44].mxu0 }
 0xd6b   :  { %v4469_v13 = vadd.f32 %v4468_v1, %v4467_v45  ;;  %v4470_v16 = vpop.f32.mrb[42].mxu1  ;;  %v3843_v55 = vpop.f32.mrb[45].mxu0 }
 0xd6c   :  { %v4471_v31 = vpop.f32.mrb[43].mxu1  ;;  %v4565_v24 = vpop.f32.mrb[46].mxu0 }
 0xd6d   :  { %v4472_v10 = vadd.f32 %v4471_v31, %v4470_v16  ;;  %v3795_v35 = vadd.f32 %v4469_v13, %v4313_v36  ;;  %v3846_v52 = vpop.f32.mrb[47].mxu0 }
 0xd6f   :  { %v3844_v44 = vadd.f32 %v3843_v55, %v3795_v35  ;;  %v3798_v17 = vadd.f32 %v4472_v10, %v4313_v36 }
 0xd71   :  { %v3847_v61 = vadd.f32 %v3846_v52, %v3798_v17  ;;  %v4473_v57 = vpop.f32.mrb[44].mxu1 }
 0xd72   :  { %v4474_v41 = vpop.f32.mrb[45].mxu1 }
 0xd73   :  { %v4475_v47 = vadd.f32 %v4474_v41, %v4473_v57  ;;  %v4476_v11 = vpop.f32.mrb[46].mxu1 }
 0xd74   :  { %v4477_v15 = vpop.f32.mrb[47].mxu1 }
 0xd75   :  { %v3803_v62 = vadd.f32 %v4475_v47, %v4313_v36  ;;  %v4478_v12 = vadd.f32 %v4477_v15, %v4476_v11 }
 0xd77   :  { %v3852_v33 = vadd.f32 %v4564_v23, %v3803_v62  ;;  %v3806_v49 = vadd.f32 %v4478_v12, %v4313_v36 }
 0xd79   :  { %v6636_v25 = vadd.f32 %v4565_v24, %v3806_v49 }
 0xd7a   :  { %5301 = dma.done.wait [#allocation12 + $0x8], 3072 }
 0xd7b   :  { %5302 = vsyncadd [#allocation12 + $0x8], 4294964224  ;;  %v6638_v29 = vrot.slane %v3844_v44, 7  ;;  %v3865_v60 = vrot.slane %v3847_v61, 7  ;;  %v3926_v37 = vld [vmem:[#allocation10 + $0x40] sm:$0xff]  ;;  %v3927_v5 = vld [vmem:[#allocation10 + $0x48] sm:$0xff] }
 0xd7c   :  { %v3918_v26 = vld [vmem:[#allocation10] sm:$0xff]  ;;  %4489 = vmatprep.subr.bf16.mxu1 %v3926_v37  ;;  %v3935_v32 = vld [vmem:[#allocation10 + $0x88] sm:$0xff]  ;;  %v3928_v20 = vld [vmem:[#allocation10 + $0x50] sm:$0xff]  ;;  %v3867_v8 = vrot.slane %v3852_v33, 7  ;;  %v3868_v38 = vrot.slane %v6636_v25, 7 }
 0xd7d   :  { %v6642_v27 = vsel %vm407_vm0, %v6638_v29, %v3865_v60  ;;  %v3876_v4 = vsel %vm407_vm0, 0.0, %v6638_v29  ;;  %v3878_v7 = vsel %vm407_vm0, %v3865_v60, 0.0  ;;  %v3934_v9 = vld [vmem:[#allocation10 + $0x80] sm:$0xff]  ;;  %4490 = vmatpush3.bf16.msra.mxu1 %v3918_v26  ;;  %v3919_v58 = vld [vmem:[#allocation10 + $0x8] sm:$0xff]  ;;  %v3936_v21 = vld [vmem:[#allocation10 + $0x90] sm:$0xff] }
 0xd7e   :  { %v3884_v51 = vrot.slane %v3876_v4, 1  ;;  %v3885_v46 = vrot.slane %v6642_v27, 1  ;;  %v3887_v30 = vrot.slane %v3878_v7, 1  ;;  %v3898_v2 = vrot.slane %v3876_v4, 2  ;;  %4566 = vmatprep.subr.bf16.mxu0 %v3934_v9  ;;  %4491 = vmatprep.subr.bf16.mxu1 %v3927_v5  ;;  %v3920_v42 = vld [vmem:[#allocation10 + $0x10] sm:$0xff]  ;;  %v3929_v18 = vld [vmem:[#allocation10 + $0x58] sm:$0xff]  ;;  %vm4315_vm3 = vmneg %vm407_vm0 }
 0xd7f   :  { %v3899_v0 = vrot.slane %v6642_v27, 2  ;;  %v3901_v63 = vrot.slane %v3878_v7, 2  ;;  %4567 = vmatpush3.bf16.msra.mxu0 %v3934_v9  ;;  %v3937_v53 = vld [vmem:[#allocation10 + $0x98] sm:$0xff]  ;;  %v3930_v40 = vld [vmem:[#allocation10 + $0x60] sm:$0xff]  ;;  %v3931_v59 = vld [vmem:[#allocation10 + $0x68] sm:$0xff]  ;;  %v3869_v48 = vsel %vm407_vm0, %v3867_v8, %v3868_v38  ;;  %v3877_v39 = vsel %vm407_vm0, 0.0, %v3867_v8 }
 0xd80   :  { %v3886_v50 = vsel %vm428_vm1, %v3884_v51, %v3885_v46  ;;  %v3888_v28 = vsel %vm428_vm1, %v3885_v46, %v3887_v30  ;;  %4568 = vmatprep.subr.bf16.mxu0 %v3935_v32  ;;  %v3921_v34 = vld [vmem:[#allocation10 + $0x18] sm:$0xff]  ;;  %v3938_v6 = vld [vmem:[#allocation10 + $0xa0] sm:$0xff]  ;;  %v3939_v56 = vld [vmem:[#allocation10 + $0xa8] sm:$0xff]  ;;  %v3879_v1 = vsel %vm407_vm0, %v3868_v38, 0.0  ;;  %v3903_v36 = vrot.slane %v3877_v39, 2 }
 0xd81   :  { %v3913_v54 = vpack.c.bf16 %v3888_v28, %v3886_v50  ;;  %v3900_v22 = vsel %vm439_vm2, %v3898_v2, %v3899_v0  ;;  %v3902_v3 = vsel %vm439_vm2, %v3899_v0, %v3901_v63  ;;  %4492 = vmatpush3.bf16.msra.mxu1 %v3919_v58  ;;  %v3922_v19 = vld [vmem:[#allocation10 + $0x20] sm:$0xff]  ;;  %v3923_v43 = vld [vmem:[#allocation10 + $0x28] sm:$0xff]  ;;  %v3932_v45 = vld [vmem:[#allocation10 + $0x70] sm:$0xff]  ;;  %v3904_v13 = vrot.slane %v3869_v48, 2 }
 0xd82   :  { %v3914_v14 = vpack.c.bf16 %v3902_v3, %v3900_v22  ;;  %4493 = vmatprep.subr.bf16.mxu1 %v3928_v20  ;;  %v3940_v23 = vld [vmem:[#allocation10 + $0xb0] sm:$0xff]  ;;  %v3906_v55 = vrot.slane %v3879_v1, 2  ;;  %v3889_v31 = vrot.slane %v3877_v39, 1  ;;  %v3890_v24 = vrot.slane %v3869_v48, 1  ;;  %v3933_v35 = vld [vmem:[#allocation10 + $0x78] sm:$0xff]  ;;  %vm4316_vm4 = vmpackc.low %vm5345_vm14, %vm4315_vm3 }
 0xd83   :  { %3981 = vmatprep.mubr.bf16.mxu1 %v3913_v54  ;;  %4569 = vmatpush3.bf16.msra.mxu0 %v3935_v32  ;;  %v3924_v16 = vld [vmem:[#allocation10 + $0x30] sm:$0xff]  ;;  %v3892_v10 = vrot.slane %v3879_v1, 1  ;;  %v3941_v52 = vld [vmem:[#allocation10 + $0xb8] sm:$0xff]  ;;  %v3905_v44 = vsel %vm439_vm2, %v3903_v36, %v3904_v13  ;;  %v4317_v47 = vpack.c.bf16 %v6642_v27, %v6638_v29  ;;  %v4321_v62 = vpack.c.bf16 %v3869_v48, %v3867_v8 }
 0xd84   :  { %4582 = vmatprep.mubr.bf16.mxu0 %v3914_v14  ;;  %4570 = vmatprep.subr.bf16.mxu0 %v3936_v21  ;;  %v3925_v17 = vld [vmem:[#allocation10 + $0x38] sm:$0xff]  ;;  %v3907_v61 = vsel %vm439_vm2, %v3904_v13, %v3906_v55  ;;  %v3891_v57 = vsel %vm428_vm1, %v3889_v31, %v3890_v24  ;;  %v4314_v25 = vld [vmem:[#allocation29] ss:$0 sm:$0xff] }
 0xd85   :  { %4494 = vmatpush3.bf16.msra.mxu1 %v3920_v42  ;;  %v3893_v41 = vsel %vm428_vm1, %v3890_v24, %v3892_v10  ;;  %v3917_v11 = vpack.c.bf16 %v3907_v61, %v3905_v44 }
 0xd86   :  { %4495 = vmatprep.subr.bf16.mxu1 %v3929_v18  ;;  %v3916_v15 = vpack.c.bf16 %v3893_v41, %v3891_v57 }
 0xd87   :  { %4571 = vmatpush3.bf16.msra.mxu0 %v3936_v21 }
 0xd88   :  { %4572 = vmatprep.subr.bf16.mxu0 %v3937_v53 }
 0xd89   :  { %4496 = vmatpush3.bf16.msra.mxu1 %v3921_v34 }
 0xd8a   :  { %4497 = vmatprep.subr.bf16.mxu1 %v3930_v40 }
 0xd8b   :  { %4573 = vmatpush3.bf16.msra.mxu0 %v3937_v53 }
 0xd8c   :  { %4574 = vmatprep.subr.bf16.mxu0 %v3938_v6 }
 0xd8d   :  { %4498 = vmatpush3.bf16.msra.mxu1 %v3922_v19 }
 0xd8e   :  { %4499 = vmatprep.subr.bf16.mxu1 %v3931_v59 }
 0xd8f   :  { %4575 = vmatpush3.bf16.msra.mxu0 %v3938_v6 }
 0xd90   :  { %4576 = vmatprep.subr.bf16.mxu0 %v3939_v56 }
 0xd91   :  { %4500 = vmatpush3.bf16.msra.mxu1 %v3923_v43 }
 0xd92   :  { %4501 = vmatprep.subr.bf16.mxu1 %v3932_v45 }
 0xd93   :  { %4577 = vmatpush3.bf16.msra.mxu0 %v3939_v56 }
 0xd94   :  { %4578 = vmatprep.subr.bf16.mxu0 %v3940_v23 }
 0xd95   :  { %4502 = vmatpush3.bf16.msra.mxu1 %v3924_v16 }
 0xd96   :  { %4503 = vmatprep.subr.bf16.mxu1 %v3933_v35 }
 0xd97   :  { %4579 = vmatpush3.bf16.msra.mxu0 %v3940_v23 }
 0xd98   :  { %4580 = vmatprep.subr.bf16.mxu0 %v3941_v52 }
 0xd99   :  { %4504 = vmatpush3.bf16.msra.mxu1 %v3925_v17 }
 0xd9b   :  { %4581 = vmatpush3.bf16.msra.mxu0 %v3941_v52 }
 0xd9c   :  { %4318 = vmatmul.mubr.msk.bf16.vlgmr.msra.gmra.mrb[48].mxu1 %vm4316_vm4, %v4317_v47 }
 0xd9d   :  { %3989 = vmatprep.mubr.bf16.mxu1 %v3916_v15 }
 0xd9e   :  { %4583 = vmatmul.mubr.bf16.vlgmr.msra.gmra.mrb[48].mxu0 %v3917_v11 }
 0xda4   :  { %4322 = vmatmul.mubr.msk.bf16.gmra.mrb[52].mxu1 %vm4316_vm4, %v4321_v62 }
 0xe6f   :  { %v4505_v12 = vpop.f32.mrb[48].mxu1 }
 0xe70   :  { %v4506_v33 = vpop.f32.mrb[49].mxu1 }
 0xe71   :  { %v4584_v49 = vpop.f32.mrb[48].mxu0  ;;  %v4507_v60 = vadd.f32 %v4506_v33, %v4505_v12  ;;  %v4508_v4 = vpop.f32.mrb[50].mxu1 }
 0xe72   :  { %v4032_v7 = vpop.f32.mrb[49].mxu0  ;;  %v4509_v51 = vpop.f32.mrb[51].mxu1 }
 0xe73   :  { %v4585_v29 = vpop.f32.mrb[50].mxu0  ;;  %v4510_v27 = vadd.f32 %v4509_v51, %v4508_v4  ;;  %v3984_v46 = vadd.f32 %v4507_v60, %v4314_v25 }
 0xe74   :  { %v4035_v30 = vpop.f32.mrb[51].mxu0 }
 0xe75   :  { %v4033_v2 = vadd.f32 %v4032_v7, %v3984_v46  ;;  %v3987_v0 = vadd.f32 %v4510_v27, %v4314_v25 }
 0xe77   :  { %v4036_v63 = vadd.f32 %v4035_v30, %v3987_v0  ;;  %v4511_v50 = vpop.f32.mrb[52].mxu1 }
 0xe78   :  { %v4512_v28 = vpop.f32.mrb[53].mxu1 }
 0xe79   :  { %v4513_v54 = vadd.f32 %v4512_v28, %v4511_v50  ;;  %v4514_v22 = vpop.f32.mrb[54].mxu1 }
 0xe7a   :  { %v4515_v3 = vpop.f32.mrb[55].mxu1 }
 0xe7b   :  { %v3992_v37 = vadd.f32 %v4513_v54, %v4314_v25  ;;  %v4516_v26 = vadd.f32 %v4515_v3, %v4514_v22 }
 0xe7d   :  { %v4041_v5 = vadd.f32 %v4584_v49, %v3992_v37  ;;  %v3995_v14 = vadd.f32 %v4516_v26, %v4314_v25 }
 0xe7f   :  { %v4044_v9 = vadd.f32 %v4585_v29, %v3995_v14 }
 0xe80   :  { %5303 = dma.done.wait [#allocation12 + $0x9], 1024 }
 0xe81   :  { %5304 = vsyncadd [#allocation12 + $0x9], 4294966272  ;;  %v4051_v32 = vadd.f32 %v4036_v63, %v4033_v2  ;;  %v4058_v58 = vadd.f32 %v4044_v9, %v4041_v5  ;;  %v5347_v20 = vmov 0.0   ;;  %vm5348_vm0 = vmmov 0   ;;  %v4067_v34 = vld [vmem:[#allocation11] sm:$0xff]  ;;  %v4068_v19 = vld [vmem:[#allocation11 + $0x8] sm:$0xff] }
 0xe82   :  { %4586 = vmatprep.subr.bf16.mxu1 %v5347_v20  ;;  %4602 = vmatprep.mubr.msk.bf16.mxu1 %vm5348_vm0, %v5347_v20  ;;  %v4069_v59 = vld [vmem:[#allocation11 + $0x10] sm:$0xff]  ;;  %v4070_v48 = vld [vmem:[#allocation11 + $0x18] sm:$0xff]  ;;  %v4071_v1 = vld [vmem:[#allocation11 + $0x20] sm:$0xff]  ;;  %vm4086_vm1 = vcmask 1041409   ;;  %s5349_s14 = smov [#allocation32]  }
 0xe83   :  { %v4052_v21 = vrot.slane %v4051_v32, 4  ;;  %v4059_v42 = vrot.slane %v4058_v58, 4  ;;  %4587 = vmatpush3.bf16.msra.mxu1 %v4067_v34  ;;  %v4072_v13 = vld [vmem:[#allocation11 + $0x28] sm:$0xff]  ;;  %v4073_v31 = vld [vmem:[#allocation11 + $0x30] sm:$0xff]  ;;  %v4074_v10 = vld [vmem:[#allocation11 + $0x38] sm:$0xff]  ;;  %s4137_s22 = sshll.u32 %s5349_s14, 4  ;;  %s4138_s22 = int_to_ptr.vmem [resolvable:$true] %s4137_s22 }
 0xe84   :  { %4588 = vmatprep.subr.bf16.mxu1 %v5347_v20  ;;  %v4323_v52 = vld [vmem:[#allocation31] ss:$0 sm:$0xff]  ;;  %s5251_s18 = scalar_lea.vmem %s4138_s22, 32  ;;  %p5256_p11 = scmp.lt.s32.totalorder %s4138_s22, %s4138_s22 }
 0xe85   :  { %v4053_v18 = vadd.f32 %v4052_v21, %v4051_v32  ;;  %v4060_v53 = vadd.f32 %v4059_v42, %v4058_v58  ;;  %p5252_p10 = scmp.ne.s32.totalorder %s4138_s22, %s5251_s18  ;;  %p5257_p12 = scmp.lt.s32.totalorder %s5251_s18, %s5251_s18 }
 0xe87   :  { %v4054_v40 = vrot.slane %v4053_v18, 2  ;;  %v4061_v6 = vrot.slane %v4060_v53, 2  ;;  %4589 = vmatpush3.bf16.msra.mxu1 %v4068_v19  ;;  %p5258_p13 = por %p5257_p12, %p5256_p11 }
 0xe88   :  { %4590 = vmatprep.subr.bf16.mxu1 %v5347_v20 }
 0xe89   :  { %v4055_v8 = vadd.f32 %v4054_v40, %v4053_v18  ;;  %v4062_v38 = vadd.f32 %v4061_v6, %v4060_v53  ;;  %p5259_p0 = pnand %p5258_p13, %p5252_p10 }
 0xe8b   :  { %4591 = vmatpush3.bf16.msra.mxu1 %v4069_v59  ;;  %v4056_v56 = vrot.slane %v4055_v8, 1  ;;  %v4063_v43 = vrot.slane %v4062_v38, 1 }
 0xe8c   :  { %4592 = vmatprep.subr.bf16.mxu1 %v5347_v20 }
 0xe8d   :  { %v4057_v39 = vadd.f32 %v4056_v56, %v4055_v8  ;;  %v4064_v45 = vadd.f32 %v4063_v43, %v4062_v38 }
 0xe8f   :  { %4593 = vmatpush3.bf16.msra.mxu1 %v4070_v48  ;;  %v4065_v23 = vpack.c.bf16 %v4057_v39, %v4057_v39  ;;  %v4066_v36 = vpack.c.bf16 %v4064_v45, %v4064_v45 }
 0xe90   :  { %4594 = vmatprep.subr.bf16.mxu1 %v5347_v20 }
 0xe91   :  { %v4084_v16 = vunpack.c.l.b16 %v4065_v23  ;;  %v4085_v55 = vunpack.c.l.b16 %v4066_v36 }
 0xe93   :  { %4595 = vmatpush3.bf16.msra.mxu1 %v4071_v1  ;;  %v4087_v24 = vsel %vm4086_vm1, %v4085_v55, %v4084_v16 }
 0xe94   :  { %4596 = vmatprep.subr.bf16.mxu1 %v5347_v20  ;;  %v4088_v35 = vpack.c.b16 %v4087_v24, %v4087_v24 }
 0xe97   :  { %4597 = vmatpush3.bf16.msra.mxu1 %v4072_v13 }
 0xe98   :  { %4598 = vmatprep.subr.bf16.mxu1 %v5347_v20 }
 0xe9b   :  { %4599 = vmatpush3.bf16.msra.mxu1 %v4073_v31 }
 0xe9c   :  { %4600 = vmatprep.subr.bf16.mxu1 %v5347_v20 }
 0xe9f   :  { %4601 = vmatpush3.bf16.msra.mxu1 %v4074_v10 }
 0xea2   :  { %4603 = vmatmul.mubr.bf16.vlgmr.msra.gmra.mrb[56].mxu1 %v4088_v35 }
 0xf75   :  { %v4124_v44 = vpop.f32.mrb[56].mxu1 }
 0xf76   :  { %v4125_v17 = vadd.f32 %v4323_v52, %v4124_v44  ;;  %v4604_v61 = vpop.f32.mrb[57].mxu1 }
 0xf77   :  { %v4127_v57 = vpop.f32.mrb[58].mxu1 }
 0xf78   :  { %4130 = vst [vmem:[#allocation32] sm:$0x3] %v4125_v17  ;;  %v4605_v41 = vpop.f32.mrb[59].mxu1 }
 0xf79   :  { %5262 = shalt.err (!%p5259_p0)
}
 0xf7a   :  { %s6724_s16 = sld [smem:[#allocation79_spill]] }
 0xf80   :  { %s5263_s29 = scalar_lea.hbm %s6724_s16, 32 }
 0xf81   :  { %p5264_p1 = scmp.ne.s32.totalorder %s6724_s16, %s5263_s29  ;;  %p5267_p2 = scmp.lt.u32.totalorder %s5263_s29, %s6724_s16 }
 0xf83   :  { %p5269_p3 = pnand %p5267_p2, %p5264_p1 }
 0xf85   :  { %5272 = shalt.err (!%p5269_p3)
}
 0xf86   :  { %4140 = dma.vmem_to_hbm [thread:$0]  %s4138_s22, 32, %s6724_s16, [#allocation16]  }
 0xf87   :  { %5305 = dma.done.wait [#allocation16], 32  }
 0xf88   :  { %5306 = vsyncadd [#allocation16], 4294967264 }
 0xf89   :  { %4144 = vsyncpa [#allocation15], 1 }
 0xf8a   :  { %4145 = vsyncpa [#allocation18], 1 }
 0xf8b   :  { %4146 = vsyncpa [#allocation21], 1 }
 0xf8c   :  { %4147 = vsyncpa [#allocation24], 1 }
 0xf8d   :  { %4148 = vsyncpa [#allocation27], 1 }
 0xf8e   :  { %4149 = vsyncpa [#allocation30], 1 }
 0xf8f   :  { %4150 = vsyncpa [#allocation16], 1 }
 0xf90   :  { %4151 = vsyncmov [#allocation12] }
 0xf93   :  { %s4152_s23 = vpop.sfrf %4151 }
 0xf94   :  { %p4324_p4 = scmp.ne.s32.totalorder %s4152_s23, 0 }
 0xf96   :  { %4156 = shalt.err (%p4324_p4)  }
 0xf97   :  { %4158 = vsyncmov [#allocation12 + $0x1] }
 0xf9a   :  { %s4159_s30 = vpop.sfrf %4158 }
 0xf9b   :  { %p4325_p5 = scmp.ne.s32.totalorder %s4159_s30, 0 }
 0xf9d   :  { %4163 = shalt.err (%p4325_p5)  }
 0xf9e   :  { %4165 = vsyncmov [#allocation12 + $0x2] }
 0xfa1   :  { %s4166_s28 = vpop.sfrf %4165 }
 0xfa2   :  { %p4326_p6 = scmp.ne.s32.totalorder %s4166_s28, 0 }
 0xfa4   :  { %4170 = shalt.err (%p4326_p6)  }
 0xfa5   :  { %4172 = vsyncmov [#allocation12 + $0x3] }
 0xfa8   :  { %s4173_s24 = vpop.sfrf %4172 }
 0xfa9   :  { %p4327_p7 = scmp.ne.s32.totalorder %s4173_s24, 0 }
 0xfab   :  { %4177 = shalt.err (%p4327_p7)  }
 0xfac   :  { %4179 = vsyncmov [#allocation12 + $0x4] }
 0xfaf   :  { %s4180_s1 = vpop.sfrf %4179 }
 0xfb0   :  { %p4328_p8 = scmp.ne.s32.totalorder %s4180_s1, 0 }
 0xfb2   :  { %4184 = shalt.err (%p4328_p8)  }
 0xfb3   :  { %4186 = vsyncmov [#allocation12 + $0x5] }
 0xfb6   :  { %s4187_s6 = vpop.sfrf %4186 }
 0xfb7   :  { %p4329_p9 = scmp.ne.s32.totalorder %s4187_s6, 0 }
 0xfb9   :  { %4191 = shalt.err (%p4329_p9)  }
 0xfba   :  { %4193 = vsyncmov [#allocation12 + $0x6] }
 0xfbd   :  { %s4194_s13 = vpop.sfrf %4193 }
 0xfbe   :  { %p4330_p10 = scmp.ne.s32.totalorder %s4194_s13, 0 }
 0xfc0   :  { %4198 = shalt.err (%p4330_p10)  }
 0xfc1   :  { %4200 = vsyncmov [#allocation12 + $0x7] }
 0xfc4   :  { %s4201_s17 = vpop.sfrf %4200 }
 0xfc5   :  { %p4331_p11 = scmp.ne.s32.totalorder %s4201_s17, 0 }
 0xfc7   :  { %4205 = shalt.err (%p4331_p11)  }
 0xfc8   :  { %4207 = vsyncmov [#allocation12 + $0x8] }
 0xfcb   :  { %s4208_s9 = vpop.sfrf %4207 }
 0xfcc   :  { %p4332_p12 = scmp.ne.s32.totalorder %s4208_s9, 0 }
 0xfce   :  { %4212 = shalt.err (%p4332_p12)  }
 0xfcf   :  { %4214 = vsyncmov [#allocation12 + $0x9] }
 0xfd2   :  { %s4215_s0 = vpop.sfrf %4214 }
 0xfd3   :  { %p4333_p13 = scmp.ne.s32.totalorder %s4215_s0, 0 }
 0xfd5   :  { %4219 = shalt.err (%p4333_p13)  }

</bundles_post_ra>
